<compile_context>
chip_gen: v7x
topology: tpu7x:2x2x1
jax: 0.10.0
libtpu: 0.0.40
codegen_flags: <defaults>
</compile_context>

<pallas_src>
import functools

import jax
import jax.numpy as jnp
from jax import lax
from jax.experimental import pallas as pl
from jax.experimental.pallas import tpu as pltpu

_SLAB = 8  # timesteps per dense load/store slab (one f32 sublane group)


def _round_up(x, m):
    return -(-x // m) * m


def _gru_kernel(x0_ref, ufz_ref, ur_ref, kfzx_ref, krx_ref, wout_ref, bout_ref,
                y_ref, state_ref, *, hidden, chunk, slab):
    H = hidden

    # (Re)initialize the recurrent state from x0 at the first time-chunk of
    # every batch tile (batch tiles are the outer grid axis, chunks the inner).
    @pl.when(pl.program_id(1) == 0)
    def _():
        state_ref[...] = x0_ref[...]

    # Weights stay resident for the whole chunk (bf16 MXU operands).
    kfzx = kfzx_ref[...]          # (H, 2H)   fused [Kf_x | Kz_x]
    krx = krx_ref[...]            # (H, H)
    wout = wout_ref[...]          # (H, OUTp)
    bout = bout_ref[...]          # (1, OUTp) f32

    # TODO(synk): latch kfzx/krx in the MXU across the chunk with
    # pltpu.matmul_push_rhs / matmul_acc_lhs / matmul_pop once a bundle dump
    # confirms Mosaic does not already keep the constant RHS staged.

    n_slabs = chunk // slab

    def slab_body(s, carry):
        base = pl.multiple_of(s * slab, slab)
        # Dense 8-sublane slab loads (bf16) instead of per-step masked loads.
        up_fz_slab = ufz_ref[:, pl.ds(base, slab), :]     # (Bt, slab, 2H)
        up_r_slab = ur_ref[:, pl.ds(base, slab), :]       # (Bt, slab, H)

        x = state_ref[...]                                # (Bt, H) f32 carry
        xs = []
        for t in range(slab):                             # fully unrolled
            xs.append(x)                                  # pre-update state
            x_bf = x.astype(jnp.bfloat16)
            up_fz = up_fz_slab[:, t, :].astype(jnp.float32)
            up_r = up_r_slab[:, t, :].astype(jnp.float32)
            fz = jax.nn.sigmoid(
                up_fz + jnp.dot(x_bf, kfzx, preferred_element_type=jnp.float32))
            f = fz[:, :H]
            z = fz[:, H:]
            r = jnp.tanh(
                up_r + jnp.dot((f * x).astype(jnp.bfloat16), krx,
                               preferred_element_type=jnp.float32))
            x = (1.0 - z) * x + z * r                     # f32 blend / carry
        state_ref[...] = x

        # Output projection of the slab's 8 pre-update states: one MXU op per
        # slab (off the per-step serial chain), one dense (Bt, slab, OUTp) store.
        states = jnp.stack(xs, axis=1)                    # (Bt, slab, H) f32
        bt = states.shape[0]
        y2d = jnp.dot(states.reshape(bt * slab, H).astype(jnp.bfloat16), wout,
                      preferred_element_type=jnp.float32) + bout
        y_ref[:, pl.ds(base, slab), :] = y2d.reshape(bt, slab, -1)
        return carry

    lax.fori_loop(0, n_slabs, slab_body, 0)


@functools.partial(jax.jit, static_argnames=("hidden_states",))
def single_layer_gru_forward(u, x0, params, *, hidden_states):
    """u: (B, T, in_features), x0: (B, 1, hidden_states) -> y: (B, T, out_features)."""
    B, T, IN = u.shape
    H = hidden_states
    OUT = params["w_out"].shape[1]

    # ---- alignment padding (lane/sublane dense vregs, full MXU tiles) -----
    Hp = _round_up(H, 128)
    OUTp = _round_up(OUT, 128)
    Bp = _round_up(B, 8)
    if Bp >= 16:                       # give v7x's 2 TensorCores work to split
        Bp = _round_up(B, 16)
        Bt = Bp // 2
    else:
        Bt = Bp
    n_btiles = Bp // Bt

    # ---- weight prep: split input/recurrent rows, fuse f|z, zero-pad ------
    kernel_fz = params["kernel_fz"]            # (IN + H, 2H)
    kernel_r = params["kernel_r"]              # (IN + H, H)

    def pad_fz_cols(k):                        # (rows, 2H) -> (rows, 2Hp)
        return jnp.concatenate(
            [jnp.pad(k[:, :H], ((0, 0), (0, Hp - H))),
             jnp.pad(k[:, H:], ((0, 0), (0, Hp - H)))], axis=1)

    kfz_u = pad_fz_cols(kernel_fz[:IN, :])                                # (IN, 2Hp)
    kfzx = jnp.pad(pad_fz_cols(kernel_fz[IN:, :]), ((0, Hp - H), (0, 0)))  # (Hp, 2Hp)
    kr_u = jnp.pad(kernel_r[:IN, :], ((0, 0), (0, Hp - H)))               # (IN, Hp)
    krx = jnp.pad(kernel_r[IN:, :], ((0, Hp - H), (0, Hp - H)))           # (Hp, Hp)
    bias_fz = jnp.concatenate(
        [jnp.pad(params["bias_fz"][:H], (0, Hp - H)),
         jnp.pad(params["bias_fz"][H:], (0, Hp - H))])                    # (2Hp,)
    bias_r = jnp.pad(params["bias_r"], (0, Hp - H))                       # (Hp,)
    w_out = jnp.pad(params["w_out"], ((0, Hp - H), (0, OUTp - OUT)))      # (Hp, OUTp)
    b_out = jnp.pad(params["b_out"], (0, OUTp - OUT)).reshape(1, OUTp)    # (1, OUTp)

    # ---- hoisted input projections, streamed to the kernel in bf16 --------
    u_p = jnp.pad(u.astype(jnp.float32), ((0, Bp - B), (0, 0), (0, 0)))
    ufz = (jnp.einsum("bti,ih->bth", u_p, kfz_u) + bias_fz).astype(jnp.bfloat16)
    ur = (jnp.einsum("bti,ih->bth", u_p, kr_u) + bias_r).astype(jnp.bfloat16)

    x0_p = jnp.pad(x0.reshape(B, H).astype(jnp.float32),
                   ((0, Bp - B), (0, Hp - H)))

    # ---- time chunking: minimize pad, respect a VMEM streaming budget -----
    def stream_bytes(tc):  # double-buffered bf16 inputs + f32 y output blocks
        return 2 * Bt * tc * (3 * Hp * 2 + OUTp * 4)

    n_chunks = -(-T // 128)
    Tc = _round_up(-(-T // n_chunks), _SLAB)
    while Tc > _SLAB and stream_bytes(Tc) > (28 << 20):
        Tc -= _SLAB
    if Tc < T:                   # multi-chunk: bf16 second-minor tiling wants 16
        Tc = _round_up(Tc, 16)
    Tp = _round_up(T, Tc)
    n_chunks = Tp // Tc
    if Tp != T:
        # Padded tail steps run on zeroed ufz/ur; y is sliced so it is exact,
        # but the final carried state is polluted — do not reuse it.
        pad_t = ((0, 0), (0, Tp - T), (0, 0))
        ufz = jnp.pad(ufz, pad_t)
        ur = jnp.pad(ur, pad_t)

    # ---- explicit VMEM budget for the compiler -----------------------------
    est = (stream_bytes(Tc)
           + 2 * (Hp * 2 * Hp + Hp * Hp + Hp * OUTp) * 2     # bf16 weights (x2 buf)
           + 2 * Bt * Hp * 4 + Bt * Hp * 4 + 2 * OUTp * 4)   # x0, scratch, bias
    vmem_limit = int(min(max(3 * est // 2 + (4 << 20), 32 << 20), 64 << 20))

    kernel = functools.partial(_gru_kernel, hidden=Hp, chunk=Tc, slab=_SLAB)
    y = pl.pallas_call(
        kernel,
        out_shape=jax.ShapeDtypeStruct((Bp, Tp, OUTp), jnp.float32),
        grid_spec=pltpu.PrefetchScalarGridSpec(
            num_scalar_prefetch=0,
            grid=(n_btiles, n_chunks),
            in_specs=[
                pl.BlockSpec((Bt, Hp), lambda b, c: (b, 0)),             # x0
                pl.BlockSpec((Bt, Tc, 2 * Hp), lambda b, c: (b, c, 0)),  # ufz
                pl.BlockSpec((Bt, Tc, Hp), lambda b, c: (b, c, 0)),      # ur
                pl.BlockSpec((Hp, 2 * Hp), lambda b, c: (0, 0)),         # K_fzx
                pl.BlockSpec((Hp, Hp), lambda b, c: (0, 0)),             # Kr_x
                pl.BlockSpec((Hp, OUTp), lambda b, c: (0, 0)),           # W_out
                pl.BlockSpec((1, OUTp), lambda b, c: (0, 0)),            # b_out
            ],
            out_specs=pl.BlockSpec((Bt, Tc, OUTp), lambda b, c: (b, c, 0)),
            scratch_shapes=[pltpu.VMEM((Bt, Hp), jnp.float32)],
        ),
        compiler_params=pltpu.CompilerParams(
            dimension_semantics=("parallel", "arbitrary"),
            vmem_limit_bytes=vmem_limit,
        ),
    )(x0_p, ufz, ur, kfzx.astype(jnp.bfloat16), krx.astype(jnp.bfloat16),
      w_out.astype(jnp.bfloat16), b_out)

    return y[:B, :T, :OUT]


def _xavier_normal(key, shape, gain):
    fan_in, fan_out = shape
    std = gain * (2.0 / (fan_in + fan_out)) ** 0.5
    return std * jax.random.normal(key, shape, dtype=jnp.float32)


def init_params(key, hidden_states, in_features, out_features):
    k1, k2, k3, k4 = jax.random.split(key, 4)
    H, IN, OUT = hidden_states, in_features, out_features
    lin_bound = 1.0 / (H ** 0.5)   # torch.nn.Linear default init range
    return {
        "kernel_fz": _xavier_normal(k1, (IN + H, 2 * H), gain=0.5),
        "bias_fz": jnp.zeros((2 * H,), jnp.float32),
        "kernel_r": _xavier_normal(k2, (IN + H, H), gain=0.5),
        "bias_r": jnp.zeros((H,), jnp.float32),
        # nn.Linear(H, OUT): stored here already transposed to (H, OUT)
        "w_out": jax.random.uniform(k3, (H, OUT), jnp.float32, -lin_bound, lin_bound),
        "b_out": jax.random.uniform(k4, (OUT,), jnp.float32, -lin_bound, lin_bound),
    }


def _reference_forward(u, x0, params, hidden_states):
    """Pure-JAX f32 reference mirroring the PyTorch module, for validation."""
    H = hidden_states
    kfz, bfz = params["kernel_fz"], params["bias_fz"]
    kr, br = params["kernel_r"], params["bias_r"]
    w_out, b_out = params["w_out"], params["b_out"]

    def step(x, u_t):
        u_ = jnp.concatenate([u_t, x], axis=-1)
        fz = jax.nn.sigmoid(u_ @ kfz + bfz)
        f, z = fz[:, :H], fz[:, H:]
        ur_ = jnp.concatenate([u_t, f * x], axis=-1)
        r = jnp.tanh(ur_ @ kr + br)
        y = x @ w_out + b_out
        xk = (1.0 - z) * x + z * r
        return xk, y

    x0_flat = x0.reshape(x0.shape[0], H)
    _, ys = jax.lax.scan(step, x0_flat, jnp.transpose(u, (1, 0, 2)))
    return jnp.transpose(ys, (1, 0, 2))


if __name__ == "__main__":
    B, T = 2, 8
    IN_FEATURES, HIDDEN, OUT_FEATURES = 4, 32, 4

    key = jax.random.PRNGKey(0)
    k_params, k_u, k_x0 = jax.random.split(key, 3)

    params = init_params(k_params, HIDDEN, IN_FEATURES, OUT_FEATURES)
    u = jax.random.normal(k_u, (B, T, IN_FEATURES), dtype=jnp.float32)
    x0 = jax.random.uniform(k_x0, (B, 1, HIDDEN), dtype=jnp.float32)

    y = single_layer_gru_forward(u, x0, params, hidden_states=HIDDEN)
    y = jax.block_until_ready(y)

    y_ref = _reference_forward(u, x0, params, HIDDEN)
    assert y.shape == (B, T, OUT_FEATURES)
    # bf16 streams / bf16 MXU operands -> bf16-level tolerance vs f32 reference
    assert jnp.allclose(y, y_ref, atol=2e-2, rtol=2e-2), "mismatch vs JAX reference"

    print("KERNEL_OK")
</pallas_src>

<mosaic_0001>
module attributes {stable_mosaic.version = 11 : i64} {
  func.func @_gru_kernel(%arg0: i32, %arg1: i32, %arg2: memref<8x128xf32, #tpu.memory_space<vmem>>, %arg3: memref<8x8x256xbf16, #tpu.memory_space<vmem>>, %arg4: memref<8x8x128xbf16, #tpu.memory_space<vmem>>, %arg5: memref<128x256xbf16, #tpu.memory_space<vmem>>, %arg6: memref<128x128xbf16, #tpu.memory_space<vmem>>, %arg7: memref<128x128xbf16, #tpu.memory_space<vmem>>, %arg8: memref<1x128xf32, #tpu.memory_space<vmem>>, %arg9: memref<8x8x128xf32, #tpu.memory_space<vmem>>, %arg10: memref<8x128xf32, #tpu.memory_space<vmem>>) attributes {dimension_semantics = [#tpu.dimension_semantics<parallel>, #tpu.dimension_semantics<arbitrary>], iteration_bounds = array<i64: 1, 1>, scalar_prefetch = 0 : i64, scratch_operands = 1 : i64, tpu.core_type = #tpu.core_type<tc>, window_params = [{transform_indices = @transform_0, window_bounds = array<i64: 8, 128>}, {transform_indices = @transform_1, window_bounds = array<i64: 8, 8, 256>}, {transform_indices = @transform_2, window_bounds = array<i64: 8, 8, 128>}, {pipeline_mode = #tpu.pipeline_mode<synchronous>, transform_indices = @transform_3, window_bounds = array<i64: 128, 256>}, {pipeline_mode = #tpu.pipeline_mode<synchronous>, transform_indices = @transform_4, window_bounds = array<i64: 128, 128>}, {pipeline_mode = #tpu.pipeline_mode<synchronous>, transform_indices = @transform_5, window_bounds = array<i64: 128, 128>}, {pipeline_mode = #tpu.pipeline_mode<synchronous>, transform_indices = @transform_6, window_bounds = array<i64: 1, 128>}, {transform_indices = @transform_7, window_bounds = array<i64: 8, 8, 128>}]} {
    %c0_i32 = arith.constant 0 : i32
    %0 = arith.cmpi eq, %arg1, %c0_i32 : i32
    %1 = arith.extui %0 : i1 to i32
    %c0_i32_0 = arith.constant 0 : i32
    %2 = arith.cmpi ne, %1, %c0_i32_0 : i32
    scf.if %2 {
      %c0_51 = arith.constant 0 : index
      %c0_52 = arith.constant 0 : index
      %240 = vector.load %arg2[%c0_51, %c0_52] : memref<8x128xf32, #tpu.memory_space<vmem>>, vector<8x128xf32>
      %c0_53 = arith.constant 0 : index
      %c0_54 = arith.constant 0 : index
      %241 = vector.load %arg10[%c0_53, %c0_54] : memref<8x128xf32, #tpu.memory_space<vmem>>, vector<8x128xf32>
      tpu.vector_store %arg10[%c0_53, %c0_54], %240 {strides = array<i32>} : memref<8x128xf32, #tpu.memory_space<vmem>>, vector<8x128xf32>,
    } else {
    }
    %c0 = arith.constant 0 : index
    %c0_1 = arith.constant 0 : index
    %3 = vector.load %arg5[%c0, %c0_1] : memref<128x256xbf16, #tpu.memory_space<vmem>>, vector<128x256xbf16>
    %c0_2 = arith.constant 0 : index
    %c0_3 = arith.constant 0 : index
    %4 = vector.load %arg6[%c0_2, %c0_3] : memref<128x128xbf16, #tpu.memory_space<vmem>>, vector<128x128xbf16>
    %c0_4 = arith.constant 0 : index
    %c0_5 = arith.constant 0 : index
    %5 = vector.load %arg7[%c0_4, %c0_5] : memref<128x128xbf16, #tpu.memory_space<vmem>>, vector<128x128xbf16>
    %c0_6 = arith.constant 0 : index
    %c0_7 = arith.constant 0 : index
    %6 = vector.load %arg8[%c0_6, %c0_7] : memref<1x128xf32, #tpu.memory_space<vmem>>, vector<1x128xf32>
    %c0_i32_8 = arith.constant 0 : i32
    %c8_i32 = arith.constant 8 : i32
    %7 = arith.muli %c0_i32_8, %c8_i32 : i32
    %8 = tpu.assume_multiple %7, 8 : i32
    %c0_9 = arith.constant 0 : index
    %9 = arith.index_cast %8 : i32 to index
    %c0_10 = arith.constant 0 : index
    %10 = vector.load %arg3[%c0_9, %9, %c0_10] : memref<8x8x256xbf16, #tpu.memory_space<vmem>>, vector<8x8x256xbf16>
    %c0_11 = arith.constant 0 : index
    %11 = arith.index_cast %8 : i32 to index
    %c0_12 = arith.constant 0 : index
    %12 = vector.load %arg4[%c0_11, %11, %c0_12] : memref<8x8x128xbf16, #tpu.memory_space<vmem>>, vector<8x8x128xbf16>
    %c0_13 = arith.constant 0 : index
    %c0_14 = arith.constant 0 : index
    %13 = vector.load %arg10[%c0_13, %c0_14] : memref<8x128xf32, #tpu.memory_space<vmem>>, vector<8x128xf32>
    %14 = arith.truncf %13 : vector<8x128xf32> to vector<8x128xbf16>
    %15 = vector.extract_strided_slice %10 {offsets = [0, 0, 0], sizes = [8, 1, 256], strides = [1, 1, 1]} : vector<8x8x256xbf16> to vector<8x1x256xbf16>
    %16 = vector.shape_cast %15 : vector<8x1x256xbf16> to vector<8x256xbf16>
    %17 = arith.extf %16 : vector<8x256xbf16> to vector<8x256xf32>
    %18 = vector.extract_strided_slice %12 {offsets = [0, 0, 0], sizes = [8, 1, 128], strides = [1, 1, 1]} : vector<8x8x128xbf16> to vector<8x1x128xbf16>
    %19 = vector.shape_cast %18 : vector<8x1x128xbf16> to vector<8x128xbf16>
    %20 = arith.extf %19 : vector<8x128xbf16> to vector<8x128xf32>
    %cst = arith.constant dense<0.000000e+00> : vector<8x256xf32>
    %21 = tpu.matmul %14, %3, %cst {dimension_numbers = #tpu.dot_dimension_numbers<[1], [0], [0], [1], [0, 0, 1, 1], [], []>} : vector<8x128xbf16>, vector<128x256xbf16>, vector<8x256xf32> -> vector<8x256xf32>
    %22 = arith.addf %17, %21 : vector<8x256xf32>
    %23 = arith.negf %22 : vector<8x256xf32>
    %24 = math.exp %23 : vector<8x256xf32>
    %cst_15 = arith.constant 1.000000e+00 : f32
    %25 = vector.broadcast %cst_15 : f32 to vector<8x256xf32>
    %26 = arith.addf %25, %24 : vector<8x256xf32>
    %27 = arith.divf %25, %26 : vector<8x256xf32>
    %28 = vector.extract_strided_slice %27 {offsets = [0, 0], sizes = [8, 128], strides = [1, 1]} : vector<8x256xf32> to vector<8x128xf32>
    %29 = vector.extract_strided_slice %27 {offsets = [0, 128], sizes = [8, 128], strides = [1, 1]} : vector<8x256xf32> to vector<8x128xf32>
    %30 = arith.mulf %28, %13 : vector<8x128xf32>
    %31 = arith.truncf %30 : vector<8x128xf32> to vector<8x128xbf16>
    %cst_16 = arith.constant dense<0.000000e+00> : vector<8x128xf32>
    %32 = tpu.matmul %31, %4, %cst_16 {dimension_numbers = #tpu.dot_dimension_numbers<[1], [0], [0], [1], [0, 0, 1, 1], [], []>} : vector<8x128xbf16>, vector<128x128xbf16>, vector<8x128xf32> -> vector<8x128xf32>
    %33 = arith.addf %20, %32 : vector<8x128xf32>
    %34 = math.tanh %33 : vector<8x128xf32>
    %cst_17 = arith.constant 1.000000e+00 : f32
    %35 = vector.broadcast %cst_17 : f32 to vector<8x128xf32>
    %36 = arith.subf %35, %29 : vector<8x128xf32>
    %37 = arith.mulf %36, %13 : vector<8x128xf32>
    %38 = arith.mulf %29, %34 : vector<8x128xf32>
    %39 = arith.addf %37, %38 : vector<8x128xf32>
    %40 = arith.truncf %39 : vector<8x128xf32> to vector<8x128xbf16>
    %41 = vector.extract_strided_slice %10 {offsets = [0, 1, 0], sizes = [8, 1, 256], strides = [1, 1, 1]} : vector<8x8x256xbf16> to vector<8x1x256xbf16>
    %42 = vector.shape_cast %41 : vector<8x1x256xbf16> to vector<8x256xbf16>
    %43 = arith.extf %42 : vector<8x256xbf16> to vector<8x256xf32>
    %44 = vector.extract_strided_slice %12 {offsets = [0, 1, 0], sizes = [8, 1, 128], strides = [1, 1, 1]} : vector<8x8x128xbf16> to vector<8x1x128xbf16>
    %45 = vector.shape_cast %44 : vector<8x1x128xbf16> to vector<8x128xbf16>
    %46 = arith.extf %45 : vector<8x128xbf16> to vector<8x128xf32>
    %cst_18 = arith.constant dense<0.000000e+00> : vector<8x256xf32>
    %47 = tpu.matmul %40, %3, %cst_18 {dimension_numbers = #tpu.dot_dimension_numbers<[1], [0], [0], [1], [0, 0, 1, 1], [], []>} : vector<8x128xbf16>, vector<128x256xbf16>, vector<8x256xf32> -> vector<8x256xf32>
    %48 = arith.addf %43, %47 : vector<8x256xf32>
    %49 = arith.negf %48 : vector<8x256xf32>
    %50 = math.exp %49 : vector<8x256xf32>
    %cst_19 = arith.constant 1.000000e+00 : f32
    %51 = vector.broadcast %cst_19 : f32 to vector<8x256xf32>
    %52 = arith.addf %51, %50 : vector<8x256xf32>
    %53 = arith.divf %51, %52 : vector<8x256xf32>
    %54 = vector.extract_strided_slice %53 {offsets = [0, 0], sizes = [8, 128], strides = [1, 1]} : vector<8x256xf32> to vector<8x128xf32>
    %55 = vector.extract_strided_slice %53 {offsets = [0, 128], sizes = [8, 128], strides = [1, 1]} : vector<8x256xf32> to vector<8x128xf32>
    %56 = arith.mulf %54, %39 : vector<8x128xf32>
    %57 = arith.truncf %56 : vector<8x128xf32> to vector<8x128xbf16>
    %cst_20 = arith.constant dense<0.000000e+00> : vector<8x128xf32>
    %58 = tpu.matmul %57, %4, %cst_20 {dimension_numbers = #tpu.dot_dimension_numbers<[1], [0], [0], [1], [0, 0, 1, 1], [], []>} : vector<8x128xbf16>, vector<128x128xbf16>, vector<8x128xf32> -> vector<8x128xf32>
    %59 = arith.addf %46, %58 : vector<8x128xf32>
    %60 = math.tanh %59 : vector<8x128xf32>
    %cst_21 = arith.constant 1.000000e+00 : f32
    %61 = vector.broadcast %cst_21 : f32 to vector<8x128xf32>
    %62 = arith.subf %61, %55 : vector<8x128xf32>
    %63 = arith.mulf %62, %39 : vector<8x128xf32>
    %64 = arith.mulf %55, %60 : vector<8x128xf32>
    %65 = arith.addf %63, %64 : vector<8x128xf32>
    %66 = arith.truncf %65 : vector<8x128xf32> to vector<8x128xbf16>
    %67 = vector.extract_strided_slice %10 {offsets = [0, 2, 0], sizes = [8, 1, 256], strides = [1, 1, 1]} : vector<8x8x256xbf16> to vector<8x1x256xbf16>
    %68 = vector.shape_cast %67 : vector<8x1x256xbf16> to vector<8x256xbf16>
    %69 = arith.extf %68 : vector<8x256xbf16> to vector<8x256xf32>
    %70 = vector.extract_strided_slice %12 {offsets = [0, 2, 0], sizes = [8, 1, 128], strides = [1, 1, 1]} : vector<8x8x128xbf16> to vector<8x1x128xbf16>
    %71 = vector.shape_cast %70 : vector<8x1x128xbf16> to vector<8x128xbf16>
    %72 = arith.extf %71 : vector<8x128xbf16> to vector<8x128xf32>
    %cst_22 = arith.constant dense<0.000000e+00> : vector<8x256xf32>
    %73 = tpu.matmul %66, %3, %cst_22 {dimension_numbers = #tpu.dot_dimension_numbers<[1], [0], [0], [1], [0, 0, 1, 1], [], []>} : vector<8x128xbf16>, vector<128x256xbf16>, vector<8x256xf32> -> vector<8x256xf32>
    %74 = arith.addf %69, %73 : vector<8x256xf32>
    %75 = arith.negf %74 : vector<8x256xf32>
    %76 = math.exp %75 : vector<8x256xf32>
    %cst_23 = arith.constant 1.000000e+00 : f32
    %77 = vector.broadcast %cst_23 : f32 to vector<8x256xf32>
    %78 = arith.addf %77, %76 : vector<8x256xf32>
    %79 = arith.divf %77, %78 : vector<8x256xf32>
    %80 = vector.extract_strided_slice %79 {offsets = [0, 0], sizes = [8, 128], strides = [1, 1]} : vector<8x256xf32> to vector<8x128xf32>
    %81 = vector.extract_strided_slice %79 {offsets = [0, 128], sizes = [8, 128], strides = [1, 1]} : vector<8x256xf32> to vector<8x128xf32>
    %82 = arith.mulf %80, %65 : vector<8x128xf32>
    %83 = arith.truncf %82 : vector<8x128xf32> to vector<8x128xbf16>
    %cst_24 = arith.constant dense<0.000000e+00> : vector<8x128xf32>
    %84 = tpu.matmul %83, %4, %cst_24 {dimension_numbers = #tpu.dot_dimension_numbers<[1], [0], [0], [1], [0, 0, 1, 1], [], []>} : vector<8x128xbf16>, vector<128x128xbf16>, vector<8x128xf32> -> vector<8x128xf32>
    %85 = arith.addf %72, %84 : vector<8x128xf32>
    %86 = math.tanh %85 : vector<8x128xf32>
    %cst_25 = arith.constant 1.000000e+00 : f32
    %87 = vector.broadcast %cst_25 : f32 to vector<8x128xf32>
    %88 = arith.subf %87, %81 : vector<8x128xf32>
    %89 = arith.mulf %88, %65 : vector<8x128xf32>
    %90 = arith.mulf %81, %86 : vector<8x128xf32>
    %91 = arith.addf %89, %90 : vector<8x128xf32>
    %92 = arith.truncf %91 : vector<8x128xf32> to vector<8x128xbf16>
    %93 = vector.extract_strided_slice %10 {offsets = [0, 3, 0], sizes = [8, 1, 256], strides = [1, 1, 1]} : vector<8x8x256xbf16> to vector<8x1x256xbf16>
    %94 = vector.shape_cast %93 : vector<8x1x256xbf16> to vector<8x256xbf16>
    %95 = arith.extf %94 : vector<8x256xbf16> to vector<8x256xf32>
    %96 = vector.extract_strided_slice %12 {offsets = [0, 3, 0], sizes = [8, 1, 128], strides = [1, 1, 1]} : vector<8x8x128xbf16> to vector<8x1x128xbf16>
    %97 = vector.shape_cast %96 : vector<8x1x128xbf16> to vector<8x128xbf16>
    %98 = arith.extf %97 : vector<8x128xbf16> to vector<8x128xf32>
    %cst_26 = arith.constant dense<0.000000e+00> : vector<8x256xf32>
    %99 = tpu.matmul %92, %3, %cst_26 {dimension_numbers = #tpu.dot_dimension_numbers<[1], [0], [0], [1], [0, 0, 1, 1], [], []>} : vector<8x128xbf16>, vector<128x256xbf16>, vector<8x256xf32> -> vector<8x256xf32>
    %100 = arith.addf %95, %99 : vector<8x256xf32>
    %101 = arith.negf %100 : vector<8x256xf32>
    %102 = math.exp %101 : vector<8x256xf32>
    %cst_27 = arith.constant 1.000000e+00 : f32
    %103 = vector.broadcast %cst_27 : f32 to vector<8x256xf32>
    %104 = arith.addf %103, %102 : vector<8x256xf32>
    %105 = arith.divf %103, %104 : vector<8x256xf32>
    %106 = vector.extract_strided_slice %105 {offsets = [0, 0], sizes = [8, 128], strides = [1, 1]} : vector<8x256xf32> to vector<8x128xf32>
    %107 = vector.extract_strided_slice %105 {offsets = [0, 128], sizes = [8, 128], strides = [1, 1]} : vector<8x256xf32> to vector<8x128xf32>
    %108 = arith.mulf %106, %91 : vector<8x128xf32>
    %109 = arith.truncf %108 : vector<8x128xf32> to vector<8x128xbf16>
    %cst_28 = arith.constant dense<0.000000e+00> : vector<8x128xf32>
    %110 = tpu.matmul %109, %4, %cst_28 {dimension_numbers = #tpu.dot_dimension_numbers<[1], [0], [0], [1], [0, 0, 1, 1], [], []>} : vector<8x128xbf16>, vector<128x128xbf16>, vector<8x128xf32> -> vector<8x128xf32>
    %111 = arith.addf %98, %110 : vector<8x128xf32>
    %112 = math.tanh %111 : vector<8x128xf32>
    %cst_29 = arith.constant 1.000000e+00 : f32
    %113 = vector.broadcast %cst_29 : f32 to vector<8x128xf32>
    %114 = arith.subf %113, %107 : vector<8x128xf32>
    %115 = arith.mulf %114, %91 : vector<8x128xf32>
    %116 = arith.mulf %107, %112 : vector<8x128xf32>
    %117 = arith.addf %115, %116 : vector<8x128xf32>
    %118 = arith.truncf %117 : vector<8x128xf32> to vector<8x128xbf16>
    %119 = vector.extract_strided_slice %10 {offsets = [0, 4, 0], sizes = [8, 1, 256], strides = [1, 1, 1]} : vector<8x8x256xbf16> to vector<8x1x256xbf16>
    %120 = vector.shape_cast %119 : vector<8x1x256xbf16> to vector<8x256xbf16>
    %121 = arith.extf %120 : vector<8x256xbf16> to vector<8x256xf32>
    %122 = vector.extract_strided_slice %12 {offsets = [0, 4, 0], sizes = [8, 1, 128], strides = [1, 1, 1]} : vector<8x8x128xbf16> to vector<8x1x128xbf16>
    %123 = vector.shape_cast %122 : vector<8x1x128xbf16> to vector<8x128xbf16>
    %124 = arith.extf %123 : vector<8x128xbf16> to vector<8x128xf32>
    %cst_30 = arith.constant dense<0.000000e+00> : vector<8x256xf32>
    %125 = tpu.matmul %118, %3, %cst_30 {dimension_numbers = #tpu.dot_dimension_numbers<[1], [0], [0], [1], [0, 0, 1, 1], [], []>} : vector<8x128xbf16>, vector<128x256xbf16>, vector<8x256xf32> -> vector<8x256xf32>
    %126 = arith.addf %121, %125 : vector<8x256xf32>
    %127 = arith.negf %126 : vector<8x256xf32>
    %128 = math.exp %127 : vector<8x256xf32>
    %cst_31 = arith.constant 1.000000e+00 : f32
    %129 = vector.broadcast %cst_31 : f32 to vector<8x256xf32>
    %130 = arith.addf %129, %128 : vector<8x256xf32>
    %131 = arith.divf %129, %130 : vector<8x256xf32>
    %132 = vector.extract_strided_slice %131 {offsets = [0, 0], sizes = [8, 128], strides = [1, 1]} : vector<8x256xf32> to vector<8x128xf32>
    %133 = vector.extract_strided_slice %131 {offsets = [0, 128], sizes = [8, 128], strides = [1, 1]} : vector<8x256xf32> to vector<8x128xf32>
    %134 = arith.mulf %132, %117 : vector<8x128xf32>
    %135 = arith.truncf %134 : vector<8x128xf32> to vector<8x128xbf16>
    %cst_32 = arith.constant dense<0.000000e+00> : vector<8x128xf32>
    %136 = tpu.matmul %135, %4, %cst_32 {dimension_numbers = #tpu.dot_dimension_numbers<[1], [0], [0], [1], [0, 0, 1, 1], [], []>} : vector<8x128xbf16>, vector<128x128xbf16>, vector<8x128xf32> -> vector<8x128xf32>
    %137 = arith.addf %124, %136 : vector<8x128xf32>
    %138 = math.tanh %137 : vector<8x128xf32>
    %cst_33 = arith.constant 1.000000e+00 : f32
    %139 = vector.broadcast %cst_33 : f32 to vector<8x128xf32>
    %140 = arith.subf %139, %133 : vector<8x128xf32>
    %141 = arith.mulf %140, %117 : vector<8x128xf32>
    %142 = arith.mulf %133, %138 : vector<8x128xf32>
    %143 = arith.addf %141, %142 : vector<8x128xf32>
    %144 = arith.truncf %143 : vector<8x128xf32> to vector<8x128xbf16>
    %145 = vector.extract_strided_slice %10 {offsets = [0, 5, 0], sizes = [8, 1, 256], strides = [1, 1, 1]} : vector<8x8x256xbf16> to vector<8x1x256xbf16>
    %146 = vector.shape_cast %145 : vector<8x1x256xbf16> to vector<8x256xbf16>
    %147 = arith.extf %146 : vector<8x256xbf16> to vector<8x256xf32>
    %148 = vector.extract_strided_slice %12 {offsets = [0, 5, 0], sizes = [8, 1, 128], strides = [1, 1, 1]} : vector<8x8x128xbf16> to vector<8x1x128xbf16>
    %149 = vector.shape_cast %148 : vector<8x1x128xbf16> to vector<8x128xbf16>
    %150 = arith.extf %149 : vector<8x128xbf16> to vector<8x128xf32>
    %cst_34 = arith.constant dense<0.000000e+00> : vector<8x256xf32>
    %151 = tpu.matmul %144, %3, %cst_34 {dimension_numbers = #tpu.dot_dimension_numbers<[1], [0], [0], [1], [0, 0, 1, 1], [], []>} : vector<8x128xbf16>, vector<128x256xbf16>, vector<8x256xf32> -> vector<8x256xf32>
    %152 = arith.addf %147, %151 : vector<8x256xf32>
    %153 = arith.negf %152 : vector<8x256xf32>
    %154 = math.exp %153 : vector<8x256xf32>
    %cst_35 = arith.constant 1.000000e+00 : f32
    %155 = vector.broadcast %cst_35 : f32 to vector<8x256xf32>
    %156 = arith.addf %155, %154 : vector<8x256xf32>
    %157 = arith.divf %155, %156 : vector<8x256xf32>
    %158 = vector.extract_strided_slice %157 {offsets = [0, 0], sizes = [8, 128], strides = [1, 1]} : vector<8x256xf32> to vector<8x128xf32>
    %159 = vector.extract_strided_slice %157 {offsets = [0, 128], sizes = [8, 128], strides = [1, 1]} : vector<8x256xf32> to vector<8x128xf32>
    %160 = arith.mulf %158, %143 : vector<8x128xf32>
    %161 = arith.truncf %160 : vector<8x128xf32> to vector<8x128xbf16>
    %cst_36 = arith.constant dense<0.000000e+00> : vector<8x128xf32>
    %162 = tpu.matmul %161, %4, %cst_36 {dimension_numbers = #tpu.dot_dimension_numbers<[1], [0], [0], [1], [0, 0, 1, 1], [], []>} : vector<8x128xbf16>, vector<128x128xbf16>, vector<8x128xf32> -> vector<8x128xf32>
    %163 = arith.addf %150, %162 : vector<8x128xf32>
    %164 = math.tanh %163 : vector<8x128xf32>
    %cst_37 = arith.constant 1.000000e+00 : f32
    %165 = vector.broadcast %cst_37 : f32 to vector<8x128xf32>
    %166 = arith.subf %165, %159 : vector<8x128xf32>
    %167 = arith.mulf %166, %143 : vector<8x128xf32>
    %168 = arith.mulf %159, %164 : vector<8x128xf32>
    %169 = arith.addf %167, %168 : vector<8x128xf32>
    %170 = arith.truncf %169 : vector<8x128xf32> to vector<8x128xbf16>
    %171 = vector.extract_strided_slice %10 {offsets = [0, 6, 0], sizes = [8, 1, 256], strides = [1, 1, 1]} : vector<8x8x256xbf16> to vector<8x1x256xbf16>
    %172 = vector.shape_cast %171 : vector<8x1x256xbf16> to vector<8x256xbf16>
    %173 = arith.extf %172 : vector<8x256xbf16> to vector<8x256xf32>
    %174 = vector.extract_strided_slice %12 {offsets = [0, 6, 0], sizes = [8, 1, 128], strides = [1, 1, 1]} : vector<8x8x128xbf16> to vector<8x1x128xbf16>
    %175 = vector.shape_cast %174 : vector<8x1x128xbf16> to vector<8x128xbf16>
    %176 = arith.extf %175 : vector<8x128xbf16> to vector<8x128xf32>
    %cst_38 = arith.constant dense<0.000000e+00> : vector<8x256xf32>
    %177 = tpu.matmul %170, %3, %cst_38 {dimension_numbers = #tpu.dot_dimension_numbers<[1], [0], [0], [1], [0, 0, 1, 1], [], []>} : vector<8x128xbf16>, vector<128x256xbf16>, vector<8x256xf32> -> vector<8x256xf32>
    %178 = arith.addf %173, %177 : vector<8x256xf32>
    %179 = arith.negf %178 : vector<8x256xf32>
    %180 = math.exp %179 : vector<8x256xf32>
    %cst_39 = arith.constant 1.000000e+00 : f32
    %181 = vector.broadcast %cst_39 : f32 to vector<8x256xf32>
    %182 = arith.addf %181, %180 : vector<8x256xf32>
    %183 = arith.divf %181, %182 : vector<8x256xf32>
    %184 = vector.extract_strided_slice %183 {offsets = [0, 0], sizes = [8, 128], strides = [1, 1]} : vector<8x256xf32> to vector<8x128xf32>
    %185 = vector.extract_strided_slice %183 {offsets = [0, 128], sizes = [8, 128], strides = [1, 1]} : vector<8x256xf32> to vector<8x128xf32>
    %186 = arith.mulf %184, %169 : vector<8x128xf32>
    %187 = arith.truncf %186 : vector<8x128xf32> to vector<8x128xbf16>
    %cst_40 = arith.constant dense<0.000000e+00> : vector<8x128xf32>
    %188 = tpu.matmul %187, %4, %cst_40 {dimension_numbers = #tpu.dot_dimension_numbers<[1], [0], [0], [1], [0, 0, 1, 1], [], []>} : vector<8x128xbf16>, vector<128x128xbf16>, vector<8x128xf32> -> vector<8x128xf32>
    %189 = arith.addf %176, %188 : vector<8x128xf32>
    %190 = math.tanh %189 : vector<8x128xf32>
    %cst_41 = arith.constant 1.000000e+00 : f32
    %191 = vector.broadcast %cst_41 : f32 to vector<8x128xf32>
    %192 = arith.subf %191, %185 : vector<8x128xf32>
    %193 = arith.mulf %192, %169 : vector<8x128xf32>
    %194 = arith.mulf %185, %190 : vector<8x128xf32>
    %195 = arith.addf %193, %194 : vector<8x128xf32>
    %196 = arith.truncf %195 : vector<8x128xf32> to vector<8x128xbf16>
    %197 = vector.extract_strided_slice %10 {offsets = [0, 7, 0], sizes = [8, 1, 256], strides = [1, 1, 1]} : vector<8x8x256xbf16> to vector<8x1x256xbf16>
    %198 = vector.shape_cast %197 : vector<8x1x256xbf16> to vector<8x256xbf16>
    %199 = arith.extf %198 : vector<8x256xbf16> to vector<8x256xf32>
    %200 = vector.extract_strided_slice %12 {offsets = [0, 7, 0], sizes = [8, 1, 128], strides = [1, 1, 1]} : vector<8x8x128xbf16> to vector<8x1x128xbf16>
    %201 = vector.shape_cast %200 : vector<8x1x128xbf16> to vector<8x128xbf16>
    %202 = arith.extf %201 : vector<8x128xbf16> to vector<8x128xf32>
    %cst_42 = arith.constant dense<0.000000e+00> : vector<8x256xf32>
    %203 = tpu.matmul %196, %3, %cst_42 {dimension_numbers = #tpu.dot_dimension_numbers<[1], [0], [0], [1], [0, 0, 1, 1], [], []>} : vector<8x128xbf16>, vector<128x256xbf16>, vector<8x256xf32> -> vector<8x256xf32>
    %204 = arith.addf %199, %203 : vector<8x256xf32>
    %205 = arith.negf %204 : vector<8x256xf32>
    %206 = math.exp %205 : vector<8x256xf32>
    %cst_43 = arith.constant 1.000000e+00 : f32
    %207 = vector.broadcast %cst_43 : f32 to vector<8x256xf32>
    %208 = arith.addf %207, %206 : vector<8x256xf32>
    %209 = arith.divf %207, %208 : vector<8x256xf32>
    %210 = vector.extract_strided_slice %209 {offsets = [0, 0], sizes = [8, 128], strides = [1, 1]} : vector<8x256xf32> to vector<8x128xf32>
    %211 = vector.extract_strided_slice %209 {offsets = [0, 128], sizes = [8, 128], strides = [1, 1]} : vector<8x256xf32> to vector<8x128xf32>
    %212 = arith.mulf %210, %195 : vector<8x128xf32>
    %213 = arith.truncf %212 : vector<8x128xf32> to vector<8x128xbf16>
    %cst_44 = arith.constant dense<0.000000e+00> : vector<8x128xf32>
    %214 = tpu.matmul %213, %4, %cst_44 {dimension_numbers = #tpu.dot_dimension_numbers<[1], [0], [0], [1], [0, 0, 1, 1], [], []>} : vector<8x128xbf16>, vector<128x128xbf16>, vector<8x128xf32> -> vector<8x128xf32>
    %215 = arith.addf %202, %214 : vector<8x128xf32>
    %216 = math.tanh %215 : vector<8x128xf32>
    %cst_45 = arith.constant 1.000000e+00 : f32
    %217 = vector.broadcast %cst_45 : f32 to vector<8x128xf32>
    %218 = arith.subf %217, %211 : vector<8x128xf32>
    %219 = arith.mulf %218, %195 : vector<8x128xf32>
    %220 = arith.mulf %211, %216 : vector<8x128xf32>
    %221 = arith.addf %219, %220 : vector<8x128xf32>
    %c0_46 = arith.constant 0 : index
    %c0_47 = arith.constant 0 : index
    %222 = vector.load %arg10[%c0_46, %c0_47] : memref<8x128xf32, #tpu.memory_space<vmem>>, vector<8x128xf32>
    tpu.vector_store %arg10[%c0_46, %c0_47], %221 {strides = array<i32>} : memref<8x128xf32, #tpu.memory_space<vmem>>, vector<8x128xf32>,
    %223 = vector.shape_cast %13 : vector<8x128xf32> to vector<8x1x128xf32>
    %224 = vector.shape_cast %39 : vector<8x128xf32> to vector<8x1x128xf32>
    %225 = vector.shape_cast %65 : vector<8x128xf32> to vector<8x1x128xf32>
    %226 = vector.shape_cast %91 : vector<8x128xf32> to vector<8x1x128xf32>
    %227 = vector.shape_cast %117 : vector<8x128xf32> to vector<8x1x128xf32>
    %228 = vector.shape_cast %143 : vector<8x128xf32> to vector<8x1x128xf32>
    %229 = vector.shape_cast %169 : vector<8x128xf32> to vector<8x1x128xf32>
    %230 = vector.shape_cast %195 : vector<8x128xf32> to vector<8x1x128xf32>
    %231 = tpu.concatenate %223, %224, %225, %226, %227, %228, %229, %230 in 1 : vector<8x1x128xf32>, vector<8x1x128xf32>, vector<8x1x128xf32>, vector<8x1x128xf32>, vector<8x1x128xf32>, vector<8x1x128xf32>, vector<8x1x128xf32>, vector<8x1x128xf32> -> vector<8x8x128xf32>
    %232 = vector.shape_cast %231 : vector<8x8x128xf32> to vector<64x128xf32>
    %233 = arith.truncf %232 : vector<64x128xf32> to vector<64x128xbf16>
    %cst_48 = arith.constant dense<0.000000e+00> : vector<64x128xf32>
    %234 = tpu.matmul %233, %5, %cst_48 {dimension_numbers = #tpu.dot_dimension_numbers<[1], [0], [0], [1], [0, 0, 1, 1], [], []>} : vector<64x128xbf16>, vector<128x128xbf16>, vector<64x128xf32> -> vector<64x128xf32>
    %235 = vector.broadcast %6 : vector<1x128xf32> to vector<64x128xf32>
    %236 = arith.addf %234, %235 : vector<64x128xf32>
    %237 = vector.shape_cast %236 : vector<64x128xf32> to vector<8x8x128xf32>
    %c0_49 = arith.constant 0 : index
    %238 = arith.index_cast %8 : i32 to index
    %c0_50 = arith.constant 0 : index
    %239 = vector.load %arg9[%c0_49, %238, %c0_50] : memref<8x8x128xf32, #tpu.memory_space<vmem>>, vector<8x8x128xf32>
    tpu.vector_store %arg9[%c0_49, %238, %c0_50], %237 {strides = array<i32>} : memref<8x8x128xf32, #tpu.memory_space<vmem>>, vector<8x8x128xf32>,
    %c1_i32 = arith.constant 1 : i32
    return
  }
  func.func @transform_0(%arg0: i32, %arg1: i32) -> (i32, i32) {
    %c0_i32 = arith.constant 0 : i32
    %c0_i32_0 = arith.constant 0 : i32
    return %arg0, %c0_i32 : i32, i32
  }
  func.func @transform_1(%arg0: i32, %arg1: i32) -> (i32, i32, i32) {
    %c0_i32 = arith.constant 0 : i32
    %c0_i32_0 = arith.constant 0 : i32
    return %arg0, %arg1, %c0_i32 : i32, i32, i32
  }
  func.func @transform_2(%arg0: i32, %arg1: i32) -> (i32, i32, i32) {
    %c0_i32 = arith.constant 0 : i32
    %c0_i32_0 = arith.constant 0 : i32
    return %arg0, %arg1, %c0_i32 : i32, i32, i32
  }
  func.func @transform_3(%arg0: i32, %arg1: i32) -> (i32, i32) {
    %c0_i32 = arith.constant 0 : i32
    %c0_i32_0 = arith.constant 0 : i32
    %c0_i32_1 = arith.constant 0 : i32
    return %c0_i32, %c0_i32_0 : i32, i32
  }
  func.func @transform_4(%arg0: i32, %arg1: i32) -> (i32, i32) {
    %c0_i32 = arith.constant 0 : i32
    %c0_i32_0 = arith.constant 0 : i32
    %c0_i32_1 = arith.constant 0 : i32
    return %c0_i32, %c0_i32_0 : i32, i32
  }
  func.func @transform_5(%arg0: i32, %arg1: i32) -> (i32, i32) {
    %c0_i32 = arith.constant 0 : i32
    %c0_i32_0 = arith.constant 0 : i32
    %c0_i32_1 = arith.constant 0 : i32
    return %c0_i32, %c0_i32_0 : i32, i32
  }
  func.func @transform_6(%arg0: i32, %arg1: i32) -> (i32, i32) {
    %c0_i32 = arith.constant 0 : i32
    %c0_i32_0 = arith.constant 0 : i32
    %c0_i32_1 = arith.constant 0 : i32
    return %c0_i32, %c0_i32_0 : i32, i32
  }
  func.func @transform_7(%arg0: i32, %arg1: i32) -> (i32, i32, i32) {
    %c0_i32 = arith.constant 0 : i32
    %c0_i32_0 = arith.constant 0 : i32
    return %arg0, %arg1, %c0_i32 : i32, i32, i32
  }
}

</mosaic_0001>

<bundles_post_ra>
// kernel: single_layer_gru_forward.1
= control target key start
LH: loop header
LB: loop body
LE: loop exit
PB: predicated region body
PF: predicated region fallthrough
CT: control target
= control target key end

     0   :  { %v6894_v1 = vmov 0   ;;  %v6896_v20 = vmov 0.0   ;;  %vm4909_vm0 = vmmov 0   ;;  %vm441_vm1 = vcmask 1041409   ;;  %s6886_s3 = inlined_call_operand.vmem [shape: bf16[128,256], index: 3, kind: input, shape index: {}]   ;;  %s6887_s0 = inlined_call_operand.vmem [shape: f32[8,128], index: 0, kind: input, shape index: {}]   ;;  %s6888_s4 = inlined_call_operand.vmem [shape: bf16[128,128], index: 4, kind: input, shape index: {}]   ;;  %s6889_s1 = inlined_call_operand.vmem [shape: bf16[8,8,256], index: 1, kind: input, shape index: {}]   ;;  %s6890_s2 = inlined_call_operand.vmem [shape: bf16[8,8,128], index: 2, kind: input, shape index: {}]   ;;  %s6891_s5 = inlined_call_operand.vmem [shape: bf16[128,128], index: 5, kind: input, shape index: {}]   ;;  %s6892_s6 = inlined_call_operand.vmem [shape: f32[1,128], index: 6, kind: input, shape index: {}]   ;;  %s6893_s7 = inlined_call_operand.vmem [shape: f32[8,8,128], index: 7, kind: output, shape index: {}]  }
   0x1   :  { %v4954_v0 = vld [vmem:[%s6886_s3 + $0x4] ss:$8 sps:$4 sm:$0xff]   ;;  %239 = vmatprep.mubr.bf16.mxu1 %v6894_v1  ;;  %687 = vmatprep.mubr.bf16.mxu0 %v6894_v1  ;;  %v4961_v2 = vld [vmem:[%s6886_s3] ss:$8 sps:$4 sm:$0xff]   ;;  %v4967_v3 = vld [vmem:[%s6886_s3 + $0x14] ss:$8 sps:$4 sm:$0xff]  }
   0x2   :  { %207 = vmatprep.subr.bf16.mxu1 %v4954_v0  ;;  %655 = vmatprep.subr.bf16.mxu0 %v4954_v0  ;;  %v4974_v4 = vld [vmem:[%s6886_s3 + $0x10] ss:$8 sps:$4 sm:$0xff]   ;;  %v4981_v5 = vld [vmem:[%s6886_s3 + $0x24] ss:$8 sps:$4 sm:$0xff]   ;;  %v4988_v6 = vld [vmem:[%s6886_s3 + $0x20] ss:$8 sps:$4 sm:$0xff]  }
   0x3   :  { %208 = vmatpush1.bf16.msra.mxu1 %v4961_v2  ;;  %656 = vmatpush1.bf16.msra.mxu0 %v4961_v2  ;;  %v4995_v7 = vld [vmem:[%s6886_s3 + $0x34] ss:$8 sps:$4 sm:$0xff]   ;;  %v5001_v8 = vld [vmem:[%s6887_s0] sm:$0xff]  ;;  %v5007_v9 = vld [vmem:[%s6886_s3 + $0x30] ss:$8 sps:$4 sm:$0xff]   ;;  %vm444_vm2 = vcmask 1042434  }
   0x4   :  { %209 = vmatprep.subr.bf16.mxu1 %v4967_v3  ;;  %657 = vmatprep.subr.bf16.mxu0 %v4967_v3  ;;  %32 = vst [vmem:[#allocation2] sm:$0xff] %v5001_v8  ;;  %v5015_v10 = vld [vmem:[%s6886_s3 + $0x44] ss:$8 sps:$4 sm:$0xff]   ;;  %v5022_v11 = vld [vmem:[%s6886_s3 + $0x40] ss:$8 sps:$4 sm:$0xff]   ;;  %v102_v18 = vpack.c.bf16 %v5001_v8, %v5001_v8  ;;  %v5091_v22 = vld [vmem:[%s6888_s4 + $0x10] sm:$0xff]  }
   0x5   :  { %v5029_v12 = vld [vmem:[%s6886_s3 + $0x54] ss:$8 sps:$4 sm:$0xff]   ;;  %v5036_v13 = vld [vmem:[%s6886_s3 + $0x50] ss:$8 sps:$4 sm:$0xff]   ;;  %v5043_v14 = vld [vmem:[%s6886_s3 + $0x64] ss:$8 sps:$4 sm:$0xff]  }
   0x6   :  { %v5050_v15 = vld [vmem:[%s6886_s3 + $0x60] ss:$8 sps:$4 sm:$0xff]   ;;  %v5057_v16 = vld [vmem:[%s6886_s3 + $0x74] ss:$8 sps:$4 sm:$0xff]   ;;  %v5064_v17 = vld [vmem:[%s6886_s3 + $0x70] ss:$8 sps:$4 sm:$0xff]  }
   0x7   :  { %210 = vmatpush1.bf16.msra.mxu1 %v4974_v4  ;;  %658 = vmatpush1.bf16.msra.mxu0 %v4974_v4  ;;  %v5077_v19 = vld [vmem:[%s6888_s4] sm:$0xff]   ;;  %v5085_v21 = vld [vmem:[%s6888_s4 + $0x8] sm:$0xff]   ;;  %7041 = vst [vmem:[#allocation5_spill] sm:$0xff] %v5091_v22  ;;  %v5100_v23 = vld [vmem:[%s6888_s4 + $0x18] sm:$0xff]   ;;  %vm447_vm3 = vcmask 1043459   ;;  %vm450_vm4 = vcmask 1044484  }
   0x8   :  { %211 = vmatprep.subr.bf16.mxu1 %v4981_v5  ;;  %659 = vmatprep.subr.bf16.mxu0 %v4981_v5  ;;  %7039 = vst [vmem:[#allocation3_spill] sm:$0xff] %v5077_v19  ;;  %7040 = vst [vmem:[#allocation4_spill] sm:$0xff] %v5085_v21  ;;  %v5107_v24 = vld [vmem:[%s6888_s4 + $0x20] sm:$0xff]   ;;  %v5114_v25 = vld [vmem:[%s6888_s4 + $0x28] sm:$0xff]   ;;  %vm453_vm5 = vcmask 1045509   ;;  %vm456_vm6 = vcmask 1046534  }
   0x9   :  { %7042 = vst [vmem:[#allocation6_spill] sm:$0xff] %v5100_v23  ;;  %7043 = vst [vmem:[#allocation7_spill] sm:$0xff] %v5107_v24  ;;  %v5121_v26 = vld [vmem:[%s6888_s4 + $0x30] sm:$0xff]   ;;  %v5128_v27 = vld [vmem:[%s6888_s4 + $0x38] sm:$0xff]   ;;  %vm459_vm7 = vcmask 1047559   ;;  %vm3504_vm8 = vcmask 1040384  }
   0xa   :  { %7044 = vst [vmem:[#allocation8_spill] sm:$0xff] %v5114_v25  ;;  %7045 = vst [vmem:[#allocation9_spill] sm:$0xff] %v5121_v26  ;;  %v5136_v28 = vld [vmem:[%s6889_s1] sm:$0xff]  ;;  %v86_v29 = vld [vmem:[%s6889_s1 + $0x8] sm:$0xff]  ;;  %vm3513_vm9 = vcmask 1041408   ;;  %vm3522_vm10 = vcmask 1042432  }
   0xb   :  { %212 = vmatpush1.bf16.msra.mxu1 %v4988_v6  ;;  %660 = vmatpush1.bf16.msra.mxu0 %v4988_v6  ;;  %7046 = vst [vmem:[#allocation10_spill] sm:$0xff] %v5128_v27  ;;  %v87_v30 = vld [vmem:[%s6889_s1 + $0x10] sm:$0xff]  ;;  %v88_v31 = vld [vmem:[%s6889_s1 + $0x18] sm:$0xff]  ;;  %v89_v32 = vld [vmem:[%s6889_s1 + $0x20] sm:$0xff]  ;;  %v5162_v36 = vunpack.c.l.bf16 %v5136_v28  ;;  %v5164_v37 = vunpack.c.l.bf16 %v86_v29  ;;  %v5179_v45 = vunpack.c.h.bf16 %v86_v29  ;;  %vm3531_vm11 = vcmask 1043456  }
   0xc   :  { %213 = vmatprep.subr.bf16.mxu1 %v4995_v7  ;;  %661 = vmatprep.subr.bf16.mxu0 %v4995_v7  ;;  %v90_v33 = vld [vmem:[%s6889_s1 + $0x28] sm:$0xff]  ;;  %v91_v34 = vld [vmem:[%s6889_s1 + $0x30] sm:$0xff]  ;;  %v5159_v35 = vld [vmem:[%s6889_s1 + $0x38] sm:$0xff]  ;;  %v5166_v38 = vunpack.c.l.bf16 %v87_v30  ;;  %v5168_v39 = vunpack.c.l.bf16 %v88_v31  ;;  %v5170_v40 = vunpack.c.l.bf16 %v89_v32  ;;  %vm3540_vm12 = vcmask 1044480  }
   0xd   :  { %v5172_v41 = vunpack.c.l.bf16 %v90_v33  ;;  %v5174_v42 = vunpack.c.l.bf16 %v91_v34  ;;  %v5177_v43 = vunpack.c.l.bf16 %v5159_v35  ;;  %7051 = vst [vmem:[#allocation15_spill] sm:$0xff] %v5179_v45  ;;  %vm3549_vm13 = vcmask 1045504  }
   0xe   :  { %7047 = vst [vmem:[#allocation11_spill] sm:$0xff] %v5170_v40  ;;  %vm3558_vm14 = vcmask 1046528  }
   0xf   :  { %214 = vmatpush1.bf16.msra.mxu1 %v5007_v9  ;;  %662 = vmatpush1.bf16.msra.mxu0 %v5007_v9  ;;  %7048 = vst [vmem:[#allocation12_spill] sm:$0xff] %v5172_v41  ;;  %7049 = vst [vmem:[#allocation13_spill] sm:$0xff] %v5174_v42 }
  0x10   :  { %215 = vmatprep.subr.bf16.mxu1 %v5015_v10  ;;  %663 = vmatprep.subr.bf16.mxu0 %v5015_v10  ;;  %7050 = vst [vmem:[#allocation14_spill] sm:$0xff] %v5177_v43 }
  0x13   :  { %216 = vmatpush1.bf16.msra.mxu1 %v5022_v11  ;;  %664 = vmatpush1.bf16.msra.mxu0 %v5022_v11 }
  0x14   :  { %217 = vmatprep.subr.bf16.mxu1 %v5029_v12  ;;  %665 = vmatprep.subr.bf16.mxu0 %v5029_v12 }
  0x17   :  { %218 = vmatpush1.bf16.msra.mxu1 %v5036_v13  ;;  %666 = vmatpush1.bf16.msra.mxu0 %v5036_v13 }
  0x18   :  { %219 = vmatprep.subr.bf16.mxu1 %v5043_v14  ;;  %667 = vmatprep.subr.bf16.mxu0 %v5043_v14 }
  0x1b   :  { %220 = vmatpush1.bf16.msra.mxu1 %v5050_v15  ;;  %668 = vmatpush1.bf16.msra.mxu0 %v5050_v15 }
  0x1c   :  { %221 = vmatprep.subr.bf16.mxu1 %v5057_v16  ;;  %669 = vmatprep.subr.bf16.mxu0 %v5057_v16 }
  0x1f   :  { %222 = vmatpush1.bf16.msra.mxu1 %v5064_v17  ;;  %670 = vmatpush1.bf16.msra.mxu0 %v5064_v17 }
  0x20   :  { %1056 = vmatprep.subr.bf16.mxu0 %v4954_v0  ;;  %3966 = vmatprep.subr.bf16.mxu1 %v6896_v20 }
  0x22   :  { %240 = vmatmul.mubr.bf16.vlgmr.msra.gmra.mrb[0].mxu1 %v102_v18  ;;  %v5190_v18 = vunpack.c.h.bf16 %v87_v30 }
  0x23   :  { %3967 = vmatpush3.bf16.msra.mxu1 %v5077_v19  ;;  %3982 = vmatprep.mubr.msk.bf16.mxu1 %vm4909_vm0, %v6896_v20 }
  0x24   :  { %3968 = vmatprep.subr.bf16.mxu1 %v6896_v20  ;;  %7052 = vst [vmem:[#allocation16_spill] sm:$0xff] %v5190_v18 }
  0x27   :  { %3969 = vmatpush3.bf16.msra.mxu1 %v5085_v21 }
  0x28   :  { %3970 = vmatprep.subr.bf16.mxu1 %v6896_v20 }
  0x2b   :  { %3971 = vmatpush3.bf16.msra.mxu1 %v5091_v22 }
  0x2c   :  { %3972 = vmatprep.subr.bf16.mxu1 %v6896_v20 }
  0x2f   :  { %3973 = vmatpush3.bf16.msra.mxu1 %v5100_v23 }
  0x30   :  { %3974 = vmatprep.subr.bf16.mxu1 %v6896_v20 }
  0x33   :  { %3975 = vmatpush3.bf16.msra.mxu1 %v5107_v24 }
  0x34   :  { %3976 = vmatprep.subr.bf16.mxu1 %v6896_v20 }
  0x37   :  { %3977 = vmatpush3.bf16.msra.mxu1 %v5114_v25 }
  0x38   :  { %3978 = vmatprep.subr.bf16.mxu1 %v6896_v20 }
  0x3b   :  { %3979 = vmatpush3.bf16.msra.mxu1 %v5121_v26 }
  0x3c   :  { %3980 = vmatprep.subr.bf16.mxu1 %v6896_v20 }
  0x3f   :  { %3981 = vmatpush3.bf16.msra.mxu1 %v5128_v27 }
  0x40   :  { %3986 = vmatprep.subr.bf16.mxu1 %v6896_v20 }
  0xf5   :  { %v241_v44 = vpop.f32.mrb[0].mxu1 }
  0xf6   :  { %v250_v46 = vrot.slane %v241_v44, 1  ;;  %v252_v47 = vrot.slane %v241_v44, 2  ;;  %v254_v48 = vrot.slane %v241_v44, 3  ;;  %v256_v49 = vrot.slane %v241_v44, 4  ;;  %v5181_v50 = vpop.f32.mrb[1].mxu1 }
  0xf7   :  { %v258_v51 = vrot.slane %v241_v44, 5  ;;  %v260_v52 = vrot.slane %v241_v44, 6  ;;  %v262_v53 = vrot.slane %v241_v44, 7  ;;  %v280_v54 = vadd.f32 %v241_v44, %v5162_v36  ;;  %v245_v55 = vpop.f32.mrb[2].mxu1 }
  0xf8   :  { %v282_v56 = vadd.f32 %v250_v46, %v5164_v37  ;;  %v284_v57 = vadd.f32 %v252_v47, %v5166_v38  ;;  %v286_v58 = vadd.f32 %v254_v48, %v5168_v39  ;;  %v288_v59 = vadd.f32 %v256_v49, %v5170_v40  ;;  %v246_v60 = vpop.f32.mrb[3].mxu1 }
  0xf9   :  { %v290_v61 = vadd.f32 %v258_v51, %v5172_v41  ;;  %v292_v62 = vadd.f32 %v260_v52, %v5174_v42  ;;  %v3718_v63 = vmul.f32 -1.442695, %v280_v54  ;;  %v294_v29 = vadd.f32 %v262_v53, %v5177_v43 }
  0xfa   :  { %v3720_v44 = vmul.f32 -1.442695, %v282_v56  ;;  %v3722_v55 = vmul.f32 -1.442695, %v284_v57  ;;  %v3724_v1 = vmul.f32 -1.442695, %v286_v58  ;;  %v5193_v47 = vunpack.c.h.bf16 %v88_v31 }
  0xfb   :  { %4195 = vpow2.f32 %v3718_v63  ;;  %v3726_v46 = vmul.f32 -1.442695, %v288_v59  ;;  %v5195_v48 = vunpack.c.h.bf16 %v89_v32  ;;  %v3728_v49 = vmul.f32 -1.442695, %v290_v61 }
  0xfc   :  { %7053 = vst [vmem:[#allocation17_spill] sm:$0xff] %v5193_v47  ;;  %4197 = vpow2.f32 %v3720_v44  ;;  %v251_v51 = vrot.slane %v5181_v50, 1  ;;  %v253_v52 = vrot.slane %v5181_v50, 2  ;;  %v3730_v30 = vmul.f32 -1.442695, %v292_v62 }
  0xfd   :  { %7054 = vst [vmem:[#allocation18_spill] sm:$0xff] %v5195_v48  ;;  %4199 = vpow2.f32 %v3722_v55  ;;  %v255_v54 = vrot.slane %v5181_v50, 3  ;;  %v257_v53 = vrot.slane %v5181_v50, 4  ;;  %v3732_v56 = vmul.f32 -1.442695, %v294_v29 }
  0xfe   :  { %4201 = vpow2.f32 %v3724_v1  ;;  %v283_v57 = vadd.f32 %v251_v51, %v5179_v45  ;;  %v285_v31 = vadd.f32 %v253_v52, %v5190_v18  ;;  %v5205_v62 = vunpack.c.h.bf16 %v90_v33 }
  0xff   :  { %4203 = vpow2.f32 %v3726_v46  ;;  %v287_v32 = vadd.f32 %v255_v54, %v5193_v47  ;;  %v289_v58 = vadd.f32 %v257_v53, %v5195_v48  ;;  %v259_v1 = vrot.slane %v5181_v50, 5 }
 0x100   :  { %4205 = vpow2.f32 %v3728_v49  ;;  %v3721_v59 = vmul.f32 -1.442695, %v283_v57  ;;  %v3723_v60 = vmul.f32 -1.442695, %v285_v31  ;;  %7055 = vst [vmem:[#allocation19_spill] sm:$0xff] %v5205_v62  ;;  %v5208_v29 = vunpack.c.h.bf16 %v91_v34 }
 0x101   :  { %4207 = vpow2.f32 %v3730_v30  ;;  %v3725_v61 = vmul.f32 -1.442695, %v287_v32  ;;  %v3727_v63 = vmul.f32 -1.442695, %v289_v58  ;;  %v261_v44 = vrot.slane %v5181_v50, 6 }
 0x102   :  { %4209 = vpow2.f32 %v3732_v56  ;;  %7056 = vst [vmem:[#allocation20_spill] sm:$0xff] %v5208_v29  ;;  %v5212_v46 = vunpack.c.h.bf16 %v5159_v35  ;;  %v263_v49 = vrot.slane %v5181_v50, 7  ;;  %v291_v54 = vadd.f32 %v259_v1, %v5205_v62 }
 0x103   :  { %4211 = vpow2.f32 %v3721_v59  ;;  %v293_v56 = vadd.f32 %v261_v44, %v5208_v29 }
 0x104   :  { %7057 = vst [vmem:[#allocation21_spill] sm:$0xff] %v5212_v46  ;;  %4213 = vpow2.f32 %v3723_v60  ;;  %v295_v35 = vadd.f32 %v263_v49, %v5212_v46 }
 0x105   :  { %v4196_v55 = vpop.eup %4195  ;;  %4215 = vpow2.f32 %v3725_v61  ;;  %v3729_v61 = vmul.f32 -1.442695, %v291_v54  ;;  %v3731_v1 = vmul.f32 -1.442695, %v293_v56  ;;  %v6900_v54 = vrot.slane %v5001_v8, 2 }
 0x106   :  { %v4198_v51 = vpop.eup %4197  ;;  %v344_v52 = vadd.f32 1.0, %v4196_v55  ;;  %4217 = vpow2.f32 %v3727_v63 }
 0x107   :  { %v4200_v33 = vpop.eup %4199  ;;  %v346_v30 = vadd.f32 1.0, %v4198_v51  ;;  %v3733_v51 = vmul.f32 -1.442695, %v295_v35 }
 0x108   :  { %v4202_v34 = vpop.eup %4201  ;;  %v348_v53 = vadd.f32 1.0, %v4200_v33  ;;  %4219 = vrcp.f32 %v344_v52 }
 0x109   :  { %v4204_v57 = vpop.eup %4203  ;;  %v350_v31 = vadd.f32 1.0, %v4202_v34  ;;  %4221 = vrcp.f32 %v346_v30  ;;  %v6898_v34 = vrot.slane %v5001_v8, 1 }
 0x10a   :  { %v4206_v32 = vpop.eup %4205  ;;  %v352_v58 = vadd.f32 1.0, %v4204_v57  ;;  %4223 = vrcp.f32 %v348_v53 }
 0x10b   :  { %v4208_v59 = vpop.eup %4207  ;;  %v354_v60 = vadd.f32 1.0, %v4206_v32  ;;  %4225 = vrcp.f32 %v350_v31  ;;  %v6899_v32 = vrot.slane %v5001_v8, 3 }
 0x10c   :  { %v356_v55 = vadd.f32 1.0, %v4208_v59  ;;  %4227 = vrcp.f32 %v352_v58  ;;  %v4210_v63 = vpop.eup %4209  ;;  %v6903_v59 = vrot.slane %v5001_v8, 4 }
 0x10d   :  { %4229 = vrcp.f32 %v354_v60  ;;  %v4212_v52 = vpop.eup %4211  ;;  %v358_v58 = vadd.f32 1.0, %v4210_v63 }
 0x10e   :  { %4231 = vrcp.f32 %v356_v55  ;;  %v4214_v44 = vpop.eup %4213  ;;  %v347_v33 = vadd.f32 1.0, %v4212_v52  ;;  %v6910_v55 = vrot.slane %v5001_v8, 5  ;;  %v6911_v52 = vrot.slane %v5001_v8, 6 }
 0x10f   :  { %4233 = vpow2.f32 %v3729_v61  ;;  %v4216_v30 = vpop.eup %4215  ;;  %v349_v49 = vadd.f32 1.0, %v4214_v44 }
 0x110   :  { %4235 = vpow2.f32 %v3731_v1  ;;  %v4218_v53 = vpop.eup %4217  ;;  %v351_v57 = vadd.f32 1.0, %v4216_v30 }
 0x111   :  { %4237 = vpow2.f32 %v3733_v51  ;;  %v353_v56 = vadd.f32 1.0, %v4218_v53 }
 0x112   :  { %v4220_v31 = vpop.eup %4219  ;;  %4239 = vrcp.f32 %v347_v33 }
 0x113   :  { %v4222_v35 = vpop.eup %4221  ;;  %v408_v60 = vmul.f32 %v4220_v31, %v5001_v8  ;;  %4241 = vrcp.f32 %v349_v49 }
 0x114   :  { %v4224_v61 = vpop.eup %4223  ;;  %v409_v1 = vmul.f32 %v4222_v35, %v6898_v34  ;;  %4243 = vrcp.f32 %v351_v57 }
 0x115   :  { %v4226_v51 = vpop.eup %4225  ;;  %v410_v44 = vmul.f32 %v4224_v61, %v6900_v54  ;;  %v416_v33 = vpack.c.bf16 %v408_v60, %v408_v60  ;;  %4245 = vrcp.f32 %v353_v56 }
 0x116   :  { %v4228_v63 = vpop.eup %4227  ;;  %v411_v30 = vmul.f32 %v4226_v51, %v6899_v32  ;;  %v417_v53 = vpack.c.bf16 %v409_v1, %v409_v1  ;;  %4247 = vrcp.f32 %v358_v58 }
 0x117   :  { %v4230_v49 = vpop.eup %4229  ;;  %v412_v31 = vmul.f32 %v4228_v63, %v6903_v59  ;;  %v418_v35 = vpack.c.bf16 %v410_v44, %v410_v44  ;;  %v432_v1 = vunpack.c.l.b16 %v416_v33  ;;  %v399_v33 = vrot.slane %v5001_v8, 7 }
 0x118   :  { %v4232_v57 = vpop.eup %4231  ;;  %v413_v20 = vmul.f32 %v4230_v49, %v6910_v55  ;;  %v419_v34 = vpack.c.bf16 %v411_v30, %v411_v30  ;;  %v433_v61 = vunpack.c.l.b16 %v417_v53 }
 0x119   :  { %v4234_v60 = vpop.eup %4233  ;;  %v414_v56 = vmul.f32 %v4232_v57, %v6911_v52  ;;  %v420_v51 = vpack.c.bf16 %v412_v31, %v412_v31  ;;  %v434_v32 = vunpack.c.l.b16 %v418_v35 }
 0x11a   :  { %v4236_v58 = vpop.eup %4235  ;;  %v355_v54 = vadd.f32 1.0, %v4234_v60  ;;  %v421_v46 = vpack.c.bf16 %v413_v20, %v413_v20  ;;  %v435_v63 = vunpack.c.l.b16 %v419_v34  ;;  %v440_v44 = vrot.slane %v433_v61, 7 }
 0x11b   :  { %v4238_v59 = vpop.eup %4237  ;;  %v357_v29 = vadd.f32 1.0, %v4236_v58  ;;  %v436_v62 = vunpack.c.l.b16 %v420_v51  ;;  %v443_v48 = vrot.slane %v434_v32, 6  ;;  %v422_v30 = vpack.c.bf16 %v414_v56, %v414_v56 }
 0x11c   :  { %4249 = vrcp.f32 %v355_v54  ;;  %v442_v53 = vsel %vm441_vm1, %v440_v44, %v432_v1  ;;  %v446_v49 = vrot.slane %v435_v63, 5  ;;  %v5238_v55 = vpop.eup %4239  ;;  %v437_v34 = vunpack.c.l.b16 %v421_v46 }
 0x11d   :  { %4251 = vrcp.f32 %v357_v29  ;;  %v445_v31 = vsel %vm444_vm2, %v443_v48, %v442_v53  ;;  %v5242_v20 = vpop.eup %4241  ;;  %v359_v32 = vadd.f32 1.0, %v4238_v59  ;;  %v449_v54 = vrot.slane %v436_v62, 4 }
 0x11e   :  { %v448_v35 = vsel %vm447_vm3, %v446_v49, %v445_v31  ;;  %v5245_v57 = vpop.eup %4243  ;;  %v584_v61 = vsub.f32 1.0, %v5238_v55  ;;  %v585_v60 = vsub.f32 1.0, %v5242_v20  ;;  %v438_v29 = vunpack.c.l.b16 %v422_v30 }
 0x11f   :  { %v5249_v56 = vpop.eup %4245  ;;  %4253 = vrcp.f32 %v359_v32  ;;  %v586_v48 = vsub.f32 1.0, %v5245_v57  ;;  %v451_v46 = vsel %vm450_vm4, %v449_v54, %v448_v35  ;;  %v7058_v59 = vrot.slane %v5001_v8, 1 }
 0x120   :  { %v4248_v51 = vpop.eup %4247  ;;  %v587_v1 = vsub.f32 1.0, %v5249_v56  ;;  %v7059_v62 = vrot.slane %v5001_v8, 2  ;;  %v452_v53 = vrot.slane %v437_v34, 3  ;;  %v7060_v30 = vrot.slane %v5001_v8, 3 }
 0x121   :  { %v5256_v58 = vmul.f32 %v584_v61, %v7058_v59  ;;  %v415_v44 = vmul.f32 %v4248_v51, %v399_v33  ;;  %v7061_v31 = vrot.slane %v5001_v8, 4  ;;  %v455_v61 = vrot.slane %v438_v29, 2 }
 0x122   :  { %v5260_v63 = vmul.f32 %v585_v60, %v7059_v62  ;;  %v5264_v49 = vmul.f32 %v586_v48, %v7060_v30  ;;  %v454_v54 = vsel %vm453_vm5, %v452_v53, %v451_v46  ;;  %v7063_v53 = vrot.slane %v5001_v8, 6 }
 0x123   :  { %v5268_v32 = vmul.f32 %v587_v1, %v7061_v31  ;;  %v423_v35 = vpack.c.bf16 %v415_v44, %v415_v44  ;;  %v457_v34 = vsel %vm456_vm6, %v455_v61, %v454_v54  ;;  %v7062_v1 = vrot.slane %v5001_v8, 5 }
 0x125   :  { %v439_v52 = vunpack.c.l.b16 %v423_v35 }
 0x126   :  { %v5271_v59 = vpop.eup %4249 }
 0x127   :  { %v5273_v60 = vpop.eup %4251  ;;  %v588_v48 = vsub.f32 1.0, %v5271_v59  ;;  %v458_v51 = vrot.slane %v439_v52, 1  ;;  %v7064_v52 = vmov 0.0  }
 0x128   :  { %v589_v62 = vsub.f32 1.0, %v5273_v60 }
 0x129   :  { %v5280_v44 = vmul.f32 %v588_v48, %v7062_v1  ;;  %v5282_v46 = vpop.eup %4253  ;;  %v460_v29 = vsel %vm459_vm7, %v458_v51, %v457_v34  ;;  %v3879_v1 = vld [vmem:[%s6890_s2 + $0x8] sm:$0xff]  }
 0x12a   :  { %v5287_v30 = vmul.f32 %v589_v62, %v7063_v53  ;;  %v461_v31 = vpack.c.b16 %v460_v29, %v460_v29  ;;  %v590_v35 = vsub.f32 1.0, %v5282_v46  ;;  %v3864_v62 = vld [vmem:[%s6890_s2] sm:$0xff]  }
 0x12b   :  { %v5327_v29 = vunpack.c.l.bf16 %v3864_v62  ;;  %v5329_v53 = vunpack.c.h.bf16 %v3864_v62 }
 0x12c   :  { %3983 = vmatmul.mubr.bf16.vlgmr.msra.gmra.mrb[4].mxu1 %v461_v31  ;;  %v5290_v54 = vmul.f32 %v590_v35, %v399_v33  ;;  %v5311_v33 = vunpack.c.h.bf16 %v5136_v28  ;;  %v3880_v28 = vld [vmem:[%s6890_s2 + $0x10] sm:$0xff]   ;;  %v5331_v31 = vunpack.c.l.bf16 %v3879_v1  ;;  %v5333_v35 = vunpack.c.h.bf16 %v3879_v1 }
 0x12d   :  { %3987 = vmatpush3.bf16.msra.mxu1 %v5077_v19  ;;  %4002 = vmatprep.mubr.msk.bf16.mxu1 %vm4909_vm0, %v7064_v52  ;;  %7066 = vst [vmem:[#allocation23_spill] sm:$0xff] %v5327_v29  ;;  %7067 = vst [vmem:[#allocation24_spill] sm:$0xff] %v5329_v53 }
 0x12e   :  { %3988 = vmatprep.subr.bf16.mxu1 %v7064_v52  ;;  %7065 = vst [vmem:[#allocation22_spill] sm:$0xff] %v5311_v33  ;;  %v281_v61 = vadd.f32 %v5181_v50, %v5311_v33  ;;  %v3881_v50 = vld [vmem:[%s6890_s2 + $0x18] sm:$0xff]   ;;  %7068 = vst [vmem:[#allocation25_spill] sm:$0xff] %v5331_v31 }
 0x12f   :  { %7069 = vst [vmem:[#allocation26_spill] sm:$0xff] %v5333_v35 }
 0x130   :  { %v3719_v34 = vmul.f32 -1.442695, %v281_v61  ;;  %v5335_v61 = vunpack.c.l.bf16 %v3880_v28 }
 0x131   :  { %3989 = vmatpush3.bf16.msra.mxu1 %v5085_v21 }
 0x132   :  { %3990 = vmatprep.subr.bf16.mxu1 %v7064_v52  ;;  %4255 = vpow2.f32 %v3719_v34  ;;  %7070 = vst [vmem:[#allocation27_spill] sm:$0xff] %v5335_v61  ;;  %v5337_v34 = vunpack.c.h.bf16 %v3880_v28 }
 0x134   :  { %7071 = vst [vmem:[#allocation28_spill] sm:$0xff] %v5337_v34 }
 0x135   :  { %3991 = vmatpush3.bf16.msra.mxu1 %v5091_v22 }
 0x136   :  { %3992 = vmatprep.subr.bf16.mxu1 %v7064_v52 }
 0x139   :  { %3993 = vmatpush3.bf16.msra.mxu1 %v5100_v23 }
 0x13a   :  { %3994 = vmatprep.subr.bf16.mxu1 %v7064_v52 }
 0x13c   :  { %v4256_v48 = vpop.eup %4255 }
 0x13d   :  { %3995 = vmatpush3.bf16.msra.mxu1 %v5107_v24  ;;  %v345_v51 = vadd.f32 1.0, %v4256_v48  ;;  %v5339_v48 = vunpack.c.l.bf16 %v3881_v50 }
 0x13e   :  { %3996 = vmatprep.subr.bf16.mxu1 %v7064_v52 }
 0x13f   :  { %4257 = vrcp.f32 %v345_v51  ;;  %7072 = vst [vmem:[#allocation29_spill] sm:$0xff] %v5339_v48 }
 0x141   :  { %3997 = vmatpush3.bf16.msra.mxu1 %v5114_v25 }
 0x142   :  { %3998 = vmatprep.subr.bf16.mxu1 %v7064_v52 }
 0x145   :  { %3999 = vmatpush3.bf16.msra.mxu1 %v5121_v26  ;;  %v5341_v26 = vunpack.c.h.bf16 %v3881_v50 }
 0x146   :  { %4000 = vmatprep.subr.bf16.mxu1 %v7064_v52 }
 0x147   :  { %7073 = vst [vmem:[#allocation30_spill] sm:$0xff] %v5341_v26 }
 0x149   :  { %4001 = vmatpush3.bf16.msra.mxu1 %v5128_v27 }
 0x14a   :  { %4006 = vmatprep.subr.bf16.mxu1 %v7064_v52 }
 0x1ff   :  { %v545_v47 = vpop.f32.mrb[4].mxu1 }
 0x200   :  { %v552_v18 = vrot.slane %v545_v47, 1  ;;  %v553_v45 = vrot.slane %v545_v47, 2  ;;  %v554_v33 = vrot.slane %v545_v47, 3  ;;  %v555_v27 = vrot.slane %v545_v47, 4  ;;  %v3984_v51 = vpop.f32.mrb[5].mxu1 }
 0x201   :  { %v556_v62 = vrot.slane %v545_v47, 5  ;;  %v557_v25 = vrot.slane %v545_v47, 6  ;;  %v567_v24 = vadd.f32 %v5327_v29, %v545_v47  ;;  %v548_v1 = vpop.f32.mrb[6].mxu1  ;;  %v558_v23 = vrot.slane %v545_v47, 7  ;;  %v4258_v47 = vpop.eup %4257 }
 0x202   :  { %v568_v22 = vadd.f32 %v5329_v53, %v552_v18  ;;  %v569_v28 = vadd.f32 %v5331_v31, %v553_v45  ;;  %v570_v21 = vadd.f32 %v5333_v35, %v554_v33  ;;  %v3985_v52 = vpop.f32.mrb[7].mxu1  ;;  %v571_v19 = vadd.f32 %v5335_v61, %v555_v27 }
 0x203   :  { %4259 = vtanh.f32 %v567_v24  ;;  %v572_v51 = vadd.f32 %v5337_v34, %v556_v62  ;;  %v573_v50 = vadd.f32 %v5339_v48, %v557_v25  ;;  %v574_v29 = vadd.f32 %v5341_v26, %v558_v23 }
 0x204   :  { %4261 = vtanh.f32 %v568_v22  ;;  %v583_v45 = vsub.f32 1.0, %v4258_v47 }
 0x205   :  { %4263 = vtanh.f32 %v569_v28 }
 0x206   :  { %4265 = vtanh.f32 %v570_v21  ;;  %v591_v27 = vmul.f32 %v583_v45, %v5001_v8 }
 0x207   :  { %4267 = vtanh.f32 %v571_v19 }
 0x208   :  { %4269 = vtanh.f32 %v572_v51 }
 0x209   :  { %4271 = vtanh.f32 %v573_v50 }
 0x20a   :  { %4273 = vtanh.f32 %v574_v29 }
 0x20d   :  { %v4260_v18 = vpop.eup %4259 }
 0x20e   :  { %v4262_v52 = vpop.eup %4261  ;;  %v599_v24 = vmul.f32 %v4260_v18, %v4258_v47 }
 0x20f   :  { %v4264_v33 = vpop.eup %4263  ;;  %v600_v22 = vmul.f32 %v4262_v52, %v5238_v55 }
 0x210   :  { %v4266_v62 = vpop.eup %4265  ;;  %v601_v25 = vmul.f32 %v4264_v33, %v5242_v20  ;;  %v5354_v1 = vadd.f32 %v599_v24, %v591_v27 }
 0x211   :  { %v4268_v21 = vpop.eup %4267  ;;  %v602_v19 = vmul.f32 %v4266_v62, %v5245_v57  ;;  %v5358_v23 = vadd.f32 %v600_v22, %v5256_v58 }
 0x212   :  { %v4270_v29 = vpop.eup %4269  ;;  %v603_v28 = vmul.f32 %v4268_v21, %v5249_v56  ;;  %v5362_v8 = vadd.f32 %v601_v25, %v5260_v63  ;;  %v615_v55 = vpack.c.bf16 %v5354_v1, %v5354_v1 }
 0x213   :  { %v4272_v51 = vpop.eup %4271  ;;  %v604_v20 = vmul.f32 %v4270_v29, %v5271_v59  ;;  %v5368_v50 = vadd.f32 %v602_v19, %v5264_v49  ;;  %v616_v57 = vpack.c.bf16 %v5358_v23, %v5358_v23 }
 0x214   :  { %v4274_v58 = vpop.eup %4273  ;;  %v605_v47 = vmul.f32 %v4272_v51, %v5273_v60  ;;  %v5374_v56 = vadd.f32 %v603_v28, %v5268_v32  ;;  %v617_v63 = vpack.c.bf16 %v5362_v8, %v5362_v8  ;;  %v631_v32 = vunpack.c.l.b16 %v615_v55 }
 0x215   :  { %v606_v45 = vmul.f32 %v4274_v58, %v5282_v46  ;;  %v5380_v18 = vadd.f32 %v604_v20, %v5280_v44  ;;  %v618_v49 = vpack.c.bf16 %v5368_v50, %v5368_v50  ;;  %v632_v59 = vunpack.c.l.b16 %v616_v57 }
 0x216   :  { %v5385_v52 = vadd.f32 %v605_v47, %v5287_v30  ;;  %v619_v60 = vpack.c.bf16 %v5374_v56, %v5374_v56  ;;  %v633_v27 = vunpack.c.l.b16 %v617_v63 }
 0x217   :  { %v5390_v24 = vadd.f32 %v606_v45, %v5290_v54  ;;  %v620_v46 = vpack.c.bf16 %v5380_v18, %v5380_v18  ;;  %v634_v44 = vunpack.c.l.b16 %v618_v49  ;;  %v639_v33 = vrot.slane %v632_v59, 7 }
 0x218   :  { %v621_v22 = vpack.c.bf16 %v5385_v52, %v5385_v52  ;;  %v635_v62 = vunpack.c.l.b16 %v619_v60  ;;  %v641_v25 = vrot.slane %v633_v27, 6 }
 0x219   :  { %v622_v30 = vpack.c.bf16 %v5390_v24, %v5390_v24  ;;  %v636_v21 = vunpack.c.l.b16 %v620_v46  ;;  %v640_v19 = vsel %vm441_vm1, %v639_v33, %v631_v32  ;;  %v643_v29 = vrot.slane %v634_v44, 5 }
 0x21a   :  { %v637_v28 = vunpack.c.l.b16 %v621_v22  ;;  %v642_v54 = vsel %vm444_vm2, %v641_v25, %v640_v19  ;;  %v645_v55 = vrot.slane %v635_v62, 4  ;;  %v7074_v32 = vmov 0  }
 0x21b   :  { %v638_v51 = vunpack.c.l.b16 %v622_v30  ;;  %v644_v20 = vsel %vm447_vm3, %v643_v29, %v642_v54  ;;  %v647_v57 = vrot.slane %v636_v21, 3 }
 0x21c   :  { %v646_v58 = vsel %vm450_vm4, %v645_v55, %v644_v20  ;;  %v649_v47 = vrot.slane %v637_v28, 2 }
 0x21d   :  { %v648_v63 = vsel %vm453_vm5, %v647_v57, %v646_v58  ;;  %v651_v45 = vrot.slane %v638_v51, 1 }
 0x21e   :  { %v650_v49 = vsel %vm456_vm6, %v649_v47, %v648_v63 }
 0x21f   :  { %v652_v59 = vsel %vm459_vm7, %v651_v45, %v650_v49 }
 0x220   :  { %v653_v60 = vpack.c.b16 %v652_v59, %v652_v59 }
 0x222   :  { %688 = vmatmul.mubr.bf16.vlgmr.msra.gmra.mrb[0].mxu0 %v653_v60 }
 0x223   :  { %1057 = vmatpush1.bf16.msra.mxu0 %v4961_v2  ;;  %1088 = vmatprep.mubr.bf16.mxu0 %v7074_v32 }
 0x224   :  { %1058 = vmatprep.subr.bf16.mxu0 %v4967_v3 }
 0x227   :  { %1059 = vmatpush1.bf16.msra.mxu0 %v4974_v4 }
 0x228   :  { %1060 = vmatprep.subr.bf16.mxu0 %v4981_v5 }
 0x22b   :  { %1061 = vmatpush1.bf16.msra.mxu0 %v4988_v6 }
 0x22c   :  { %1062 = vmatprep.subr.bf16.mxu0 %v4995_v7 }
 0x22f   :  { %1063 = vmatpush1.bf16.msra.mxu0 %v5007_v9 }
 0x230   :  { %1064 = vmatprep.subr.bf16.mxu0 %v5015_v10 }
 0x233   :  { %1065 = vmatpush1.bf16.msra.mxu0 %v5022_v11 }
 0x234   :  { %1066 = vmatprep.subr.bf16.mxu0 %v5029_v12 }
 0x237   :  { %1067 = vmatpush1.bf16.msra.mxu0 %v5036_v13 }
 0x238   :  { %1068 = vmatprep.subr.bf16.mxu0 %v5043_v14 }
 0x23b   :  { %1069 = vmatpush1.bf16.msra.mxu0 %v5050_v15 }
 0x23c   :  { %1070 = vmatprep.subr.bf16.mxu0 %v5057_v16 }
 0x23f   :  { %1071 = vmatpush1.bf16.msra.mxu0 %v5064_v17 }
 0x240   :  { %1457 = vmatprep.subr.bf16.mxu0 %v4954_v0 }
 0x2f5   :  { %v689_v2 = vpop.f32.mrb[0].mxu0 }
 0x2f6   :  { %v698_v3 = vrot.slane %v689_v2, 7  ;;  %v700_v4 = vrot.slane %v689_v2, 1  ;;  %v702_v5 = vrot.slane %v689_v2, 2  ;;  %v704_v6 = vrot.slane %v689_v2, 3  ;;  %v5422_v7 = vpop.f32.mrb[1].mxu0 }
 0x2f7   :  { %v706_v9 = vrot.slane %v689_v2, 4  ;;  %v708_v10 = vrot.slane %v689_v2, 5  ;;  %v730_v11 = vadd.f32 %v689_v2, %v5164_v37  ;;  %v693_v12 = vpop.f32.mrb[2].mxu0  ;;  %v710_v17 = vrot.slane %v689_v2, 6 }
 0x2f8   :  { %v728_v13 = vadd.f32 %v698_v3, %v5162_v36  ;;  %v732_v14 = vadd.f32 %v700_v4, %v5166_v38  ;;  %v734_v15 = vadd.f32 %v702_v5, %v5168_v39  ;;  %v736_v0 = vadd.f32 %v704_v6, %v5170_v40  ;;  %v694_v16 = vpop.f32.mrb[3].mxu0 }
 0x2f9   :  { %v738_v27 = vadd.f32 %v706_v9, %v5172_v41  ;;  %v740_v46 = vadd.f32 %v708_v10, %v5174_v42  ;;  %v3744_v44 = vmul.f32 -1.442695, %v730_v11  ;;  %v742_v19 = vadd.f32 %v710_v17, %v5177_v43 }
 0x2fa   :  { %v3742_v33 = vmul.f32 -1.442695, %v728_v13  ;;  %v3746_v22 = vmul.f32 -1.442695, %v732_v14  ;;  %v3748_v62 = vmul.f32 -1.442695, %v734_v15 }
 0x2fb   :  { %4275 = vpow2.f32 %v3744_v44  ;;  %v3750_v25 = vmul.f32 -1.442695, %v736_v0  ;;  %v3752_v30 = vmul.f32 -1.442695, %v738_v27  ;;  %v3754_v21 = vmul.f32 -1.442695, %v740_v46 }
 0x2fc   :  { %4277 = vpow2.f32 %v3742_v33  ;;  %v3756_v29 = vmul.f32 -1.442695, %v742_v19  ;;  %v5433_v4 = vrot.slane %v5358_v23, 7  ;;  %v5436_v6 = vrot.slane %v5354_v1, 7 }
 0x2fd   :  { %4279 = vpow2.f32 %v3746_v22  ;;  %v5439_v10 = vrot.slane %v5362_v8, 7  ;;  %v5443_v14 = vrot.slane %v5368_v50, 7  ;;  %v5447_v23 = vrot.slane %v5374_v56, 7 }
 0x2fe   :  { %4281 = vpow2.f32 %v3748_v62  ;;  %7075 = vst [vmem:[#allocation31_spill] sm:$0xff] %v5433_v4  ;;  %7076 = vst [vmem:[#allocation32_spill] sm:$0xff] %v5436_v6  ;;  %v5451_v17 = vrot.slane %v5380_v18, 7  ;;  %v5455_v50 = vrot.slane %v5385_v52, 7 }
 0x2ff   :  { %4283 = vpow2.f32 %v3750_v25  ;;  %7077 = vst [vmem:[#allocation33_spill] sm:$0xff] %v5439_v10  ;;  %7078 = vst [vmem:[#allocation34_spill] sm:$0xff] %v5443_v14 }
 0x300   :  { %4285 = vpow2.f32 %v3752_v30  ;;  %7079 = vst [vmem:[#allocation35_spill] sm:$0xff] %v5447_v23  ;;  %7080 = vst [vmem:[#allocation36_spill] sm:$0xff] %v5451_v17 }
 0x301   :  { %4287 = vpow2.f32 %v3754_v21  ;;  %7081 = vst [vmem:[#allocation37_spill] sm:$0xff] %v5455_v50 }
 0x302   :  { %4289 = vpow2.f32 %v3756_v29 }
 0x305   :  { %v4276_v28 = vpop.eup %4275 }
 0x306   :  { %v4278_v54 = vpop.eup %4277  ;;  %v794_v55 = vadd.f32 1.0, %v4276_v28 }
 0x307   :  { %v4280_v51 = vpop.eup %4279  ;;  %v792_v20 = vadd.f32 1.0, %v4278_v54 }
 0x308   :  { %v4282_v57 = vpop.eup %4281  ;;  %v796_v58 = vadd.f32 1.0, %v4280_v51  ;;  %4291 = vrcp.f32 %v794_v55 }
 0x309   :  { %v4284_v47 = vpop.eup %4283  ;;  %v798_v63 = vadd.f32 1.0, %v4282_v57  ;;  %4293 = vrcp.f32 %v792_v20 }
 0x30a   :  { %v4286_v45 = vpop.eup %4285  ;;  %v800_v49 = vadd.f32 1.0, %v4284_v47  ;;  %4295 = vrcp.f32 %v796_v58 }
 0x30b   :  { %v4288_v59 = vpop.eup %4287  ;;  %v802_v60 = vadd.f32 1.0, %v4286_v45  ;;  %4297 = vrcp.f32 %v798_v63 }
 0x30c   :  { %v804_v2 = vadd.f32 1.0, %v4288_v59  ;;  %4299 = vrcp.f32 %v800_v49  ;;  %v4290_v3 = vpop.eup %4289  ;;  %v5464_v59 = vrot.slane %v5390_v24, 7  ;;  %v7083_v24 = vld [vmem:[#allocation3_spill] sm:$0xff] }
 0x30d   :  { %4301 = vrcp.f32 %v802_v60  ;;  %v806_v11 = vadd.f32 1.0, %v4290_v3 }
 0x30e   :  { %4303 = vrcp.f32 %v804_v2  ;;  %7082 = vst [vmem:[#allocation38_spill] sm:$0xff] %v5464_v59 }
 0x30f   :  { %4305 = vrcp.f32 %v806_v11 }
 0x312   :  { %v4292_v5 = vpop.eup %4291 }
 0x313   :  { %v4294_v9 = vpop.eup %4293  ;;  %v865_v12 = vmul.f32 %v4292_v5, %v5433_v4 }
 0x314   :  { %v4296_v13 = vpop.eup %4295  ;;  %v864_v15 = vmul.f32 %v4294_v9, %v5436_v6 }
 0x315   :  { %v4298_v0 = vpop.eup %4297  ;;  %v866_v1 = vmul.f32 %v4296_v13, %v5439_v10  ;;  %v873_v46 = vpack.c.bf16 %v865_v12, %v865_v12 }
 0x316   :  { %v4300_v16 = vpop.eup %4299  ;;  %v867_v8 = vmul.f32 %v4298_v0, %v5443_v14  ;;  %v872_v27 = vpack.c.bf16 %v864_v15, %v864_v15 }
 0x317   :  { %v4302_v44 = vpop.eup %4301  ;;  %v868_v33 = vmul.f32 %v4300_v16, %v5447_v23  ;;  %v874_v22 = vpack.c.bf16 %v866_v1, %v866_v1  ;;  %v889_v28 = vunpack.c.l.b16 %v873_v46  ;;  %v7085_v46 = vld [vmem:[#allocation4_spill] sm:$0xff] }
 0x318   :  { %v4304_v56 = vpop.eup %4303  ;;  %v869_v62 = vmul.f32 %v4302_v44, %v5451_v17  ;;  %v875_v25 = vpack.c.bf16 %v867_v8, %v867_v8  ;;  %v888_v30 = vunpack.c.l.b16 %v872_v27  ;;  %v7084_v27 = vmov 0.0   ;;  %v7086_v44 = vld [vmem:[#allocation5_spill] sm:$0xff] }
 0x319   :  { %v870_v18 = vmul.f32 %v4304_v56, %v5455_v50  ;;  %v876_v21 = vpack.c.bf16 %v868_v33, %v868_v33  ;;  %v890_v19 = vunpack.c.l.b16 %v874_v22  ;;  %v4306_v60 = vpop.eup %4305  ;;  %v7087_v33 = vld [vmem:[#allocation6_spill] sm:$0xff]  ;;  %v7088_v22 = vld [vmem:[#allocation7_spill] sm:$0xff]  ;;  %v7089_v56 = vld [vmem:[#allocation8_spill] sm:$0xff] }
 0x31a   :  { %v877_v29 = vpack.c.bf16 %v869_v62, %v869_v62  ;;  %v891_v54 = vunpack.c.l.b16 %v875_v25  ;;  %v896_v55 = vrot.slane %v888_v30, 1  ;;  %v871_v5 = vmul.f32 %v4306_v60, %v5464_v59  ;;  %v7090_v62 = vld [vmem:[#allocation9_spill] sm:$0xff]  ;;  %v7091_v25 = vld [vmem:[#allocation10_spill] sm:$0xff] }
 0x31b   :  { %v892_v51 = vunpack.c.l.b16 %v876_v21  ;;  %v898_v52 = vrot.slane %v890_v19, 7  ;;  %v878_v57 = vpack.c.bf16 %v870_v18, %v870_v18  ;;  %v699_v30 = vrot.slane %v5422_v7, 7 }
 0x31c   :  { %v897_v20 = vsel %vm441_vm1, %v889_v28, %v896_v55  ;;  %v900_v47 = vrot.slane %v891_v54, 6  ;;  %v893_v63 = vunpack.c.l.b16 %v877_v29  ;;  %v879_v11 = vpack.c.bf16 %v871_v5, %v871_v5  ;;  %v7092_v29 = vld [vmem:[#allocation22_spill] sm:$0xff]  ;;  %v7093_v55 = vld [vmem:[#allocation15_spill] sm:$0xff] }
 0x31d   :  { %v899_v58 = vsel %vm444_vm2, %v898_v52, %v897_v20  ;;  %v902_v49 = vrot.slane %v892_v51, 5  ;;  %v894_v2 = vunpack.c.l.b16 %v878_v57  ;;  %v701_v18 = vrot.slane %v5422_v7, 1  ;;  %v7094_v20 = vld [vmem:[#allocation16_spill] sm:$0xff] }
 0x31e   :  { %v901_v45 = vsel %vm447_vm3, %v900_v47, %v899_v58  ;;  %v904_v9 = vrot.slane %v893_v63, 4  ;;  %v895_v15 = vunpack.c.l.b16 %v879_v11  ;;  %v703_v21 = vrot.slane %v5422_v7, 2  ;;  %v7095_v58 = vld [vmem:[#allocation17_spill] sm:$0xff] }
 0x31f   :  { %v903_v3 = vsel %vm450_vm4, %v902_v49, %v901_v45  ;;  %v906_v13 = vrot.slane %v894_v2, 3  ;;  %v705_v19 = vrot.slane %v5422_v7, 3  ;;  %v729_v28 = vadd.f32 %v699_v30, %v7092_v29  ;;  %v7096_v45 = vld [vmem:[#allocation18_spill] sm:$0xff]  ;;  %v7097_v2 = vld [vmem:[#allocation19_spill] sm:$0xff] }
 0x320   :  { %v905_v12 = vsel %vm453_vm5, %v904_v9, %v903_v3  ;;  %v908_v1 = vrot.slane %v895_v15, 2  ;;  %v707_v54 = vrot.slane %v5422_v7, 4  ;;  %v731_v51 = vadd.f32 %v5422_v7, %v7093_v55  ;;  %v7098_v9 = vld [vmem:[#allocation20_spill] sm:$0xff]  ;;  %v7099_v15 = vld [vmem:[#allocation21_spill] sm:$0xff] }
 0x321   :  { %v907_v0 = vsel %vm456_vm6, %v906_v13, %v905_v12  ;;  %v709_v52 = vrot.slane %v5422_v7, 5  ;;  %v733_v57 = vadd.f32 %v701_v18, %v7094_v20  ;;  %v735_v47 = vadd.f32 %v703_v21, %v7095_v58 }
 0x322   :  { %v909_v16 = vsel %vm459_vm7, %v908_v1, %v907_v0  ;;  %v711_v63 = vrot.slane %v5422_v7, 6  ;;  %v737_v49 = vadd.f32 %v705_v19, %v7096_v45  ;;  %v3743_v60 = vmul.f32 -1.442695, %v729_v28 }
 0x323   :  { %v910_v8 = vpack.c.b16 %v909_v16, %v909_v16  ;;  %v739_v3 = vadd.f32 %v707_v54, %v7097_v2  ;;  %v3745_v5 = vmul.f32 -1.442695, %v731_v51  ;;  %v741_v11 = vadd.f32 %v709_v52, %v7098_v9 }
 0x324   :  { %v3747_v12 = vmul.f32 -1.442695, %v733_v57  ;;  %v3749_v13 = vmul.f32 -1.442695, %v735_v47  ;;  %v743_v0 = vadd.f32 %v711_v63, %v7099_v15  ;;  %4307 = vpow2.f32 %v3743_v60 }
 0x325   :  { %4003 = vmatmul.mubr.bf16.vlgmr.msra.gmra.mrb[8].mxu1 %v910_v8  ;;  %v3751_v1 = vmul.f32 -1.442695, %v737_v49  ;;  %4309 = vpow2.f32 %v3745_v5  ;;  %v3753_v16 = vmul.f32 -1.442695, %v739_v3  ;;  %v3755_v8 = vmul.f32 -1.442695, %v741_v11 }
 0x326   :  { %4007 = vmatpush3.bf16.msra.mxu1 %v7083_v24  ;;  %4022 = vmatprep.mubr.msk.bf16.mxu1 %vm4909_vm0, %v7084_v27  ;;  %4311 = vpow2.f32 %v3747_v12  ;;  %v3757_v7 = vmul.f32 -1.442695, %v743_v0 }
 0x327   :  { %4008 = vmatprep.subr.bf16.mxu1 %v7084_v27  ;;  %4313 = vpow2.f32 %v3749_v13 }
 0x328   :  { %4315 = vpow2.f32 %v3751_v1  ;;  %v7100_v1 = vld [vmem:[#allocation23_spill] sm:$0xff] }
 0x329   :  { %4317 = vpow2.f32 %v3753_v16 }
 0x32a   :  { %4009 = vmatpush3.bf16.msra.mxu1 %v7085_v46  ;;  %4319 = vpow2.f32 %v3755_v8 }
 0x32b   :  { %4010 = vmatprep.subr.bf16.mxu1 %v7084_v27  ;;  %4321 = vpow2.f32 %v3757_v7 }
 0x32e   :  { %4011 = vmatpush3.bf16.msra.mxu1 %v7086_v44  ;;  %v4308_v24 = vpop.eup %4307 }
 0x32f   :  { %4012 = vmatprep.subr.bf16.mxu1 %v7084_v27  ;;  %v4310_v46 = vpop.eup %4309 }
 0x330   :  { %v4312_v44 = vpop.eup %4311 }
 0x331   :  { %v797_v30 = vadd.f32 1.0, %v4312_v44 }
 0x332   :  { %4013 = vmatpush3.bf16.msra.mxu1 %v7087_v33  ;;  %v4314_v33 = vpop.eup %4313 }
 0x333   :  { %4014 = vmatprep.subr.bf16.mxu1 %v7084_v27  ;;  %v799_v21 = vadd.f32 1.0, %v4314_v33 }
 0x336   :  { %4015 = vmatpush3.bf16.msra.mxu1 %v7088_v22  ;;  %v793_v22 = vadd.f32 1.0, %v4308_v24 }
 0x337   :  { %4016 = vmatprep.subr.bf16.mxu1 %v7084_v27 }
 0x338   :  { %4323 = vrcp.f32 %v793_v22 }
 0x33a   :  { %4017 = vmatpush3.bf16.msra.mxu1 %v7089_v56  ;;  %v4316_v56 = vpop.eup %4315 }
 0x33b   :  { %4018 = vmatprep.subr.bf16.mxu1 %v7084_v27  ;;  %v801_v19 = vadd.f32 1.0, %v4316_v56 }
 0x33e   :  { %4019 = vmatpush3.bf16.msra.mxu1 %v7090_v62  ;;  %v795_v62 = vadd.f32 1.0, %v4310_v46 }
 0x33f   :  { %4020 = vmatprep.subr.bf16.mxu1 %v7084_v27 }
 0x340   :  { %4325 = vrcp.f32 %v795_v62 }
 0x341   :  { %4327 = vrcp.f32 %v797_v30 }
 0x342   :  { %4021 = vmatpush3.bf16.msra.mxu1 %v7091_v25  ;;  %v4318_v25 = vpop.eup %4317  ;;  %4329 = vrcp.f32 %v799_v21 }
 0x343   :  { %4026 = vmatprep.subr.bf16.mxu1 %v7084_v27  ;;  %v4320_v18 = vpop.eup %4319  ;;  %v803_v54 = vadd.f32 1.0, %v4318_v25  ;;  %4331 = vrcp.f32 %v801_v19 }
 0x344   :  { %v4322_v28 = vpop.eup %4321  ;;  %v805_v51 = vadd.f32 1.0, %v4320_v18 }
 0x345   :  { %v807_v52 = vadd.f32 1.0, %v4322_v28  ;;  %4333 = vrcp.f32 %v803_v54  ;;  %v4324_v46 = vpop.eup %4323 }
 0x346   :  { %4335 = vrcp.f32 %v805_v51  ;;  %v984_v51 = vsub.f32 1.0, %v4324_v46 }
 0x347   :  { %4337 = vrcp.f32 %v807_v52 }
 0x34a   :  { %v4326_v33 = vpop.eup %4325 }
 0x34b   :  { %v4328_v56 = vpop.eup %4327  ;;  %v985_v28 = vsub.f32 1.0, %v4326_v33 }
 0x34c   :  { %v4330_v25 = vpop.eup %4329  ;;  %v986_v52 = vsub.f32 1.0, %v4328_v56 }
 0x34d   :  { %v4332_v18 = vpop.eup %4331 }
 0x34f   :  { %v4334_v21 = vpop.eup %4333 }
 0x350   :  { %v4336_v19 = vpop.eup %4335 }
 0x351   :  { %v4338_v54 = vpop.eup %4337 }
 0x3f8   :  { %v946_v57 = vpop.f32.mrb[8].mxu1 }
 0x3f9   :  { %v953_v47 = vrot.slane %v946_v57, 7  ;;  %v954_v63 = vrot.slane %v946_v57, 1  ;;  %v955_v49 = vrot.slane %v946_v57, 2  ;;  %v956_v60 = vrot.slane %v946_v57, 3  ;;  %v4004_v3 = vpop.f32.mrb[9].mxu1 }
 0x3fa   :  { %v957_v5 = vrot.slane %v946_v57, 4  ;;  %v958_v11 = vrot.slane %v946_v57, 5  ;;  %v969_v12 = vadd.f32 %v5329_v53, %v946_v57  ;;  %v949_v13 = vpop.f32.mrb[10].mxu1  ;;  %v959_v0 = vrot.slane %v946_v57, 6 }
 0x3fb   :  { %v968_v16 = vadd.f32 %v7100_v1, %v953_v47  ;;  %v970_v8 = vadd.f32 %v5331_v31, %v954_v63  ;;  %v971_v7 = vadd.f32 %v5333_v35, %v955_v49  ;;  %v4005_v24 = vpop.f32.mrb[11].mxu1  ;;  %v972_v44 = vadd.f32 %v5335_v61, %v956_v60 }
 0x3fc   :  { %4339 = vtanh.f32 %v969_v12  ;;  %v973_v22 = vadd.f32 %v5337_v34, %v957_v5  ;;  %v974_v62 = vadd.f32 %v5339_v48, %v958_v11  ;;  %v975_v30 = vadd.f32 %v5341_v26, %v959_v0 }
 0x3fd   :  { %4341 = vtanh.f32 %v968_v16  ;;  %v987_v47 = vsub.f32 1.0, %v4330_v25  ;;  %v988_v63 = vsub.f32 1.0, %v4332_v18  ;;  %v989_v60 = vsub.f32 1.0, %v4334_v21 }
 0x3fe   :  { %4343 = vtanh.f32 %v970_v8  ;;  %v993_v3 = vmul.f32 %v985_v28, %v5433_v4  ;;  %v990_v12 = vsub.f32 1.0, %v4336_v19  ;;  %v992_v13 = vmul.f32 %v984_v51, %v5436_v6 }
 0x3ff   :  { %4345 = vtanh.f32 %v971_v7  ;;  %v991_v8 = vsub.f32 1.0, %v4338_v54  ;;  %v994_v7 = vmul.f32 %v986_v52, %v5439_v10 }
 0x400   :  { %4347 = vtanh.f32 %v972_v44 }
 0x401   :  { %4349 = vtanh.f32 %v973_v22 }
 0x402   :  { %4351 = vtanh.f32 %v974_v62  ;;  %v995_v62 = vmul.f32 %v987_v47, %v5443_v14 }
 0x403   :  { %4353 = vtanh.f32 %v975_v30  ;;  %v996_v30 = vmul.f32 %v988_v63, %v5447_v23  ;;  %v999_v63 = vmul.f32 %v991_v8, %v5464_v59 }
 0x406   :  { %v4340_v57 = vpop.eup %4339 }
 0x407   :  { %v4342_v49 = vpop.eup %4341  ;;  %v1001_v5 = vmul.f32 %v4340_v57, %v4326_v33  ;;  %v997_v57 = vmul.f32 %v989_v60, %v5451_v17 }
 0x408   :  { %v4344_v11 = vpop.eup %4343  ;;  %v1000_v0 = vmul.f32 %v4342_v49, %v4324_v46  ;;  %v998_v49 = vmul.f32 %v990_v12, %v5455_v50 }
 0x409   :  { %v4346_v16 = vpop.eup %4345  ;;  %v1002_v24 = vmul.f32 %v4344_v11, %v4328_v56  ;;  %v5516_v44 = vadd.f32 %v1001_v5, %v993_v3 }
 0x40a   :  { %v4348_v22 = vpop.eup %4347  ;;  %v1003_v26 = vmul.f32 %v4346_v16, %v4330_v25  ;;  %v5520_v28 = vadd.f32 %v1000_v0, %v992_v13 }
 0x40b   :  { %v4350_v33 = vpop.eup %4349  ;;  %v1004_v51 = vmul.f32 %v4348_v22, %v4332_v18  ;;  %v5523_v46 = vadd.f32 %v1002_v24, %v994_v7  ;;  %v1017_v52 = vpack.c.bf16 %v5516_v44, %v5516_v44 }
 0x40c   :  { %v4352_v56 = vpop.eup %4351  ;;  %v1005_v3 = vmul.f32 %v4350_v33, %v4334_v21  ;;  %v5528_v5 = vadd.f32 %v1003_v26, %v995_v62  ;;  %v1016_v25 = vpack.c.bf16 %v5520_v28, %v5520_v28 }
 0x40d   :  { %v4354_v47 = vpop.eup %4353  ;;  %v1006_v11 = vmul.f32 %v4352_v56, %v4336_v19  ;;  %v5533_v60 = vadd.f32 %v1004_v51, %v996_v30  ;;  %v1018_v18 = vpack.c.bf16 %v5523_v46, %v5523_v46  ;;  %v1033_v7 = vunpack.c.l.b16 %v1017_v52 }
 0x40e   :  { %v1007_v13 = vmul.f32 %v4354_v47, %v4338_v54  ;;  %v5537_v0 = vadd.f32 %v1005_v3, %v997_v57  ;;  %v1019_v21 = vpack.c.bf16 %v5528_v5, %v5528_v5  ;;  %v1032_v26 = vunpack.c.l.b16 %v1016_v25 }
 0x40f   :  { %v5541_v12 = vadd.f32 %v1006_v11, %v998_v49  ;;  %v1020_v16 = vpack.c.bf16 %v5533_v60, %v5533_v60  ;;  %v1034_v8 = vunpack.c.l.b16 %v1018_v18 }
 0x410   :  { %v5545_v19 = vadd.f32 %v1007_v13, %v999_v63  ;;  %v1021_v24 = vpack.c.bf16 %v5537_v0, %v5537_v0  ;;  %v1035_v22 = vunpack.c.l.b16 %v1019_v21  ;;  %v1040_v54 = vrot.slane %v1032_v26, 1 }
 0x411   :  { %v1022_v62 = vpack.c.bf16 %v5541_v12, %v5541_v12  ;;  %v1036_v30 = vunpack.c.l.b16 %v1020_v16  ;;  %v1042_v33 = vrot.slane %v1034_v8, 7 }
 0x412   :  { %v1023_v57 = vpack.c.bf16 %v5545_v19, %v5545_v19  ;;  %v1037_v51 = vunpack.c.l.b16 %v1021_v24  ;;  %v1041_v56 = vsel %vm441_vm1, %v1033_v7, %v1040_v54  ;;  %v1044_v52 = vrot.slane %v1035_v22, 6  ;;  %v5563_v24 = vld [vmem:[%s6886_s3] ss:$8 sps:$4 sm:$0xff]   ;;  %v5570_v22 = vld [vmem:[%s6886_s3 + $0x14] ss:$8 sps:$4 sm:$0xff]  }
 0x413   :  { %v1038_v49 = vunpack.c.l.b16 %v1022_v62  ;;  %v1043_v3 = vsel %vm444_vm2, %v1042_v33, %v1041_v56  ;;  %v1046_v25 = vrot.slane %v1036_v30, 5  ;;  %v5576_v54 = vld [vmem:[%s6886_s3 + $0x10] ss:$8 sps:$4 sm:$0xff]   ;;  %v5582_v62 = vld [vmem:[%s6886_s3 + $0x24] ss:$8 sps:$4 sm:$0xff]  }
 0x414   :  { %v1039_v47 = vunpack.c.l.b16 %v1023_v57  ;;  %v1045_v63 = vsel %vm447_vm3, %v1044_v52, %v1043_v3  ;;  %v1048_v11 = vrot.slane %v1037_v51, 4  ;;  %v5588_v30 = vld [vmem:[%s6886_s3 + $0x20] ss:$8 sps:$4 sm:$0xff]   ;;  %v5594_v33 = vld [vmem:[%s6886_s3 + $0x34] ss:$8 sps:$4 sm:$0xff]  }
 0x415   :  { %v1047_v18 = vsel %vm450_vm4, %v1046_v25, %v1045_v63  ;;  %v1050_v13 = vrot.slane %v1038_v49, 3  ;;  %v5600_v57 = vld [vmem:[%s6886_s3 + $0x30] ss:$8 sps:$4 sm:$0xff]   ;;  %v5606_v51 = vld [vmem:[%s6886_s3 + $0x44] ss:$8 sps:$4 sm:$0xff]  }
 0x416   :  { %v1049_v21 = vsel %vm453_vm5, %v1048_v11, %v1047_v18  ;;  %v1052_v26 = vrot.slane %v1039_v47, 2  ;;  %v5612_v56 = vld [vmem:[%s6886_s3 + $0x40] ss:$8 sps:$4 sm:$0xff]   ;;  %v5618_v52 = vld [vmem:[%s6886_s3 + $0x54] ss:$8 sps:$4 sm:$0xff]  }
 0x417   :  { %v1051_v16 = vsel %vm456_vm6, %v1050_v13, %v1049_v21  ;;  %7101 = vst [vmem:[#allocation3_spill] sm:$0xff] %v5618_v52  ;;  %v5624_v49 = vld [vmem:[%s6886_s3 + $0x50] ss:$8 sps:$4 sm:$0xff]   ;;  %v5630_v3 = vld [vmem:[%s6886_s3 + $0x64] ss:$8 sps:$4 sm:$0xff]  }
 0x418   :  { %v1053_v8 = vsel %vm459_vm7, %v1052_v26, %v1051_v16  ;;  %7102 = vst [vmem:[#allocation4_spill] sm:$0xff] %v5624_v49  ;;  %7103 = vst [vmem:[#allocation5_spill] sm:$0xff] %v5630_v3  ;;  %v5636_v25 = vld [vmem:[%s6886_s3 + $0x60] ss:$8 sps:$4 sm:$0xff]   ;;  %v5642_v47 = vld [vmem:[%s6886_s3 + $0x74] ss:$8 sps:$4 sm:$0xff]  }
 0x419   :  { %v1054_v7 = vpack.c.b16 %v1053_v8, %v1053_v8  ;;  %7104 = vst [vmem:[#allocation6_spill] sm:$0xff] %v5636_v25  ;;  %7105 = vst [vmem:[#allocation7_spill] sm:$0xff] %v5642_v47  ;;  %v5648_v63 = vld [vmem:[%s6886_s3 + $0x70] ss:$8 sps:$4 sm:$0xff]   ;;  %v5654_v11 = vld [vmem:[%s6886_s3 + $0x4] ss:$8 sps:$4 sm:$0xff]  }
 0x41a   :  { %7106 = vst [vmem:[#allocation8_spill] sm:$0xff] %v5648_v63  ;;  %7107 = vst [vmem:[#allocation9_spill] sm:$0xff] %v5654_v11 }
 0x41b   :  { %1089 = vmatmul.mubr.bf16.vlgmr.msra.gmra.mrb[4].mxu0 %v1054_v7 }
 0x41c   :  { %1458 = vmatpush1.bf16.msra.mxu0 %v5563_v24  ;;  %1489 = vmatprep.mubr.bf16.mxu0 %v7074_v32 }
 0x41d   :  { %1459 = vmatprep.subr.bf16.mxu0 %v5570_v22 }
 0x420   :  { %1460 = vmatpush1.bf16.msra.mxu0 %v5576_v54 }
 0x421   :  { %1461 = vmatprep.subr.bf16.mxu0 %v5582_v62 }
 0x424   :  { %1462 = vmatpush1.bf16.msra.mxu0 %v5588_v30 }
 0x425   :  { %1463 = vmatprep.subr.bf16.mxu0 %v5594_v33 }
 0x428   :  { %1464 = vmatpush1.bf16.msra.mxu0 %v5600_v57 }
 0x429   :  { %1465 = vmatprep.subr.bf16.mxu0 %v5606_v51 }
 0x42c   :  { %1466 = vmatpush1.bf16.msra.mxu0 %v5612_v56 }
 0x42d   :  { %1467 = vmatprep.subr.bf16.mxu0 %v5618_v52 }
 0x430   :  { %1468 = vmatpush1.bf16.msra.mxu0 %v5624_v49 }
 0x431   :  { %1469 = vmatprep.subr.bf16.mxu0 %v5630_v3 }
 0x434   :  { %1470 = vmatpush1.bf16.msra.mxu0 %v5636_v25 }
 0x435   :  { %1471 = vmatprep.subr.bf16.mxu0 %v5642_v47 }
 0x438   :  { %1472 = vmatpush1.bf16.msra.mxu0 %v5648_v63 }
 0x439   :  { %1858 = vmatprep.subr.bf16.mxu0 %v5654_v11 }
 0x4ee   :  { %v1090_v18 = vpop.f32.mrb[4].mxu0 }
 0x4ef   :  { %v1099_v13 = vrot.slane %v1090_v18, 6  ;;  %v1101_v21 = vrot.slane %v1090_v18, 7  ;;  %v1103_v26 = vrot.slane %v1090_v18, 1  ;;  %v1105_v16 = vrot.slane %v1090_v18, 2  ;;  %v5657_v8 = vpop.f32.mrb[5].mxu0 }
 0x4f0   :  { %v1107_v7 = vrot.slane %v1090_v18, 3  ;;  %v1109_v50 = vrot.slane %v1090_v18, 4  ;;  %v1133_v59 = vadd.f32 %v1090_v18, %v5166_v38  ;;  %v1094_v17 = vpop.f32.mrb[6].mxu0  ;;  %v1111_v11 = vrot.slane %v1090_v18, 5 }
 0x4f1   :  { %v1129_v23 = vadd.f32 %v1099_v13, %v5162_v36  ;;  %v1131_v14 = vadd.f32 %v1101_v21, %v5164_v37  ;;  %v1135_v10 = vadd.f32 %v1103_v26, %v5168_v39  ;;  %v1137_v4 = vadd.f32 %v1105_v16, %v5170_v40  ;;  %v1095_v6 = vpop.f32.mrb[7].mxu0 }
 0x4f2   :  { %v1139_v63 = vadd.f32 %v1107_v7, %v5172_v41  ;;  %v1141_v47 = vadd.f32 %v1109_v50, %v5174_v42  ;;  %v3762_v25 = vmul.f32 -1.442695, %v1133_v59  ;;  %v1143_v26 = vadd.f32 %v1111_v11, %v5177_v43 }
 0x4f3   :  { %v3758_v3 = vmul.f32 -1.442695, %v1129_v23  ;;  %v3760_v49 = vmul.f32 -1.442695, %v1131_v14  ;;  %v3764_v52 = vmul.f32 -1.442695, %v1135_v10 }
 0x4f4   :  { %4355 = vpow2.f32 %v3762_v25  ;;  %v3766_v17 = vmul.f32 -1.442695, %v1137_v4  ;;  %v3768_v13 = vmul.f32 -1.442695, %v1139_v63  ;;  %v3770_v21 = vmul.f32 -1.442695, %v1141_v47 }
 0x4f5   :  { %4357 = vpow2.f32 %v3758_v3  ;;  %v3772_v6 = vmul.f32 -1.442695, %v1143_v26  ;;  %v5674_v26 = vrot.slane %v5516_v44, 7 }
 0x4f6   :  { %4359 = vpow2.f32 %v3760_v49 }
 0x4f7   :  { %4361 = vpow2.f32 %v3764_v52  ;;  %7110 = vst [vmem:[#allocation40_spill] sm:$0xff] %v5674_v26 }
 0x4f8   :  { %4363 = vpow2.f32 %v3766_v17  ;;  %v5668_v17 = vrot.slane %v5520_v28, 7  ;;  %v5682_v28 = vrot.slane %v5533_v60, 7 }
 0x4f9   :  { %4365 = vpow2.f32 %v3768_v13  ;;  %v5671_v13 = vrot.slane %v5523_v46, 7 }
 0x4fa   :  { %4367 = vpow2.f32 %v3770_v21  ;;  %7108 = vst [vmem:[#allocation10_spill] sm:$0xff] %v5668_v17  ;;  %7112 = vst [vmem:[#allocation42_spill] sm:$0xff] %v5682_v28 }
 0x4fb   :  { %4369 = vpow2.f32 %v3772_v6  ;;  %7109 = vst [vmem:[#allocation39_spill] sm:$0xff] %v5671_v13 }
 0x4fe   :  { %v4356_v18 = vpop.eup %4355 }
 0x4ff   :  { %v4358_v16 = vpop.eup %4357  ;;  %v1197_v50 = vadd.f32 1.0, %v4356_v18 }
 0x500   :  { %v4360_v23 = vpop.eup %4359  ;;  %v1193_v14 = vadd.f32 1.0, %v4358_v16  ;;  %v5677_v16 = vrot.slane %v5528_v5, 7  ;;  %v5690_v5 = vrot.slane %v5541_v12, 7 }
 0x501   :  { %v4362_v10 = vpop.eup %4361  ;;  %v1195_v59 = vadd.f32 1.0, %v4360_v23  ;;  %4371 = vrcp.f32 %v1197_v50 }
 0x502   :  { %v4364_v4 = vpop.eup %4363  ;;  %v1199_v3 = vadd.f32 1.0, %v4362_v10  ;;  %4373 = vrcp.f32 %v1193_v14  ;;  %7111 = vst [vmem:[#allocation41_spill] sm:$0xff] %v5677_v16  ;;  %7114 = vst [vmem:[#allocation44_spill] sm:$0xff] %v5690_v5 }
 0x503   :  { %v4366_v49 = vpop.eup %4365  ;;  %v1201_v25 = vadd.f32 1.0, %v4364_v4  ;;  %4375 = vrcp.f32 %v1195_v59  ;;  %v5686_v59 = vrot.slane %v5537_v0, 7 }
 0x504   :  { %v4368_v52 = vpop.eup %4367  ;;  %v1203_v47 = vadd.f32 1.0, %v4366_v49  ;;  %4377 = vrcp.f32 %v1199_v3 }
 0x505   :  { %v1205_v63 = vadd.f32 1.0, %v4368_v52  ;;  %4379 = vrcp.f32 %v1201_v25  ;;  %v4370_v11 = vpop.eup %4369  ;;  %7113 = vst [vmem:[#allocation43_spill] sm:$0xff] %v5686_v59 }
 0x506   :  { %4381 = vrcp.f32 %v1203_v47  ;;  %v1207_v6 = vadd.f32 1.0, %v4370_v11 }
 0x507   :  { %4383 = vrcp.f32 %v1205_v63 }
 0x508   :  { %4385 = vrcp.f32 %v1207_v6 }
 0x50b   :  { %v4372_v7 = vpop.eup %4371 }
 0x50c   :  { %v4374_v21 = vpop.eup %4373  ;;  %v1267_v23 = vmul.f32 %v4372_v7, %v5671_v13 }
 0x50d   :  { %v4376_v18 = vpop.eup %4375  ;;  %v1265_v50 = vmul.f32 %v4374_v21, %v5668_v17 }
 0x50e   :  { %v4378_v14 = vpop.eup %4377  ;;  %v1266_v46 = vmul.f32 %v4376_v18, %v5674_v26  ;;  %v1275_v47 = vpack.c.bf16 %v1267_v23, %v1267_v23 }
 0x50f   :  { %v4380_v10 = vpop.eup %4379  ;;  %v1268_v44 = vmul.f32 %v4378_v14, %v5677_v16  ;;  %v1273_v4 = vpack.c.bf16 %v1265_v50, %v1265_v50 }
 0x510   :  { %v4382_v3 = vpop.eup %4381  ;;  %v1269_v49 = vmul.f32 %v4380_v10, %v5682_v28  ;;  %v1274_v25 = vpack.c.bf16 %v1266_v46, %v1266_v46  ;;  %v1291_v42 = vunpack.c.l.b16 %v1275_v47 }
 0x511   :  { %v4384_v52 = vpop.eup %4383  ;;  %v1270_v60 = vmul.f32 %v4382_v3, %v5686_v59  ;;  %v1276_v63 = vpack.c.bf16 %v1268_v44, %v1268_v44  ;;  %v1289_v11 = vunpack.c.l.b16 %v1273_v4  ;;  %v5699_v4 = vrot.slane %v5545_v19, 7  ;;  %v5709_v19 = vld [vmem:[%s6888_s4] sm:$0xff]  }
 0x512   :  { %v1271_v0 = vmul.f32 %v4384_v52, %v5690_v5  ;;  %v1277_v7 = vpack.c.bf16 %v1269_v49, %v1269_v49  ;;  %v1290_v21 = vunpack.c.l.b16 %v1274_v25  ;;  %v4386_v49 = vpop.eup %4385 }
 0x513   :  { %v1278_v18 = vpack.c.bf16 %v1270_v60, %v1270_v60  ;;  %v1292_v50 = vunpack.c.l.b16 %v1276_v63  ;;  %v1297_v14 = vrot.slane %v1289_v11, 2  ;;  %7115 = vst [vmem:[#allocation45_spill] sm:$0xff] %v5699_v4  ;;  %v1272_v60 = vmul.f32 %v4386_v49, %v5699_v4 }
 0x514   :  { %v1293_v43 = vunpack.c.l.b16 %v1277_v7  ;;  %v1298_v12 = vrot.slane %v1290_v21, 1  ;;  %v1279_v6 = vpack.c.bf16 %v1271_v0, %v1271_v0  ;;  %v1106_v49 = vrot.slane %v5657_v8, 2 }
 0x515   :  { %v1301_v46 = vrot.slane %v1292_v50, 7  ;;  %v1294_v41 = vunpack.c.l.b16 %v1278_v18  ;;  %v1280_v63 = vpack.c.bf16 %v1272_v60, %v1272_v60  ;;  %v5725_v50 = vld [vmem:[%s6888_s4 + $0x10] sm:$0xff]  }
 0x516   :  { %v1299_v10 = vsel %vm441_vm1, %v1298_v12, %v1297_v14  ;;  %v1303_v44 = vrot.slane %v1293_v43, 6  ;;  %v1295_v25 = vunpack.c.l.b16 %v1279_v6  ;;  %v5732_v14 = vld [vmem:[%s6888_s4 + $0x18] sm:$0xff]   ;;  %v5739_v12 = vld [vmem:[%s6888_s4 + $0x20] sm:$0xff]   ;;  %v5746_v6 = vld [vmem:[%s6888_s4 + $0x28] sm:$0xff]  }
 0x517   :  { %v1300_v3 = vsel %vm444_vm2, %v1291_v42, %v1299_v10  ;;  %v1305_v47 = vrot.slane %v1294_v41, 5  ;;  %v1296_v7 = vunpack.c.l.b16 %v1280_v63  ;;  %v5718_v41 = vld [vmem:[%s6888_s4 + $0x8] sm:$0xff]   ;;  %v5753_v10 = vld [vmem:[%s6888_s4 + $0x30] sm:$0xff]   ;;  %v1134_v63 = vadd.f32 %v5657_v8, %v7094_v20 }
 0x518   :  { %v1302_v23 = vsel %vm447_vm3, %v1301_v46, %v1300_v3  ;;  %v1307_v0 = vrot.slane %v1295_v25, 4  ;;  %v5760_v46 = vld [vmem:[%s6888_s4 + $0x38] sm:$0xff]   ;;  %v1100_v3 = vrot.slane %v5657_v8, 6 }
 0x519   :  { %v1304_v52 = vsel %vm450_vm4, %v1303_v44, %v1302_v23  ;;  %v1309_v21 = vrot.slane %v1296_v7, 3  ;;  %v1102_v23 = vrot.slane %v5657_v8, 7  ;;  %v1104_v44 = vrot.slane %v5657_v8, 1 }
 0x51a   :  { %v1306_v11 = vsel %vm453_vm5, %v1305_v47, %v1304_v52  ;;  %v1130_v25 = vadd.f32 %v1100_v3, %v7092_v29  ;;  %v1108_v52 = vrot.slane %v5657_v8, 3  ;;  %v1110_v47 = vrot.slane %v5657_v8, 4 }
 0x51b   :  { %v1308_v42 = vsel %vm456_vm6, %v1307_v0, %v1306_v11  ;;  %v1132_v60 = vadd.f32 %v1102_v23, %v7093_v55  ;;  %v1136_v11 = vadd.f32 %v1104_v44, %v7095_v58  ;;  %v1112_v0 = vrot.slane %v5657_v8, 5 }
 0x51c   :  { %v1310_v43 = vsel %vm459_vm7, %v1309_v21, %v1308_v42  ;;  %v1138_v7 = vadd.f32 %v1106_v49, %v7096_v45  ;;  %v3759_v42 = vmul.f32 -1.442695, %v1130_v25  ;;  %v1140_v21 = vadd.f32 %v1108_v52, %v7097_v2 }
 0x51d   :  { %v1311_v18 = vpack.c.b16 %v1310_v43, %v1310_v43  ;;  %v3761_v43 = vmul.f32 -1.442695, %v1132_v60  ;;  %v3763_v3 = vmul.f32 -1.442695, %v1134_v63  ;;  %v3765_v29 = vmul.f32 -1.442695, %v1136_v11 }
 0x51e   :  { %v1144_v23 = vadd.f32 %v1112_v0, %v7099_v15  ;;  %4387 = vpow2.f32 %v3759_v42  ;;  %v3767_v55 = vmul.f32 -1.442695, %v1138_v7  ;;  %v3769_v20 = vmul.f32 -1.442695, %v1140_v21 }
 0x51f   :  { %4023 = vmatmul.mubr.bf16.vlgmr.msra.gmra.mrb[12].mxu1 %v1311_v18  ;;  %v1142_v18 = vadd.f32 %v1110_v47, %v7098_v9  ;;  %4389 = vpow2.f32 %v3761_v43 }
 0x520   :  { %4027 = vmatpush3.bf16.msra.mxu1 %v5709_v19  ;;  %4042 = vmatprep.mubr.msk.bf16.mxu1 %vm4909_vm0, %v7084_v27  ;;  %4391 = vpow2.f32 %v3763_v3  ;;  %v3773_v8 = vmul.f32 -1.442695, %v1144_v23 }
 0x521   :  { %4028 = vmatprep.subr.bf16.mxu1 %v7084_v27  ;;  %v3771_v44 = vmul.f32 -1.442695, %v1142_v18  ;;  %4393 = vpow2.f32 %v3765_v29 }
 0x522   :  { %4395 = vpow2.f32 %v3767_v55 }
 0x523   :  { %4397 = vpow2.f32 %v3769_v20 }
 0x524   :  { %4029 = vmatpush3.bf16.msra.mxu1 %v5718_v41  ;;  %4399 = vpow2.f32 %v3771_v44 }
 0x525   :  { %4030 = vmatprep.subr.bf16.mxu1 %v7084_v27  ;;  %4401 = vpow2.f32 %v3773_v8 }
 0x528   :  { %4031 = vmatpush3.bf16.msra.mxu1 %v5725_v50  ;;  %v4388_v49 = vpop.eup %4387 }
 0x529   :  { %4032 = vmatprep.subr.bf16.mxu1 %v7084_v27  ;;  %v4390_v25 = vpop.eup %4389  ;;  %v1194_v47 = vadd.f32 1.0, %v4388_v49 }
 0x52a   :  { %v4392_v52 = vpop.eup %4391  ;;  %v1196_v11 = vadd.f32 1.0, %v4390_v25 }
 0x52b   :  { %v4394_v60 = vpop.eup %4393  ;;  %v1198_v42 = vadd.f32 1.0, %v4392_v52  ;;  %4403 = vrcp.f32 %v1194_v47 }
 0x52c   :  { %4033 = vmatpush3.bf16.msra.mxu1 %v5732_v14  ;;  %v4396_v63 = vpop.eup %4395  ;;  %v1200_v43 = vadd.f32 1.0, %v4394_v60  ;;  %4405 = vrcp.f32 %v1196_v11 }
 0x52d   :  { %4034 = vmatprep.subr.bf16.mxu1 %v7084_v27  ;;  %v4398_v0 = vpop.eup %4397  ;;  %v1202_v21 = vadd.f32 1.0, %v4396_v63  ;;  %4407 = vrcp.f32 %v1198_v42 }
 0x52e   :  { %v4400_v7 = vpop.eup %4399  ;;  %v1204_v29 = vadd.f32 1.0, %v4398_v0  ;;  %4409 = vrcp.f32 %v1200_v43 }
 0x52f   :  { %v4402_v18 = vpop.eup %4401  ;;  %v1206_v55 = vadd.f32 1.0, %v4400_v7  ;;  %4411 = vrcp.f32 %v1202_v21 }
 0x530   :  { %4035 = vmatpush3.bf16.msra.mxu1 %v5739_v12  ;;  %v1208_v20 = vadd.f32 1.0, %v4402_v18  ;;  %4413 = vrcp.f32 %v1204_v29 }
 0x531   :  { %4036 = vmatprep.subr.bf16.mxu1 %v7084_v27  ;;  %4415 = vrcp.f32 %v1206_v55 }
 0x532   :  { %4417 = vrcp.f32 %v1208_v20 }
 0x534   :  { %4037 = vmatpush3.bf16.msra.mxu1 %v5746_v6 }
 0x535   :  { %4038 = vmatprep.subr.bf16.mxu1 %v7084_v27  ;;  %v4404_v21 = vpop.eup %4403 }
 0x536   :  { %v4406_v29 = vpop.eup %4405 }
 0x537   :  { %v4408_v20 = vpop.eup %4407 }
 0x538   :  { %4039 = vmatpush3.bf16.msra.mxu1 %v5753_v10 }
 0x539   :  { %4040 = vmatprep.subr.bf16.mxu1 %v7084_v27 }
 0x53c   :  { %4041 = vmatpush3.bf16.msra.mxu1 %v5760_v46 }
 0x53d   :  { %4046 = vmatprep.subr.bf16.mxu1 %v7084_v27 }
 0x5f2   :  { %v1347_v3 = vpop.f32.mrb[12].mxu1 }
 0x5f3   :  { %v1354_v23 = vrot.slane %v1347_v3, 6  ;;  %v1355_v44 = vrot.slane %v1347_v3, 7  ;;  %v1356_v8 = vrot.slane %v1347_v3, 1  ;;  %v1357_v49 = vrot.slane %v1347_v3, 2  ;;  %v4024_v25 = vpop.f32.mrb[13].mxu1 }
 0x5f4   :  { %v1358_v52 = vrot.slane %v1347_v3, 3  ;;  %v1359_v60 = vrot.slane %v1347_v3, 4  ;;  %v1371_v47 = vadd.f32 %v5331_v31, %v1347_v3  ;;  %v1350_v63 = vpop.f32.mrb[14].mxu1  ;;  %v1360_v11 = vrot.slane %v1347_v3, 5  ;;  %v4410_v3 = vpop.eup %4409 }
 0x5f5   :  { %v1369_v0 = vadd.f32 %v7100_v1, %v1354_v23  ;;  %v1370_v42 = vadd.f32 %v5329_v53, %v1355_v44  ;;  %v1372_v7 = vadd.f32 %v5333_v35, %v1356_v8  ;;  %v4025_v43 = vpop.f32.mrb[15].mxu1  ;;  %v1373_v18 = vadd.f32 %v5335_v61, %v1357_v49  ;;  %v7116_v63 = vld [vmem:[#allocation30_spill] sm:$0xff]  ;;  %v4412_v44 = vpop.eup %4411 }
 0x5f6   :  { %4419 = vtanh.f32 %v1371_v47  ;;  %v1374_v55 = vadd.f32 %v5337_v34, %v1358_v52  ;;  %v1375_v25 = vadd.f32 %v5339_v48, %v1359_v60  ;;  %v1376_v23 = vadd.f32 %v7116_v63, %v1360_v11  ;;  %v4414_v8 = vpop.eup %4413 }
 0x5f7   :  { %4421 = vtanh.f32 %v1369_v0  ;;  %v4416_v43 = vpop.eup %4415  ;;  %v1387_v49 = vsub.f32 1.0, %v4408_v20  ;;  %v1385_v61 = vsub.f32 1.0, %v4404_v21  ;;  %v1386_v52 = vsub.f32 1.0, %v4406_v29 }
 0x5f8   :  { %4423 = vtanh.f32 %v1370_v42  ;;  %v4418_v47 = vpop.eup %4417  ;;  %v1388_v34 = vsub.f32 1.0, %v4410_v3  ;;  %v1389_v31 = vsub.f32 1.0, %v4412_v44  ;;  %v1390_v42 = vsub.f32 1.0, %v4414_v8 }
 0x5f9   :  { %4425 = vtanh.f32 %v1372_v7  ;;  %v1391_v48 = vsub.f32 1.0, %v4416_v43  ;;  %v1395_v11 = vmul.f32 %v1387_v49, %v5671_v13 }
 0x5fa   :  { %4427 = vtanh.f32 %v1373_v18  ;;  %v1392_v18 = vsub.f32 1.0, %v4418_v47  ;;  %v1396_v9 = vmul.f32 %v1388_v34, %v5677_v16  ;;  %v1397_v2 = vmul.f32 %v1389_v31, %v5682_v28 }
 0x5fb   :  { %4429 = vtanh.f32 %v1374_v55  ;;  %v1393_v55 = vmul.f32 %v1385_v61, %v5668_v17  ;;  %v1398_v49 = vmul.f32 %v1390_v42, %v5686_v59  ;;  %v1399_v61 = vmul.f32 %v1391_v48, %v5690_v5 }
 0x5fc   :  { %4431 = vtanh.f32 %v1375_v25 }
 0x5fd   :  { %4433 = vtanh.f32 %v1376_v23  ;;  %v1394_v23 = vmul.f32 %v1386_v52, %v5674_v26 }
 0x600   :  { %v4420_v0 = vpop.eup %4419 }
 0x601   :  { %v4422_v60 = vpop.eup %4421  ;;  %v1403_v7 = vmul.f32 %v4420_v0, %v4408_v20 }
 0x602   :  { %v4424_v63 = vpop.eup %4423  ;;  %v1401_v53 = vmul.f32 %v4422_v60, %v4404_v21 }
 0x603   :  { %v4426_v25 = vpop.eup %4425  ;;  %v1402_v1 = vmul.f32 %v4424_v63, %v4406_v29  ;;  %v5791_v35 = vadd.f32 %v1403_v7, %v1395_v11  ;;  %v1400_v29 = vmul.f32 %v1392_v18, %v5699_v4 }
 0x604   :  { %v4428_v15 = vpop.eup %4427  ;;  %v1404_v45 = vmul.f32 %v4426_v25, %v4410_v3  ;;  %v5795_v58 = vadd.f32 %v1401_v53, %v1393_v55 }
 0x605   :  { %v4430_v20 = vpop.eup %4429  ;;  %v1405_v21 = vmul.f32 %v4428_v15, %v4412_v44  ;;  %v5799_v0 = vadd.f32 %v1402_v1, %v1394_v23  ;;  %v1419_v48 = vpack.c.bf16 %v5791_v35, %v5791_v35 }
 0x606   :  { %v4432_v52 = vpop.eup %4431  ;;  %v1406_v63 = vmul.f32 %v4430_v20, %v4414_v8  ;;  %v5802_v60 = vadd.f32 %v1404_v45, %v1396_v9  ;;  %v1417_v31 = vpack.c.bf16 %v5795_v58, %v5795_v58 }
 0x607   :  { %v4434_v34 = vpop.eup %4433  ;;  %v1407_v53 = vmul.f32 %v4432_v52, %v4416_v43  ;;  %v5806_v3 = vadd.f32 %v1405_v21, %v1397_v2  ;;  %v1418_v42 = vpack.c.bf16 %v5799_v0, %v5799_v0  ;;  %v1435_v20 = vunpack.c.l.b16 %v1419_v48 }
 0x608   :  { %v1408_v15 = vmul.f32 %v4434_v34, %v4418_v47  ;;  %v5812_v1 = vadd.f32 %v1406_v63, %v1398_v49  ;;  %v1420_v45 = vpack.c.bf16 %v5802_v60, %v5802_v60  ;;  %v1433_v9 = vunpack.c.l.b16 %v1417_v31 }
 0x609   :  { %v5816_v44 = vadd.f32 %v1407_v53, %v1399_v61  ;;  %v1421_v8 = vpack.c.bf16 %v5806_v3, %v5806_v3  ;;  %v1434_v2 = vunpack.c.l.b16 %v1418_v42 }
 0x60a   :  { %v5820_v43 = vadd.f32 %v1408_v15, %v1400_v29  ;;  %v1422_v11 = vpack.c.bf16 %v5812_v1, %v5812_v1  ;;  %v1436_v7 = vunpack.c.l.b16 %v1420_v45  ;;  %v1441_v18 = vrot.slane %v1433_v9, 2 }
 0x60b   :  { %v1423_v47 = vpack.c.bf16 %v5816_v44, %v5816_v44  ;;  %v1437_v55 = vunpack.c.l.b16 %v1421_v8  ;;  %v1442_v25 = vrot.slane %v1434_v2, 1 }
 0x60c   :  { %v1424_v23 = vpack.c.bf16 %v5820_v43, %v5820_v43  ;;  %v1438_v49 = vunpack.c.l.b16 %v1422_v11  ;;  %v1445_v52 = vrot.slane %v1436_v7, 7  ;;  %v7117_v11 = vld [vmem:[#allocation3_spill] sm:$0xff]  ;;  %v7119_v7 = vld [vmem:[#allocation5_spill] sm:$0xff] }
 0x60d   :  { %v1439_v61 = vunpack.c.l.b16 %v1423_v47  ;;  %v1443_v21 = vsel %vm441_vm1, %v1442_v25, %v1441_v18  ;;  %v1447_v31 = vrot.slane %v1437_v55, 6 }
 0x60e   :  { %v1440_v29 = vunpack.c.l.b16 %v1424_v23  ;;  %v1444_v63 = vsel %vm444_vm2, %v1435_v20, %v1443_v21  ;;  %v1449_v53 = vrot.slane %v1438_v49, 5 }
 0x60f   :  { %v1446_v34 = vsel %vm447_vm3, %v1445_v52, %v1444_v63  ;;  %v1451_v15 = vrot.slane %v1439_v61, 4 }
 0x610   :  { %v1448_v42 = vsel %vm450_vm4, %v1447_v31, %v1446_v34  ;;  %v1453_v9 = vrot.slane %v1440_v29, 3  ;;  %v7124_v31 = vld [vmem:[#allocation12_spill] sm:$0xff] }
 0x611   :  { %v1450_v45 = vsel %vm453_vm5, %v1449_v53, %v1448_v42  ;;  %v7125_v53 = vld [vmem:[#allocation13_spill] sm:$0xff] }
 0x612   :  { %v1452_v48 = vsel %vm456_vm6, %v1451_v15, %v1450_v45 }
 0x613   :  { %v1454_v8 = vsel %vm459_vm7, %v1453_v9, %v1452_v48 }
 0x614   :  { %v1455_v2 = vpack.c.b16 %v1454_v8, %v1454_v8 }
 0x616   :  { %1490 = vmatmul.mubr.bf16.vlgmr.msra.gmra.mrb[8].mxu0 %v1455_v2 }
 0x617   :  { %1859 = vmatpush1.bf16.msra.mxu0 %v5563_v24  ;;  %1890 = vmatprep.mubr.bf16.mxu0 %v7074_v32  ;;  %v7118_v24 = vld [vmem:[#allocation4_spill] sm:$0xff] }
 0x618   :  { %1860 = vmatprep.subr.bf16.mxu0 %v5570_v22  ;;  %v7120_v22 = vld [vmem:[#allocation6_spill] sm:$0xff] }
 0x61b   :  { %1861 = vmatpush1.bf16.msra.mxu0 %v5576_v54  ;;  %v7121_v54 = vld [vmem:[#allocation7_spill] sm:$0xff] }
 0x61c   :  { %1862 = vmatprep.subr.bf16.mxu0 %v5582_v62  ;;  %v7122_v62 = vld [vmem:[#allocation8_spill] sm:$0xff] }
 0x61f   :  { %1863 = vmatpush1.bf16.msra.mxu0 %v5588_v30  ;;  %v7123_v30 = vld [vmem:[#allocation9_spill] sm:$0xff] }
 0x620   :  { %1864 = vmatprep.subr.bf16.mxu0 %v5594_v33 }
 0x623   :  { %1865 = vmatpush1.bf16.msra.mxu0 %v5600_v57 }
 0x624   :  { %1866 = vmatprep.subr.bf16.mxu0 %v5606_v51 }
 0x627   :  { %1867 = vmatpush1.bf16.msra.mxu0 %v5612_v56 }
 0x628   :  { %1868 = vmatprep.subr.bf16.mxu0 %v7117_v11 }
 0x62b   :  { %1869 = vmatpush1.bf16.msra.mxu0 %v7118_v24  ;;  %v7126_v24 = vld [vmem:[#allocation14_spill] sm:$0xff] }
 0x62c   :  { %1870 = vmatprep.subr.bf16.mxu0 %v7119_v7 }
 0x62f   :  { %1871 = vmatpush1.bf16.msra.mxu0 %v7120_v22 }
 0x630   :  { %1872 = vmatprep.subr.bf16.mxu0 %v7121_v54 }
 0x633   :  { %1873 = vmatpush1.bf16.msra.mxu0 %v7122_v62 }
 0x634   :  { %2259 = vmatprep.subr.bf16.mxu0 %v7123_v30 }
 0x6e9   :  { %v1491_v33 = vpop.f32.mrb[8].mxu0 }
 0x6ea   :  { %v1500_v57 = vrot.slane %v1491_v33, 5  ;;  %v1502_v18 = vrot.slane %v1491_v33, 6  ;;  %v1504_v51 = vrot.slane %v1491_v33, 7  ;;  %v1506_v47 = vrot.slane %v1491_v33, 1  ;;  %v5852_v56 = vpop.f32.mrb[9].mxu0 }
 0x6eb   :  { %v1508_v55 = vrot.slane %v1491_v33, 2  ;;  %v1510_v25 = vrot.slane %v1491_v33, 3  ;;  %v1536_v23 = vadd.f32 %v1491_v33, %v5168_v39  ;;  %v1495_v20 = vpop.f32.mrb[10].mxu0  ;;  %v1512_v63 = vrot.slane %v1491_v33, 4 }
 0x6ec   :  { %v1530_v49 = vadd.f32 %v1500_v57, %v5162_v36  ;;  %v1532_v61 = vadd.f32 %v1502_v18, %v5164_v37  ;;  %v1534_v21 = vadd.f32 %v1504_v51, %v5166_v38  ;;  %v1538_v52 = vadd.f32 %v1506_v47, %v5170_v40  ;;  %v1496_v29 = vpop.f32.mrb[11].mxu0 }
 0x6ed   :  { %v1540_v34 = vadd.f32 %v1508_v55, %v7124_v31  ;;  %v1542_v42 = vadd.f32 %v1510_v25, %v7125_v53  ;;  %v3780_v15 = vmul.f32 -1.442695, %v1536_v23  ;;  %v1544_v7 = vadd.f32 %v1512_v63, %v7126_v24 }
 0x6ee   :  { %v3774_v45 = vmul.f32 -1.442695, %v1530_v49  ;;  %v3776_v9 = vmul.f32 -1.442695, %v1532_v61  ;;  %v3778_v48 = vmul.f32 -1.442695, %v1534_v21 }
 0x6ef   :  { %4435 = vpow2.f32 %v3780_v15  ;;  %v3782_v8 = vmul.f32 -1.442695, %v1538_v52  ;;  %v3784_v2 = vmul.f32 -1.442695, %v1540_v34  ;;  %v3786_v11 = vmul.f32 -1.442695, %v1542_v42 }
 0x6f0   :  { %4437 = vpow2.f32 %v3774_v45  ;;  %v3788_v22 = vmul.f32 -1.442695, %v1544_v7  ;;  %v5863_v29 = vrot.slane %v5795_v58, 7  ;;  %v5866_v34 = vrot.slane %v5799_v0, 7 }
 0x6f1   :  { %4439 = vpow2.f32 %v3776_v9  ;;  %v5869_v42 = vrot.slane %v5802_v60, 7  ;;  %v5872_v9 = vrot.slane %v5791_v35, 7  ;;  %v5881_v7 = vrot.slane %v5812_v1, 7 }
 0x6f2   :  { %4441 = vpow2.f32 %v3778_v48  ;;  %7127 = vst [vmem:[#allocation3_spill] sm:$0xff] %v5863_v29  ;;  %7128 = vst [vmem:[#allocation4_spill] sm:$0xff] %v5866_v34  ;;  %v5885_v35 = vrot.slane %v5816_v44, 7 }
 0x6f3   :  { %4443 = vpow2.f32 %v3782_v8  ;;  %7129 = vst [vmem:[#allocation5_spill] sm:$0xff] %v5869_v42  ;;  %7130 = vst [vmem:[#allocation6_spill] sm:$0xff] %v5872_v9 }
 0x6f4   :  { %4445 = vpow2.f32 %v3784_v2  ;;  %v5876_v2 = vrot.slane %v5806_v3, 7  ;;  %7132 = vst [vmem:[#allocation8_spill] sm:$0xff] %v5881_v7  ;;  %7133 = vst [vmem:[#allocation9_spill] sm:$0xff] %v5885_v35 }
 0x6f5   :  { %4447 = vpow2.f32 %v3786_v11 }
 0x6f6   :  { %4449 = vpow2.f32 %v3788_v22  ;;  %7131 = vst [vmem:[#allocation7_spill] sm:$0xff] %v5876_v2 }
 0x6f9   :  { %v4436_v54 = vpop.eup %4435 }
 0x6fa   :  { %v4438_v62 = vpop.eup %4437  ;;  %v1600_v30 = vadd.f32 1.0, %v4436_v54 }
 0x6fb   :  { %v4440_v33 = vpop.eup %4439  ;;  %v1594_v57 = vadd.f32 1.0, %v4438_v62 }
 0x6fc   :  { %v4442_v18 = vpop.eup %4441  ;;  %v1596_v51 = vadd.f32 1.0, %v4440_v33  ;;  %4451 = vrcp.f32 %v1600_v30 }
 0x6fd   :  { %v4444_v47 = vpop.eup %4443  ;;  %v1598_v55 = vadd.f32 1.0, %v4442_v18  ;;  %4453 = vrcp.f32 %v1594_v57 }
 0x6fe   :  { %v4446_v25 = vpop.eup %4445  ;;  %v1602_v23 = vadd.f32 1.0, %v4444_v47  ;;  %4455 = vrcp.f32 %v1596_v51 }
 0x6ff   :  { %v4448_v20 = vpop.eup %4447  ;;  %v1604_v49 = vadd.f32 1.0, %v4446_v25  ;;  %4457 = vrcp.f32 %v1598_v55 }
 0x700   :  { %v1606_v61 = vadd.f32 1.0, %v4448_v20  ;;  %4459 = vrcp.f32 %v1602_v23  ;;  %v4450_v21 = vpop.eup %4449 }
 0x701   :  { %4461 = vrcp.f32 %v1604_v49  ;;  %v1608_v15 = vadd.f32 1.0, %v4450_v21 }
 0x702   :  { %4463 = vrcp.f32 %v1606_v61 }
 0x703   :  { %4465 = vrcp.f32 %v1608_v15 }
 0x706   :  { %v4452_v52 = vpop.eup %4451 }
 0x707   :  { %v4454_v63 = vpop.eup %4453  ;;  %v1669_v11 = vmul.f32 %v4452_v52, %v5869_v42 }
 0x708   :  { %v4456_v45 = vpop.eup %4455  ;;  %v1666_v48 = vmul.f32 %v4454_v63, %v5863_v29 }
 0x709   :  { %v4458_v8 = vpop.eup %4457  ;;  %v1667_v58 = vmul.f32 %v4456_v45, %v5866_v34  ;;  %v1677_v1 = vpack.c.bf16 %v1669_v11, %v1669_v11 }
 0x70a   :  { %v4460_v0 = vpop.eup %4459  ;;  %v1668_v60 = vmul.f32 %v4458_v8, %v5872_v9  ;;  %v1674_v22 = vpack.c.bf16 %v1666_v48, %v1666_v48 }
 0x70b   :  { %v4462_v54 = vpop.eup %4461  ;;  %v1670_v62 = vmul.f32 %v4460_v0, %v5876_v2  ;;  %v1675_v3 = vpack.c.bf16 %v1667_v58, %v1667_v58  ;;  %v1693_v52 = vunpack.c.l.b16 %v1677_v1  ;;  %v5894_v58 = vrot.slane %v5820_v43, 7 }
 0x70c   :  { %v4464_v30 = vpop.eup %4463  ;;  %v1671_v33 = vmul.f32 %v4462_v54, %v5881_v7  ;;  %v1676_v57 = vpack.c.bf16 %v1668_v60, %v1668_v60  ;;  %v1690_v18 = vunpack.c.l.b16 %v1674_v22  ;;  %v1509_v43 = vrot.slane %v5852_v56, 2 }
 0x70d   :  { %v1672_v51 = vmul.f32 %v4464_v30, %v5885_v35  ;;  %v1678_v47 = vpack.c.bf16 %v1670_v62, %v1670_v62  ;;  %v1691_v55 = vunpack.c.l.b16 %v1675_v3  ;;  %7134 = vst [vmem:[#allocation12_spill] sm:$0xff] %v5894_v58  ;;  %v4466_v11 = vpop.eup %4465 }
 0x70e   :  { %v1679_v25 = vpack.c.bf16 %v1671_v33, %v1671_v33  ;;  %v1692_v23 = vunpack.c.l.b16 %v1676_v57  ;;  %v1698_v20 = vrot.slane %v1690_v18, 3  ;;  %v1673_v22 = vmul.f32 %v4466_v11, %v5894_v58 }
 0x70f   :  { %v1694_v49 = vunpack.c.l.b16 %v1678_v47  ;;  %v1699_v44 = vrot.slane %v1691_v55, 2  ;;  %v1680_v21 = vpack.c.bf16 %v1672_v51, %v1672_v51  ;;  %v7136_v47 = vld [vmem:[#allocation15_spill] sm:$0xff]  ;;  %v1511_v55 = vrot.slane %v5852_v56, 3 }
 0x710   :  { %v1701_v61 = vrot.slane %v1692_v23, 1  ;;  %v1695_v15 = vunpack.c.l.b16 %v1679_v25  ;;  %v1681_v62 = vpack.c.bf16 %v1673_v22, %v1673_v22  ;;  %v7137_v25 = vld [vmem:[#allocation16_spill] sm:$0xff]  ;;  %v7138_v23 = vld [vmem:[#allocation17_spill] sm:$0xff] }
 0x711   :  { %v1700_v63 = vsel %vm441_vm1, %v1699_v44, %v1698_v20  ;;  %v1704_v8 = vrot.slane %v1694_v49, 7  ;;  %v1696_v0 = vunpack.c.l.b16 %v1680_v21  ;;  %v1537_v20 = vadd.f32 %v5852_v56, %v7138_v23  ;;  %v7139_v44 = vld [vmem:[#allocation18_spill] sm:$0xff] }
 0x712   :  { %v1702_v45 = vsel %vm444_vm2, %v1701_v61, %v1700_v63  ;;  %v1706_v54 = vrot.slane %v1695_v15, 6  ;;  %v1697_v33 = vunpack.c.l.b16 %v1681_v62  ;;  %v1513_v49 = vrot.slane %v5852_v56, 4 }
 0x713   :  { %v1703_v48 = vsel %vm447_vm3, %v1693_v52, %v1702_v45  ;;  %v1708_v30 = vrot.slane %v1696_v0, 5  ;;  %v7140_v52 = vld [vmem:[#allocation19_spill] sm:$0xff]  ;;  %v7141_v45 = vld [vmem:[#allocation20_spill] sm:$0xff]  ;;  %v3781_v11 = vmul.f32 -1.442695, %v1537_v20  ;;  %v7142_v0 = vld [vmem:[#allocation21_spill] sm:$0xff] }
 0x714   :  { %v1705_v60 = vsel %vm450_vm4, %v1704_v8, %v1703_v48  ;;  %v1710_v18 = vrot.slane %v1697_v33, 4  ;;  %v1541_v63 = vadd.f32 %v1509_v43, %v7140_v52  ;;  %v1543_v48 = vadd.f32 %v1511_v55, %v7141_v45 }
 0x715   :  { %v1707_v3 = vsel %vm453_vm5, %v1706_v54, %v1705_v60  ;;  %v1545_v60 = vadd.f32 %v1513_v49, %v7142_v0 }
 0x716   :  { %v1709_v57 = vsel %vm456_vm6, %v1708_v30, %v1707_v3  ;;  %v3785_v54 = vmul.f32 -1.442695, %v1541_v63  ;;  %v3787_v62 = vmul.f32 -1.442695, %v1543_v48 }
 0x717   :  { %v1711_v51 = vsel %vm459_vm7, %v1710_v18, %v1709_v57 }
 0x718   :  { %v1712_v1 = vpack.c.b16 %v1711_v51, %v1711_v51 }
 0x71a   :  { %4043 = vmatmul.mubr.bf16.vlgmr.msra.gmra.mrb[16].mxu1 %v1712_v1 }
 0x71b   :  { %4047 = vmatpush3.bf16.msra.mxu1 %v5709_v19  ;;  %4062 = vmatprep.mubr.msk.bf16.mxu1 %vm4909_vm0, %v7084_v27  ;;  %v1501_v19 = vrot.slane %v5852_v56, 5 }
 0x71c   :  { %4048 = vmatprep.subr.bf16.mxu1 %v7084_v27 }
 0x71f   :  { %4049 = vmatpush3.bf16.msra.mxu1 %v5718_v41  ;;  %v1503_v41 = vrot.slane %v5852_v56, 6 }
 0x720   :  { %4050 = vmatprep.subr.bf16.mxu1 %v7084_v27 }
 0x723   :  { %4051 = vmatpush3.bf16.msra.mxu1 %v5725_v50  ;;  %v1505_v50 = vrot.slane %v5852_v56, 7 }
 0x724   :  { %4052 = vmatprep.subr.bf16.mxu1 %v7084_v27 }
 0x727   :  { %4053 = vmatpush3.bf16.msra.mxu1 %v5732_v14  ;;  %v1507_v14 = vrot.slane %v5852_v56, 1  ;;  %v3789_v56 = vmul.f32 -1.442695, %v1545_v60 }
 0x728   :  { %4054 = vmatprep.subr.bf16.mxu1 %v7084_v27 }
 0x729   :  { %v1539_v61 = vadd.f32 %v1507_v14, %v7139_v44 }
 0x72b   :  { %4055 = vmatpush3.bf16.msra.mxu1 %v5739_v12  ;;  %v7135_v12 = vld [vmem:[#allocation22_spill] sm:$0xff]  ;;  %v3783_v22 = vmul.f32 -1.442695, %v1539_v61 }
 0x72c   :  { %4056 = vmatprep.subr.bf16.mxu1 %v7084_v27 }
 0x72f   :  { %4057 = vmatpush3.bf16.msra.mxu1 %v5746_v6  ;;  %v1531_v6 = vadd.f32 %v1501_v19, %v7135_v12 }
 0x730   :  { %4058 = vmatprep.subr.bf16.mxu1 %v7084_v27 }
 0x731   :  { %v3775_v21 = vmul.f32 -1.442695, %v1531_v6 }
 0x733   :  { %4059 = vmatpush3.bf16.msra.mxu1 %v5753_v10  ;;  %v1533_v10 = vadd.f32 %v1503_v41, %v7136_v47  ;;  %4467 = vpow2.f32 %v3775_v21 }
 0x734   :  { %4060 = vmatprep.subr.bf16.mxu1 %v7084_v27 }
 0x735   :  { %v3777_v15 = vmul.f32 -1.442695, %v1533_v10 }
 0x737   :  { %4061 = vmatpush3.bf16.msra.mxu1 %v5760_v46  ;;  %v1535_v46 = vadd.f32 %v1505_v50, %v7137_v25  ;;  %4469 = vpow2.f32 %v3777_v15 }
 0x738   :  { %4066 = vmatprep.subr.bf16.mxu1 %v7084_v27 }
 0x739   :  { %v3779_v8 = vmul.f32 -1.442695, %v1535_v46 }
 0x73b   :  { %4471 = vpow2.f32 %v3779_v8 }
 0x73c   :  { %4473 = vpow2.f32 %v3781_v11  ;;  %v7143_v11 = vld [vmem:[#allocation26_spill] sm:$0xff] }
 0x73d   :  { %4475 = vpow2.f32 %v3783_v22  ;;  %v4468_v3 = vpop.eup %4467 }
 0x73e   :  { %4477 = vpow2.f32 %v3785_v54  ;;  %v1595_v18 = vadd.f32 1.0, %v4468_v3  ;;  %v7145_v3 = vld [vmem:[#allocation24_spill] sm:$0xff] }
 0x73f   :  { %4479 = vpow2.f32 %v3787_v62  ;;  %v7144_v62 = vld [vmem:[#allocation23_spill] sm:$0xff] }
 0x740   :  { %4481 = vpow2.f32 %v3789_v56 }
 0x741   :  { %v4470_v30 = vpop.eup %4469  ;;  %4483 = vrcp.f32 %v1595_v18 }
 0x742   :  { %v1597_v1 = vadd.f32 1.0, %v4470_v30 }
 0x744   :  { %4485 = vrcp.f32 %v1597_v1  ;;  %v7147_v1 = vld [vmem:[#allocation27_spill] sm:$0xff] }
 0x745   :  { %v4472_v33 = vpop.eup %4471 }
 0x746   :  { %v4474_v57 = vpop.eup %4473  ;;  %v1599_v41 = vadd.f32 1.0, %v4472_v33  ;;  %v7146_v33 = vld [vmem:[#allocation25_spill] sm:$0xff] }
 0x747   :  { %v4476_v51 = vpop.eup %4475  ;;  %v1601_v14 = vadd.f32 1.0, %v4474_v57 }
 0x748   :  { %v4478_v19 = vpop.eup %4477  ;;  %v1603_v6 = vadd.f32 1.0, %v4476_v51  ;;  %4487 = vrcp.f32 %v1599_v41 }
 0x749   :  { %v4480_v50 = vpop.eup %4479  ;;  %v1605_v10 = vadd.f32 1.0, %v4478_v19  ;;  %4489 = vrcp.f32 %v1601_v14 }
 0x74a   :  { %v4482_v43 = vpop.eup %4481  ;;  %v1607_v55 = vadd.f32 1.0, %v4480_v50  ;;  %4491 = vrcp.f32 %v1603_v6  ;;  %v7148_v50 = vld [vmem:[#allocation28_spill] sm:$0xff] }
 0x74b   :  { %v1609_v46 = vadd.f32 1.0, %v4482_v43  ;;  %4493 = vrcp.f32 %v1605_v10  ;;  %v4484_v51 = vpop.eup %4483  ;;  %v7149_v43 = vld [vmem:[#allocation29_spill] sm:$0xff] }
 0x74c   :  { %4495 = vrcp.f32 %v1607_v55 }
 0x74d   :  { %4497 = vrcp.f32 %v1609_v46  ;;  %v7150_v46 = vld [vmem:[#allocation30_spill] sm:$0xff] }
 0x74e   :  { %v4486_v41 = vpop.eup %4485 }
 0x752   :  { %v4488_v6 = vpop.eup %4487 }
 0x753   :  { %v4490_v55 = vpop.eup %4489 }
 0x7ed   :  { %v1748_v20 = vpop.f32.mrb[16].mxu1 }
 0x7ee   :  { %v1755_v49 = vrot.slane %v1748_v20, 5  ;;  %v1756_v61 = vrot.slane %v1748_v20, 6  ;;  %v1757_v21 = vrot.slane %v1748_v20, 7  ;;  %v1758_v63 = vrot.slane %v1748_v20, 1  ;;  %v4044_v15 = vpop.f32.mrb[17].mxu1 }
 0x7ef   :  { %v1759_v48 = vrot.slane %v1748_v20, 2  ;;  %v1760_v8 = vrot.slane %v1748_v20, 3  ;;  %v1773_v60 = vadd.f32 %v7143_v11, %v1748_v20  ;;  %v1751_v22 = vpop.f32.mrb[18].mxu1  ;;  %v1761_v54 = vrot.slane %v1748_v20, 4 }
 0x7f0   :  { %v1770_v56 = vadd.f32 %v7144_v62, %v1755_v49  ;;  %v1771_v30 = vadd.f32 %v7145_v3, %v1756_v61  ;;  %v1772_v57 = vadd.f32 %v7146_v33, %v1757_v21  ;;  %v4045_v18 = vpop.f32.mrb[19].mxu1  ;;  %v1774_v19 = vadd.f32 %v7147_v1, %v1758_v63  ;;  %v4492_v49 = vpop.eup %4491 }
 0x7f1   :  { %4499 = vtanh.f32 %v1773_v60  ;;  %v1775_v14 = vadd.f32 %v7148_v50, %v1759_v48  ;;  %v1776_v10 = vadd.f32 %v7149_v43, %v1760_v8  ;;  %v1777_v20 = vadd.f32 %v7150_v46, %v1761_v54  ;;  %v4494_v61 = vpop.eup %4493 }
 0x7f2   :  { %4501 = vtanh.f32 %v1770_v56  ;;  %v4496_v21 = vpop.eup %4495  ;;  %v1789_v63 = vsub.f32 1.0, %v4490_v55  ;;  %v1786_v60 = vsub.f32 1.0, %v4484_v51  ;;  %v1787_v48 = vsub.f32 1.0, %v4486_v41 }
 0x7f3   :  { %4503 = vtanh.f32 %v1771_v30  ;;  %v4498_v15 = vpop.eup %4497  ;;  %v1788_v56 = vsub.f32 1.0, %v4488_v6  ;;  %v1790_v8 = vsub.f32 1.0, %v4492_v49  ;;  %v1791_v30 = vsub.f32 1.0, %v4494_v61 }
 0x7f4   :  { %4505 = vtanh.f32 %v1772_v57  ;;  %v1797_v5 = vmul.f32 %v1789_v63, %v5869_v42  ;;  %v1792_v4 = vsub.f32 1.0, %v4496_v21 }
 0x7f5   :  { %4507 = vtanh.f32 %v1774_v19  ;;  %v1794_v19 = vmul.f32 %v1786_v60, %v5863_v29  ;;  %v1796_v26 = vmul.f32 %v1788_v56, %v5872_v9 }
 0x7f6   :  { %4509 = vtanh.f32 %v1775_v14 }
 0x7f7   :  { %4511 = vtanh.f32 %v1776_v10  ;;  %v1793_v10 = vsub.f32 1.0, %v4498_v15 }
 0x7f8   :  { %4513 = vtanh.f32 %v1777_v20  ;;  %v1795_v20 = vmul.f32 %v1787_v48, %v5866_v34  ;;  %v1800_v48 = vmul.f32 %v1792_v4, %v5885_v35 }
 0x7fb   :  { %v4500_v22 = vpop.eup %4499 }
 0x7fc   :  { %v4502_v18 = vpop.eup %4501  ;;  %v1805_v54 = vmul.f32 %v4500_v22, %v4490_v55  ;;  %v1798_v55 = vmul.f32 %v1790_v8, %v5876_v2  ;;  %v1799_v22 = vmul.f32 %v1791_v30, %v5881_v7 }
 0x7fd   :  { %v4504_v57 = vpop.eup %4503  ;;  %v1802_v14 = vmul.f32 %v4502_v18, %v4484_v51 }
 0x7fe   :  { %v4506_v59 = vpop.eup %4505  ;;  %v1803_v28 = vmul.f32 %v4504_v57, %v4486_v41  ;;  %v5946_v16 = vadd.f32 %v1805_v54, %v1797_v5 }
 0x7ff   :  { %v4508_v13 = vpop.eup %4507  ;;  %v1804_v17 = vmul.f32 %v4506_v59, %v4488_v6  ;;  %v5949_v46 = vadd.f32 %v1802_v14, %v1794_v19  ;;  %v1801_v6 = vmul.f32 %v1793_v10, %v5894_v58 }
 0x800   :  { %v4510_v63 = vpop.eup %4509  ;;  %v1806_v60 = vmul.f32 %v4508_v13, %v4492_v49  ;;  %v5953_v51 = vadd.f32 %v1803_v28, %v1795_v20 }
 0x801   :  { %v4512_v18 = vpop.eup %4511  ;;  %v1807_v41 = vmul.f32 %v4510_v63, %v4494_v61  ;;  %v5956_v5 = vadd.f32 %v1804_v17, %v1796_v26  ;;  %v1818_v56 = vpack.c.bf16 %v5949_v46, %v5949_v46  ;;  %v1821_v61 = vpack.c.bf16 %v5946_v16, %v5946_v16 }
 0x802   :  { %v4514_v59 = vpop.eup %4513  ;;  %v1808_v54 = vmul.f32 %v4512_v18, %v4496_v21  ;;  %v5961_v57 = vadd.f32 %v1806_v60, %v1798_v55  ;;  %v1819_v13 = vpack.c.bf16 %v5953_v51, %v5953_v51 }
 0x803   :  { %v1809_v28 = vmul.f32 %v4514_v59, %v4498_v15  ;;  %v5965_v49 = vadd.f32 %v1807_v41, %v1799_v22  ;;  %v1820_v4 = vpack.c.bf16 %v5956_v5, %v5956_v5  ;;  %v1834_v17 = vunpack.c.l.b16 %v1818_v56 }
 0x804   :  { %v5969_v26 = vadd.f32 %v1808_v54, %v1800_v48  ;;  %v1822_v21 = vpack.c.bf16 %v5961_v57, %v5961_v57  ;;  %v1835_v8 = vunpack.c.l.b16 %v1819_v13  ;;  %v1837_v18 = vunpack.c.l.b16 %v1821_v61 }
 0x805   :  { %v5975_v30 = vadd.f32 %v1809_v28, %v1801_v6  ;;  %v1823_v15 = vpack.c.bf16 %v5965_v49, %v5965_v49  ;;  %v1836_v19 = vunpack.c.l.b16 %v1820_v4  ;;  %v1842_v14 = vrot.slane %v1834_v17, 3 }
 0x806   :  { %v1824_v10 = vpack.c.bf16 %v5969_v26, %v5969_v26  ;;  %v1838_v20 = vunpack.c.l.b16 %v1822_v21  ;;  %v1843_v63 = vrot.slane %v1835_v8, 2 }
 0x807   :  { %v1825_v55 = vpack.c.bf16 %v5975_v30, %v5975_v30  ;;  %v1839_v22 = vunpack.c.l.b16 %v1823_v15  ;;  %v1845_v60 = vrot.slane %v1836_v19, 1  ;;  %v5993_v19 = vld [vmem:[%s6886_s3] ss:$8 sps:$4 sm:$0xff]  }
 0x808   :  { %v1840_v48 = vunpack.c.l.b16 %v1824_v10  ;;  %v1844_v41 = vsel %vm441_vm1, %v1843_v63, %v1842_v14  ;;  %v1848_v6 = vrot.slane %v1838_v20, 7  ;;  %v6000_v14 = vld [vmem:[%s6886_s3 + $0x14] ss:$8 sps:$4 sm:$0xff]   ;;  %v6006_v10 = vld [vmem:[%s6886_s3 + $0x10] ss:$8 sps:$4 sm:$0xff]  }
 0x809   :  { %v1841_v56 = vunpack.c.l.b16 %v1825_v55  ;;  %v1846_v59 = vsel %vm444_vm2, %v1845_v60, %v1844_v41  ;;  %v1850_v13 = vrot.slane %v1839_v22, 6  ;;  %v6012_v20 = vld [vmem:[%s6886_s3 + $0x24] ss:$8 sps:$4 sm:$0xff]   ;;  %v6018_v63 = vld [vmem:[%s6886_s3 + $0x20] ss:$8 sps:$4 sm:$0xff]  }
 0x80a   :  { %v1847_v54 = vsel %vm447_vm3, %v1837_v18, %v1846_v59  ;;  %v1852_v4 = vrot.slane %v1840_v48, 5  ;;  %v6024_v55 = vld [vmem:[%s6886_s3 + $0x34] ss:$8 sps:$4 sm:$0xff]   ;;  %v6030_v22 = vld [vmem:[%s6886_s3 + $0x30] ss:$8 sps:$4 sm:$0xff]  }
 0x80b   :  { %v1849_v28 = vsel %vm450_vm4, %v1848_v6, %v1847_v54  ;;  %v1854_v21 = vrot.slane %v1841_v56, 4  ;;  %v6036_v60 = vld [vmem:[%s6886_s3 + $0x44] ss:$8 sps:$4 sm:$0xff]   ;;  %v6042_v18 = vld [vmem:[%s6886_s3 + $0x40] ss:$8 sps:$4 sm:$0xff]  }
 0x80c   :  { %v1851_v17 = vsel %vm453_vm5, %v1850_v13, %v1849_v28  ;;  %v6048_v48 = vld [vmem:[%s6886_s3 + $0x54] ss:$8 sps:$4 sm:$0xff]   ;;  %v6054_v41 = vld [vmem:[%s6886_s3 + $0x50] ss:$8 sps:$4 sm:$0xff]   ;;  %v6060_v56 = vld [vmem:[%s6886_s3 + $0x64] ss:$8 sps:$4 sm:$0xff]  }
 0x80d   :  { %v1853_v8 = vsel %vm456_vm6, %v1852_v4, %v1851_v17  ;;  %7151 = vst [vmem:[#allocation46_spill] sm:$0xff] %v6048_v48  ;;  %7152 = vst [vmem:[#allocation47_spill] sm:$0xff] %v6054_v41  ;;  %v6066_v59 = vld [vmem:[%s6886_s3 + $0x60] ss:$8 sps:$4 sm:$0xff]   ;;  %v6072_v6 = vld [vmem:[%s6886_s3 + $0x74] ss:$8 sps:$4 sm:$0xff]  }
 0x80e   :  { %v1855_v61 = vsel %vm459_vm7, %v1854_v21, %v1853_v8  ;;  %7153 = vst [vmem:[#allocation48_spill] sm:$0xff] %v6060_v56  ;;  %7154 = vst [vmem:[#allocation49_spill] sm:$0xff] %v6066_v59  ;;  %v6078_v54 = vld [vmem:[%s6886_s3 + $0x70] ss:$8 sps:$4 sm:$0xff]   ;;  %v6084_v13 = vld [vmem:[%s6886_s3 + $0x4] ss:$8 sps:$4 sm:$0xff]  }
 0x80f   :  { %v1856_v15 = vpack.c.b16 %v1855_v61, %v1855_v61  ;;  %7155 = vst [vmem:[#allocation50_spill] sm:$0xff] %v6072_v6  ;;  %7156 = vst [vmem:[#allocation51_spill] sm:$0xff] %v6078_v54 }
 0x810   :  { %7157 = vst [vmem:[#allocation52_spill] sm:$0xff] %v6084_v13 }
 0x811   :  { %1891 = vmatmul.mubr.bf16.vlgmr.msra.gmra.mrb[12].mxu0 %v1856_v15 }
 0x812   :  { %2260 = vmatpush1.bf16.msra.mxu0 %v5993_v19  ;;  %2291 = vmatprep.mubr.bf16.mxu0 %v7074_v32 }
 0x813   :  { %2261 = vmatprep.subr.bf16.mxu0 %v6000_v14 }
 0x816   :  { %2262 = vmatpush1.bf16.msra.mxu0 %v6006_v10 }
 0x817   :  { %2263 = vmatprep.subr.bf16.mxu0 %v6012_v20 }
 0x81a   :  { %2264 = vmatpush1.bf16.msra.mxu0 %v6018_v63 }
 0x81b   :  { %2265 = vmatprep.subr.bf16.mxu0 %v6024_v55 }
 0x81e   :  { %2266 = vmatpush1.bf16.msra.mxu0 %v6030_v22 }
 0x81f   :  { %2267 = vmatprep.subr.bf16.mxu0 %v6036_v60 }
 0x822   :  { %2268 = vmatpush1.bf16.msra.mxu0 %v6042_v18 }
 0x823   :  { %2269 = vmatprep.subr.bf16.mxu0 %v6048_v48 }
 0x826   :  { %2270 = vmatpush1.bf16.msra.mxu0 %v6054_v41 }
 0x827   :  { %2271 = vmatprep.subr.bf16.mxu0 %v6060_v56 }
 0x82a   :  { %2272 = vmatpush1.bf16.msra.mxu0 %v6066_v59 }
 0x82b   :  { %2273 = vmatprep.subr.bf16.mxu0 %v6072_v6 }
 0x82e   :  { %2274 = vmatpush1.bf16.msra.mxu0 %v6078_v54 }
 0x82f   :  { %2660 = vmatprep.subr.bf16.mxu0 %v6084_v13 }
 0x8e4   :  { %v1892_v28 = vpop.f32.mrb[12].mxu0 }
 0x8e5   :  { %v1901_v4 = vrot.slane %v1892_v28, 4  ;;  %v1903_v17 = vrot.slane %v1892_v28, 5  ;;  %v1905_v21 = vrot.slane %v1892_v28, 6  ;;  %v1907_v8 = vrot.slane %v1892_v28, 7  ;;  %v6087_v61 = vpop.f32.mrb[13].mxu0 }
 0x8e6   :  { %v1909_v15 = vrot.slane %v1892_v28, 1  ;;  %v1911_v35 = vrot.slane %v1892_v28, 2  ;;  %v1939_v58 = vadd.f32 %v1892_v28, %v5170_v40  ;;  %v1896_v7 = vpop.f32.mrb[14].mxu0  ;;  %v1913_v13 = vrot.slane %v1892_v28, 3 }
 0x8e7   :  { %v1931_v2 = vadd.f32 %v1901_v4, %v5162_v36  ;;  %v1933_v42 = vadd.f32 %v1903_v17, %v5164_v37  ;;  %v1935_v9 = vadd.f32 %v1905_v21, %v5166_v38  ;;  %v1937_v34 = vadd.f32 %v1907_v8, %v5168_v39  ;;  %v1897_v29 = vpop.f32.mrb[15].mxu0 }
 0x8e8   :  { %v1941_v54 = vadd.f32 %v1909_v15, %v7124_v31  ;;  %v1943_v6 = vadd.f32 %v1911_v35, %v7125_v53  ;;  %v3798_v59 = vmul.f32 -1.442695, %v1939_v58  ;;  %v1945_v17 = vadd.f32 %v1913_v13, %v7126_v24 }
 0x8e9   :  { %v3790_v56 = vmul.f32 -1.442695, %v1931_v2  ;;  %v3792_v41 = vmul.f32 -1.442695, %v1933_v42  ;;  %v3794_v48 = vmul.f32 -1.442695, %v1935_v9 }
 0x8ea   :  { %v3796_v40 = vmul.f32 -1.442695, %v1937_v34  ;;  %4515 = vpow2.f32 %v3798_v59  ;;  %v3800_v7 = vmul.f32 -1.442695, %v1941_v54  ;;  %v3802_v4 = vmul.f32 -1.442695, %v1943_v6 }
 0x8eb   :  { %4517 = vpow2.f32 %v3790_v56  ;;  %v3804_v29 = vmul.f32 -1.442695, %v1945_v17  ;;  %v6098_v8 = vrot.slane %v5949_v46, 7 }
 0x8ec   :  { %4519 = vpow2.f32 %v3792_v41 }
 0x8ed   :  { %4521 = vpow2.f32 %v3794_v48  ;;  %7158 = vst [vmem:[#allocation53_spill] sm:$0xff] %v6098_v8 }
 0x8ee   :  { %4523 = vpow2.f32 %v3796_v40 }
 0x8ef   :  { %4525 = vpow2.f32 %v3800_v7  ;;  %v6101_v7 = vrot.slane %v5953_v51, 7  ;;  %v6115_v51 = vrot.slane %v5965_v49, 7 }
 0x8f0   :  { %4527 = vpow2.f32 %v3802_v4 }
 0x8f1   :  { %4529 = vpow2.f32 %v3804_v29  ;;  %7159 = vst [vmem:[#allocation54_spill] sm:$0xff] %v6101_v7  ;;  %v6104_v29 = vrot.slane %v5956_v5, 7  ;;  %7163 = vst [vmem:[#allocation58_spill] sm:$0xff] %v6115_v51 }
 0x8f3   :  { %7160 = vst [vmem:[#allocation55_spill] sm:$0xff] %v6104_v29 }
 0x8f4   :  { %v4516_v28 = vpop.eup %4515 }
 0x8f5   :  { %v4518_v21 = vpop.eup %4517  ;;  %v2003_v35 = vadd.f32 1.0, %v4516_v28 }
 0x8f6   :  { %v4520_v2 = vpop.eup %4519  ;;  %v1995_v42 = vadd.f32 1.0, %v4518_v21 }
 0x8f7   :  { %v4522_v9 = vpop.eup %4521  ;;  %v1997_v34 = vadd.f32 1.0, %v4520_v2  ;;  %4531 = vrcp.f32 %v2003_v35  ;;  %v6108_v35 = vrot.slane %v5946_v16, 7  ;;  %v6111_v2 = vrot.slane %v5961_v57, 7 }
 0x8f8   :  { %v4524_v58 = vpop.eup %4523  ;;  %v1999_v56 = vadd.f32 1.0, %v4522_v9  ;;  %4533 = vrcp.f32 %v1995_v42  ;;  %v6118_v9 = vrot.slane %v5969_v26, 7 }
 0x8f9   :  { %v4526_v41 = vpop.eup %4525  ;;  %v2001_v59 = vadd.f32 1.0, %v4524_v58  ;;  %4535 = vrcp.f32 %v1997_v34  ;;  %7161 = vst [vmem:[#allocation56_spill] sm:$0xff] %v6108_v35  ;;  %7162 = vst [vmem:[#allocation57_spill] sm:$0xff] %v6111_v2 }
 0x8fa   :  { %v4528_v48 = vpop.eup %4527  ;;  %v2005_v40 = vadd.f32 1.0, %v4526_v41  ;;  %4537 = vrcp.f32 %v1999_v56  ;;  %7164 = vst [vmem:[#allocation59_spill] sm:$0xff] %v6118_v9 }
 0x8fb   :  { %v2007_v6 = vadd.f32 1.0, %v4528_v48  ;;  %4539 = vrcp.f32 %v2001_v59  ;;  %v4530_v54 = vpop.eup %4529 }
 0x8fc   :  { %4541 = vrcp.f32 %v2005_v40  ;;  %v2009_v4 = vadd.f32 1.0, %v4530_v54 }
 0x8fd   :  { %4543 = vrcp.f32 %v2007_v6 }
 0x8fe   :  { %4545 = vrcp.f32 %v2009_v4 }
 0x901   :  { %v4532_v13 = vpop.eup %4531 }
 0x902   :  { %v4534_v15 = vpop.eup %4533  ;;  %v2071_v56 = vmul.f32 %v4532_v13, %v6111_v2 }
 0x903   :  { %v4536_v17 = vpop.eup %4535  ;;  %v2067_v28 = vmul.f32 %v4534_v15, %v6098_v8 }
 0x904   :  { %v4538_v21 = vpop.eup %4537  ;;  %v2068_v46 = vmul.f32 %v4536_v17, %v6101_v7 }
 0x905   :  { %v4540_v42 = vpop.eup %4539  ;;  %v2069_v5 = vmul.f32 %v4538_v21, %v6104_v29  ;;  %v2075_v34 = vpack.c.bf16 %v2067_v28, %v2067_v28  ;;  %v2079_v28 = vpack.c.bf16 %v2071_v56, %v2071_v56 }
 0x906   :  { %v4542_v58 = vpop.eup %4541  ;;  %v2070_v16 = vmul.f32 %v4540_v42, %v6108_v35  ;;  %v2076_v57 = vpack.c.bf16 %v2068_v46, %v2068_v46 }
 0x907   :  { %v4544_v41 = vpop.eup %4543  ;;  %v2072_v59 = vmul.f32 %v4542_v58, %v6115_v51  ;;  %v2077_v48 = vpack.c.bf16 %v2069_v5, %v2069_v5  ;;  %v2091_v40 = vunpack.c.l.b16 %v2075_v34  ;;  %v2095_v5 = vunpack.c.l.b16 %v2079_v28  ;;  %v6155_v28 = vld [vmem:[%s6888_s4 + $0x10] sm:$0xff]  }
 0x908   :  { %v2073_v49 = vmul.f32 %v4544_v41, %v6118_v9  ;;  %v2078_v6 = vpack.c.bf16 %v2070_v16, %v2070_v16  ;;  %v2092_v26 = vunpack.c.l.b16 %v2076_v57  ;;  %v6129_v16 = vrot.slane %v5975_v30, 7  ;;  %v4546_v57 = vpop.eup %4545  ;;  %v6139_v30 = vld [vmem:[%s6888_s4] sm:$0xff]  }
 0x909   :  { %v2080_v54 = vpack.c.bf16 %v2072_v59, %v2072_v59  ;;  %v2093_v15 = vunpack.c.l.b16 %v2077_v48  ;;  %v2099_v17 = vrot.slane %v2091_v40, 4 }
 0x90a   :  { %v2094_v21 = vunpack.c.l.b16 %v2078_v6  ;;  %v2100_v4 = vrot.slane %v2092_v26, 3  ;;  %v2081_v42 = vpack.c.bf16 %v2073_v49, %v2073_v49  ;;  %7165 = vst [vmem:[#allocation60_spill] sm:$0xff] %v6129_v16  ;;  %v2074_v59 = vmul.f32 %v4546_v57, %v6129_v16 }
 0x90b   :  { %v2102_v24 = vrot.slane %v2093_v15, 2  ;;  %v2096_v53 = vunpack.c.l.b16 %v2080_v54  ;;  %v1908_v57 = vrot.slane %v6087_v61, 7 }
 0x90c   :  { %v2101_v13 = vsel %vm441_vm1, %v2100_v4, %v2099_v17  ;;  %v2104_v46 = vrot.slane %v2094_v21, 1  ;;  %v2097_v41 = vunpack.c.l.b16 %v2081_v42  ;;  %v2082_v40 = vpack.c.bf16 %v2074_v59, %v2074_v59  ;;  %v6162_v21 = vld [vmem:[%s6888_s4 + $0x18] sm:$0xff]   ;;  %v6169_v4 = vld [vmem:[%s6888_s4 + $0x20] sm:$0xff]   ;;  %v6176_v42 = vld [vmem:[%s6888_s4 + $0x28] sm:$0xff]  }
 0x90d   :  { %v2103_v58 = vsel %vm444_vm2, %v2102_v24, %v2101_v13  ;;  %v2107_v48 = vrot.slane %v2096_v53, 7  ;;  %v6148_v53 = vld [vmem:[%s6888_s4 + $0x8] sm:$0xff]   ;;  %v6183_v13 = vld [vmem:[%s6888_s4 + $0x30] sm:$0xff]  }
 0x90e   :  { %v2105_v34 = vsel %vm447_vm3, %v2104_v46, %v2103_v58  ;;  %v2109_v6 = vrot.slane %v2097_v41, 6  ;;  %v2098_v26 = vunpack.c.l.b16 %v2082_v40  ;;  %v6190_v46 = vld [vmem:[%s6888_s4 + $0x38] sm:$0xff]   ;;  %v1902_v58 = vrot.slane %v6087_v61, 4 }
 0x90f   :  { %v2106_v56 = vsel %vm450_vm4, %v2095_v5, %v2105_v34  ;;  %v1904_v5 = vrot.slane %v6087_v61, 5  ;;  %v1906_v34 = vrot.slane %v6087_v61, 6 }
 0x910   :  { %v2108_v49 = vsel %vm453_vm5, %v2107_v48, %v2106_v56  ;;  %v2111_v54 = vrot.slane %v2098_v26, 5  ;;  %v1932_v41 = vadd.f32 %v1902_v58, %v7135_v12  ;;  %v1910_v56 = vrot.slane %v6087_v61, 1 }
 0x911   :  { %v2110_v24 = vsel %vm456_vm6, %v2109_v6, %v2108_v49  ;;  %v1934_v59 = vadd.f32 %v1904_v5, %v7136_v47  ;;  %v1912_v48 = vrot.slane %v6087_v61, 2  ;;  %v1936_v40 = vadd.f32 %v1906_v34, %v7137_v25 }
 0x912   :  { %v2112_v15 = vsel %vm459_vm7, %v2111_v54, %v2110_v24  ;;  %v1938_v49 = vadd.f32 %v1908_v57, %v7138_v23  ;;  %v1914_v6 = vrot.slane %v6087_v61, 3  ;;  %v1940_v26 = vadd.f32 %v6087_v61, %v7139_v44 }
 0x913   :  { %v2113_v17 = vpack.c.b16 %v2112_v15, %v2112_v15  ;;  %v3791_v24 = vmul.f32 -1.442695, %v1932_v41  ;;  %v1942_v54 = vadd.f32 %v1910_v56, %v7140_v52  ;;  %v3793_v15 = vmul.f32 -1.442695, %v1934_v59 }
 0x914   :  { %v3795_v58 = vmul.f32 -1.442695, %v1936_v40  ;;  %v3797_v12 = vmul.f32 -1.442695, %v1938_v49  ;;  %v1946_v5 = vadd.f32 %v1914_v6, %v7142_v0  ;;  %v3799_v47 = vmul.f32 -1.442695, %v1940_v26 }
 0x915   :  { %4063 = vmatmul.mubr.bf16.vlgmr.msra.gmra.mrb[20].mxu1 %v2113_v17  ;;  %v1944_v17 = vadd.f32 %v1912_v48, %v7141_v45  ;;  %4547 = vpow2.f32 %v3791_v24  ;;  %v3801_v34 = vmul.f32 -1.442695, %v1942_v54 }
 0x916   :  { %4067 = vmatpush3.bf16.msra.mxu1 %v6139_v30  ;;  %4082 = vmatprep.mubr.msk.bf16.mxu1 %vm4909_vm0, %v7084_v27  ;;  %4549 = vpow2.f32 %v3793_v15  ;;  %v3805_v23 = vmul.f32 -1.442695, %v1946_v5 }
 0x917   :  { %4068 = vmatprep.subr.bf16.mxu1 %v7084_v27  ;;  %4551 = vpow2.f32 %v3795_v58  ;;  %v3803_v57 = vmul.f32 -1.442695, %v1944_v17 }
 0x918   :  { %4553 = vpow2.f32 %v3797_v12 }
 0x919   :  { %4555 = vpow2.f32 %v3799_v47 }
 0x91a   :  { %4069 = vmatpush3.bf16.msra.mxu1 %v6148_v53  ;;  %4557 = vpow2.f32 %v3801_v34 }
 0x91b   :  { %4070 = vmatprep.subr.bf16.mxu1 %v7084_v27  ;;  %4559 = vpow2.f32 %v3803_v57 }
 0x91c   :  { %4561 = vpow2.f32 %v3805_v23 }
 0x91e   :  { %4071 = vmatpush3.bf16.msra.mxu1 %v6155_v28 }
 0x91f   :  { %4072 = vmatprep.subr.bf16.mxu1 %v7084_v27  ;;  %v4548_v61 = vpop.eup %4547 }
 0x920   :  { %v4550_v41 = vpop.eup %4549  ;;  %v1996_v48 = vadd.f32 1.0, %v4548_v61 }
 0x921   :  { %v4552_v56 = vpop.eup %4551  ;;  %v1998_v49 = vadd.f32 1.0, %v4550_v41 }
 0x922   :  { %4073 = vmatpush3.bf16.msra.mxu1 %v6162_v21  ;;  %v4554_v59 = vpop.eup %4553  ;;  %v2000_v24 = vadd.f32 1.0, %v4552_v56  ;;  %4563 = vrcp.f32 %v1996_v48 }
 0x923   :  { %4074 = vmatprep.subr.bf16.mxu1 %v7084_v27  ;;  %v4556_v40 = vpop.eup %4555  ;;  %v2002_v15 = vadd.f32 1.0, %v4554_v59  ;;  %4565 = vrcp.f32 %v1998_v49 }
 0x924   :  { %v4558_v6 = vpop.eup %4557  ;;  %v2004_v54 = vadd.f32 1.0, %v4556_v40  ;;  %4567 = vrcp.f32 %v2000_v24 }
 0x925   :  { %v4560_v26 = vpop.eup %4559  ;;  %v2006_v12 = vadd.f32 1.0, %v4558_v6  ;;  %4569 = vrcp.f32 %v2002_v15 }
 0x926   :  { %4075 = vmatpush3.bf16.msra.mxu1 %v6169_v4  ;;  %v4562_v17 = vpop.eup %4561  ;;  %v2008_v47 = vadd.f32 1.0, %v4560_v26  ;;  %4571 = vrcp.f32 %v2004_v54 }
 0x927   :  { %4076 = vmatprep.subr.bf16.mxu1 %v7084_v27  ;;  %v2010_v23 = vadd.f32 1.0, %v4562_v17  ;;  %4573 = vrcp.f32 %v2006_v12 }
 0x928   :  { %4575 = vrcp.f32 %v2008_v47 }
 0x929   :  { %4577 = vrcp.f32 %v2010_v23 }
 0x92a   :  { %4077 = vmatpush3.bf16.msra.mxu1 %v6176_v42 }
 0x92b   :  { %4078 = vmatprep.subr.bf16.mxu1 %v7084_v27 }
 0x92c   :  { %v4564_v54 = vpop.eup %4563 }
 0x92d   :  { %v4566_v12 = vpop.eup %4565 }
 0x92e   :  { %4079 = vmatpush3.bf16.msra.mxu1 %v6183_v13  ;;  %v4568_v23 = vpop.eup %4567 }
 0x92f   :  { %4080 = vmatprep.subr.bf16.mxu1 %v7084_v27 }
 0x932   :  { %4081 = vmatpush3.bf16.msra.mxu1 %v6190_v46 }
 0x933   :  { %4086 = vmatprep.subr.bf16.mxu1 %v7084_v27 }
 0x9e8   :  { %v2149_v58 = vpop.f32.mrb[20].mxu1 }
 0x9e9   :  { %v2156_v5 = vrot.slane %v2149_v58, 4  ;;  %v2157_v34 = vrot.slane %v2149_v58, 5  ;;  %v2158_v57 = vrot.slane %v2149_v58, 6  ;;  %v2159_v61 = vrot.slane %v2149_v58, 7  ;;  %v4064_v41 = vpop.f32.mrb[21].mxu1 }
 0x9ea   :  { %v2160_v56 = vrot.slane %v2149_v58, 1  ;;  %v2161_v59 = vrot.slane %v2149_v58, 2  ;;  %v2175_v48 = vadd.f32 %v7147_v1, %v2149_v58  ;;  %v2152_v40 = vpop.f32.mrb[22].mxu1  ;;  %v2162_v49 = vrot.slane %v2149_v58, 3  ;;  %v4570_v58 = vpop.eup %4569 }
 0x9eb   :  { %v2171_v6 = vadd.f32 %v7144_v62, %v2156_v5  ;;  %v2172_v24 = vadd.f32 %v7145_v3, %v2157_v34  ;;  %v2173_v26 = vadd.f32 %v7146_v33, %v2158_v57  ;;  %v4065_v15 = vpop.f32.mrb[23].mxu1  ;;  %v2174_v17 = vadd.f32 %v7143_v11, %v2159_v61  ;;  %v7166_v40 = vld [vmem:[#allocation30_spill] sm:$0xff]  ;;  %v4572_v34 = vpop.eup %4571 }
 0x9ec   :  { %4579 = vtanh.f32 %v2175_v48  ;;  %v2176_v47 = vadd.f32 %v7148_v50, %v2160_v56  ;;  %v2177_v41 = vadd.f32 %v7149_v43, %v2161_v59  ;;  %v2178_v5 = vadd.f32 %v7166_v40, %v2162_v49  ;;  %v4574_v57 = vpop.eup %4573 }
 0x9ed   :  { %4581 = vtanh.f32 %v2171_v6  ;;  %v4576_v15 = vpop.eup %4575  ;;  %v2191_v61 = vsub.f32 1.0, %v4572_v34  ;;  %v2187_v1 = vsub.f32 1.0, %v4564_v54  ;;  %v2188_v56 = vsub.f32 1.0, %v4566_v12 }
 0x9ee   :  { %4583 = vtanh.f32 %v2172_v24  ;;  %v4578_v48 = vpop.eup %4577  ;;  %v2189_v11 = vsub.f32 1.0, %v4568_v23  ;;  %v2190_v59 = vsub.f32 1.0, %v4570_v58  ;;  %v2192_v24 = vsub.f32 1.0, %v4574_v57 }
 0x9ef   :  { %4585 = vtanh.f32 %v2173_v26  ;;  %v2199_v43 = vmul.f32 %v2191_v61, %v6111_v2  ;;  %v2193_v40 = vsub.f32 1.0, %v4576_v15 }
 0x9f0   :  { %4587 = vtanh.f32 %v2174_v17  ;;  %v2195_v17 = vmul.f32 %v2187_v1, %v6098_v8  ;;  %v2197_v45 = vmul.f32 %v2189_v11, %v6104_v29 }
 0x9f1   :  { %4589 = vtanh.f32 %v2176_v47 }
 0x9f2   :  { %4591 = vtanh.f32 %v2177_v41  ;;  %v2194_v41 = vsub.f32 1.0, %v4578_v48 }
 0x9f3   :  { %4593 = vtanh.f32 %v2178_v5  ;;  %v2196_v5 = vmul.f32 %v2188_v56, %v6101_v7  ;;  %v2201_v56 = vmul.f32 %v2193_v40, %v6118_v9 }
 0x9f6   :  { %v4580_v6 = vpop.eup %4579 }
 0x9f7   :  { %v4582_v33 = vpop.eup %4581  ;;  %v2207_v49 = vmul.f32 %v4580_v6, %v4572_v34  ;;  %v2198_v34 = vmul.f32 %v2190_v59, %v6108_v35  ;;  %v2200_v6 = vmul.f32 %v2192_v24, %v6115_v51 }
 0x9f8   :  { %v4584_v26 = vpop.eup %4583  ;;  %v2203_v47 = vmul.f32 %v4582_v33, %v4564_v54 }
 0x9f9   :  { %v4586_v3 = vpop.eup %4585  ;;  %v2204_v62 = vmul.f32 %v4584_v26, %v4566_v12  ;;  %v6221_v50 = vadd.f32 %v2207_v49, %v2199_v43 }
 0x9fa   :  { %v4588_v0 = vpop.eup %4587  ;;  %v2205_v44 = vmul.f32 %v4586_v3, %v4568_v23  ;;  %v6224_v52 = vadd.f32 %v2203_v47, %v2195_v17  ;;  %v2202_v23 = vmul.f32 %v2194_v41, %v6129_v16 }
 0x9fb   :  { %v4590_v61 = vpop.eup %4589  ;;  %v2206_v1 = vmul.f32 %v4588_v0, %v4570_v58  ;;  %v6228_v33 = vadd.f32 %v2204_v62, %v2196_v5 }
 0x9fc   :  { %v4592_v54 = vpop.eup %4591  ;;  %v2208_v12 = vmul.f32 %v4590_v61, %v4574_v57  ;;  %v6231_v43 = vadd.f32 %v2205_v44, %v2197_v45  ;;  %v2219_v11 = vpack.c.bf16 %v6224_v52, %v6224_v52 }
 0x9fd   :  { %v4594_v3 = vpop.eup %4593  ;;  %v2209_v49 = vmul.f32 %v4592_v54, %v4576_v15  ;;  %v6236_v26 = vadd.f32 %v2206_v1, %v2198_v34  ;;  %v2220_v0 = vpack.c.bf16 %v6228_v33, %v6228_v33  ;;  %v2223_v15 = vpack.c.bf16 %v6221_v50, %v6221_v50 }
 0x9fe   :  { %v2210_v62 = vmul.f32 %v4594_v3, %v4578_v48  ;;  %v6240_v58 = vadd.f32 %v2208_v12, %v2200_v6  ;;  %v2221_v40 = vpack.c.bf16 %v6231_v43, %v6231_v43  ;;  %v2235_v44 = vunpack.c.l.b16 %v2219_v11 }
 0x9ff   :  { %v6244_v45 = vadd.f32 %v2209_v49, %v2201_v56  ;;  %v2222_v57 = vpack.c.bf16 %v6236_v26, %v6236_v26  ;;  %v2236_v59 = vunpack.c.l.b16 %v2220_v0  ;;  %v2239_v11 = vunpack.c.l.b16 %v2223_v15  ;;  %v7167_v15 = vld [vmem:[#allocation46_spill] sm:$0xff] }
 0xa00   :  { %v6250_v24 = vadd.f32 %v2210_v62, %v2202_v23  ;;  %v2224_v48 = vpack.c.bf16 %v6240_v58, %v6240_v58  ;;  %v2237_v17 = vunpack.c.l.b16 %v2221_v40  ;;  %v2243_v47 = vrot.slane %v2235_v44, 4 }
 0xa01   :  { %v2225_v41 = vpack.c.bf16 %v6244_v45, %v6244_v45  ;;  %v2238_v5 = vunpack.c.l.b16 %v2222_v57  ;;  %v2244_v61 = vrot.slane %v2236_v59, 3 }
 0xa02   :  { %v2226_v34 = vpack.c.bf16 %v6250_v24, %v6250_v24  ;;  %v2240_v6 = vunpack.c.l.b16 %v2224_v48  ;;  %v2246_v1 = vrot.slane %v2237_v17, 2 }
 0xa03   :  { %v2241_v54 = vunpack.c.l.b16 %v2225_v41  ;;  %v2245_v56 = vsel %vm441_vm1, %v2244_v61, %v2243_v47  ;;  %v2248_v12 = vrot.slane %v2238_v5, 1  ;;  %v7169_v47 = vld [vmem:[#allocation48_spill] sm:$0xff] }
 0xa04   :  { %v2242_v3 = vunpack.c.l.b16 %v2226_v34  ;;  %v2247_v23 = vsel %vm444_vm2, %v2246_v1, %v2245_v56  ;;  %v2251_v0 = vrot.slane %v2240_v6, 7 }
 0xa05   :  { %v2249_v49 = vsel %vm447_vm3, %v2248_v12, %v2247_v23  ;;  %v2253_v40 = vrot.slane %v2241_v54, 6 }
 0xa06   :  { %v2250_v62 = vsel %vm450_vm4, %v2239_v11, %v2249_v49  ;;  %v2255_v57 = vrot.slane %v2242_v3, 5  ;;  %v7174_v49 = vld [vmem:[#allocation11_spill] sm:$0xff] }
 0xa07   :  { %v2252_v44 = vsel %vm453_vm5, %v2251_v0, %v2250_v62  ;;  %v7175_v62 = vld [vmem:[#allocation13_spill] sm:$0xff] }
 0xa08   :  { %v2254_v59 = vsel %vm456_vm6, %v2253_v40, %v2252_v44 }
 0xa09   :  { %v2256_v48 = vsel %vm459_vm7, %v2255_v57, %v2254_v59 }
 0xa0a   :  { %v2257_v17 = vpack.c.b16 %v2256_v48, %v2256_v48 }
 0xa0c   :  { %2292 = vmatmul.mubr.bf16.vlgmr.msra.gmra.mrb[16].mxu0 %v2257_v17 }
 0xa0d   :  { %2661 = vmatpush1.bf16.msra.mxu0 %v5993_v19  ;;  %2692 = vmatprep.mubr.bf16.mxu0 %v7074_v32  ;;  %v7168_v19 = vld [vmem:[#allocation47_spill] sm:$0xff] }
 0xa0e   :  { %2662 = vmatprep.subr.bf16.mxu0 %v6000_v14  ;;  %v7170_v14 = vld [vmem:[#allocation49_spill] sm:$0xff] }
 0xa11   :  { %2663 = vmatpush1.bf16.msra.mxu0 %v6006_v10  ;;  %v7171_v10 = vld [vmem:[#allocation50_spill] sm:$0xff] }
 0xa12   :  { %2664 = vmatprep.subr.bf16.mxu0 %v6012_v20  ;;  %v7172_v20 = vld [vmem:[#allocation51_spill] sm:$0xff] }
 0xa15   :  { %2665 = vmatpush1.bf16.msra.mxu0 %v6018_v63  ;;  %v7173_v63 = vld [vmem:[#allocation52_spill] sm:$0xff] }
 0xa16   :  { %2666 = vmatprep.subr.bf16.mxu0 %v6024_v55 }
 0xa19   :  { %2667 = vmatpush1.bf16.msra.mxu0 %v6030_v22 }
 0xa1a   :  { %2668 = vmatprep.subr.bf16.mxu0 %v6036_v60 }
 0xa1d   :  { %2669 = vmatpush1.bf16.msra.mxu0 %v6042_v18 }
 0xa1e   :  { %2670 = vmatprep.subr.bf16.mxu0 %v7167_v15 }
 0xa21   :  { %2671 = vmatpush1.bf16.msra.mxu0 %v7168_v19 }
 0xa22   :  { %2672 = vmatprep.subr.bf16.mxu0 %v7169_v47  ;;  %v7176_v47 = vld [vmem:[#allocation14_spill] sm:$0xff] }
 0xa25   :  { %2673 = vmatpush1.bf16.msra.mxu0 %v7170_v14 }
 0xa26   :  { %2674 = vmatprep.subr.bf16.mxu0 %v7171_v10 }
 0xa29   :  { %2675 = vmatpush1.bf16.msra.mxu0 %v7172_v20 }
 0xa2a   :  { %3061 = vmatprep.subr.bf16.mxu0 %v7173_v63 }
 0xadf   :  { %v2293_v55 = vpop.f32.mrb[16].mxu0 }
 0xae0   :  { %v2302_v22 = vrot.slane %v2293_v55, 3  ;;  %v2304_v41 = vrot.slane %v2293_v55, 4  ;;  %v2306_v60 = vrot.slane %v2293_v55, 5  ;;  %v2308_v5 = vrot.slane %v2293_v55, 6  ;;  %v6282_v18 = vpop.f32.mrb[17].mxu0 }
 0xae1   :  { %v2310_v61 = vrot.slane %v2293_v55, 7  ;;  %v2312_v34 = vrot.slane %v2293_v55, 1  ;;  %v2342_v6 = vadd.f32 %v2293_v55, %v7124_v31  ;;  %v2297_v1 = vpop.f32.mrb[18].mxu0  ;;  %v2314_v23 = vrot.slane %v2293_v55, 2 }
 0xae2   :  { %v2332_v54 = vadd.f32 %v2302_v22, %v5162_v36  ;;  %v2334_v56 = vadd.f32 %v2304_v41, %v5164_v37  ;;  %v2336_v12 = vadd.f32 %v2306_v60, %v5166_v38  ;;  %v2338_v11 = vadd.f32 %v2308_v5, %v5168_v39  ;;  %v2298_v3 = vpop.f32.mrb[19].mxu0 }
 0xae3   :  { %v2340_v0 = vadd.f32 %v2310_v61, %v7174_v49  ;;  %v2344_v40 = vadd.f32 %v2312_v34, %v7175_v62  ;;  %v3816_v44 = vmul.f32 -1.442695, %v2342_v6  ;;  %v2346_v14 = vadd.f32 %v2314_v23, %v7176_v47 }
 0xae4   :  { %v3806_v57 = vmul.f32 -1.442695, %v2332_v54  ;;  %v3808_v59 = vmul.f32 -1.442695, %v2334_v56  ;;  %v3810_v48 = vmul.f32 -1.442695, %v2336_v12 }
 0xae5   :  { %v3812_v17 = vmul.f32 -1.442695, %v2338_v11  ;;  %4595 = vpow2.f32 %v3816_v44  ;;  %v3814_v15 = vmul.f32 -1.442695, %v2340_v0  ;;  %v3818_v19 = vmul.f32 -1.442695, %v2344_v40 }
 0xae6   :  { %4597 = vpow2.f32 %v3806_v57  ;;  %v3820_v10 = vmul.f32 -1.442695, %v2346_v14  ;;  %v6293_v23 = vrot.slane %v6224_v52, 7  ;;  %v6296_v40 = vrot.slane %v6228_v33, 7 }
 0xae7   :  { %4599 = vpow2.f32 %v3808_v59  ;;  %v6299_v59 = vrot.slane %v6231_v43, 7  ;;  %v6307_v52 = vrot.slane %v6221_v50, 7 }
 0xae8   :  { %4601 = vpow2.f32 %v3810_v48 }
 0xae9   :  { %4603 = vpow2.f32 %v3812_v17 }
 0xaea   :  { %4605 = vpow2.f32 %v3814_v15  ;;  %v6303_v15 = vrot.slane %v6236_v26, 7  ;;  %v6315_v26 = vrot.slane %v6240_v58, 7 }
 0xaeb   :  { %4607 = vpow2.f32 %v3818_v19 }
 0xaec   :  { %4609 = vpow2.f32 %v3820_v10 }
 0xaef   :  { %v4596_v20 = vpop.eup %4595 }
 0xaf0   :  { %v4598_v63 = vpop.eup %4597  ;;  %v2406_v55 = vadd.f32 1.0, %v4596_v20 }
 0xaf1   :  { %v4600_v22 = vpop.eup %4599  ;;  %v2396_v41 = vadd.f32 1.0, %v4598_v63  ;;  %v6311_v63 = vrot.slane %v6244_v45, 7 }
 0xaf2   :  { %v4602_v60 = vpop.eup %4601  ;;  %v2398_v5 = vadd.f32 1.0, %v4600_v22  ;;  %4611 = vrcp.f32 %v2406_v55 }
 0xaf3   :  { %v4604_v61 = vpop.eup %4603  ;;  %v2400_v34 = vadd.f32 1.0, %v4602_v60  ;;  %4613 = vrcp.f32 %v2396_v41 }
 0xaf4   :  { %v4606_v6 = vpop.eup %4605  ;;  %v2402_v1 = vadd.f32 1.0, %v4604_v61  ;;  %4615 = vrcp.f32 %v2398_v5 }
 0xaf5   :  { %v4608_v54 = vpop.eup %4607  ;;  %v2404_v56 = vadd.f32 1.0, %v4606_v6  ;;  %4617 = vrcp.f32 %v2400_v34 }
 0xaf6   :  { %v2408_v12 = vadd.f32 1.0, %v4608_v54  ;;  %4619 = vrcp.f32 %v2402_v1  ;;  %v4610_v11 = vpop.eup %4609 }
 0xaf7   :  { %4621 = vrcp.f32 %v2404_v56  ;;  %v2410_v44 = vadd.f32 1.0, %v4610_v11 }
 0xaf8   :  { %4623 = vrcp.f32 %v2408_v12 }
 0xaf9   :  { %4625 = vrcp.f32 %v2410_v44 }
 0xafc   :  { %v4612_v3 = vpop.eup %4611 }
 0xafd   :  { %v4614_v0 = vpop.eup %4613  ;;  %v2473_v6 = vmul.f32 %v4612_v3, %v6315_v26 }
 0xafe   :  { %v4616_v57 = vpop.eup %4615  ;;  %v2468_v48 = vmul.f32 %v4614_v0, %v6293_v23 }
 0xaff   :  { %v4618_v17 = vpop.eup %4617  ;;  %v2469_v19 = vmul.f32 %v4616_v57, %v6296_v40 }
 0xb00   :  { %v4620_v14 = vpop.eup %4619  ;;  %v2470_v33 = vmul.f32 %v4618_v17, %v6299_v59  ;;  %v2476_v10 = vpack.c.bf16 %v2468_v48, %v2468_v48  ;;  %v2481_v48 = vpack.c.bf16 %v2473_v6, %v2473_v6 }
 0xb01   :  { %v4622_v20 = vpop.eup %4621  ;;  %v2471_v43 = vmul.f32 %v4620_v14, %v6303_v15  ;;  %v2477_v55 = vpack.c.bf16 %v2469_v19, %v2469_v19 }
 0xb02   :  { %v4624_v22 = vpop.eup %4623  ;;  %v2472_v41 = vmul.f32 %v4622_v20, %v6307_v52  ;;  %v2478_v60 = vpack.c.bf16 %v2470_v33, %v2470_v33  ;;  %v2492_v50 = vunpack.c.l.b16 %v2476_v10  ;;  %v6324_v33 = vrot.slane %v6250_v24, 7 }
 0xb03   :  { %v2474_v5 = vmul.f32 %v4624_v22, %v6311_v63  ;;  %v2479_v61 = vpack.c.bf16 %v2471_v43, %v2471_v43  ;;  %v2493_v34 = vunpack.c.l.b16 %v2477_v55  ;;  %v4626_v3 = vpop.eup %4625  ;;  %v2497_v55 = vunpack.c.l.b16 %v2481_v48 }
 0xb04   :  { %v2480_v45 = vpack.c.bf16 %v2472_v41, %v2472_v41  ;;  %v2494_v1 = vunpack.c.l.b16 %v2478_v60  ;;  %v2500_v54 = vrot.slane %v2492_v50, 5  ;;  %v2475_v43 = vmul.f32 %v4626_v3, %v6324_v33 }
 0xb05   :  { %v2495_v56 = vunpack.c.l.b16 %v2479_v61  ;;  %v2501_v12 = vrot.slane %v2493_v34, 4  ;;  %v2482_v44 = vpack.c.bf16 %v2474_v5, %v2474_v5  ;;  %v2311_v24 = vrot.slane %v6282_v18, 7 }
 0xb06   :  { %v2496_v11 = vunpack.c.l.b16 %v2480_v45  ;;  %v2503_v0 = vrot.slane %v2494_v1, 3  ;;  %v2483_v22 = vpack.c.bf16 %v2475_v43, %v2475_v43  ;;  %v7178_v45 = vld [vmem:[#allocation15_spill] sm:$0xff]  ;;  %v2313_v1 = vrot.slane %v6282_v18, 1 }
 0xb07   :  { %v2502_v58 = vsel %vm441_vm1, %v2501_v12, %v2500_v54  ;;  %v2505_v57 = vrot.slane %v2495_v56, 2  ;;  %v2498_v10 = vunpack.c.l.b16 %v2482_v44  ;;  %v7179_v54 = vld [vmem:[#allocation17_spill] sm:$0xff]  ;;  %v2315_v12 = vrot.slane %v6282_v18, 2 }
 0xb08   :  { %v2504_v17 = vsel %vm444_vm2, %v2503_v0, %v2502_v58  ;;  %v2507_v14 = vrot.slane %v2496_v11, 1  ;;  %v2499_v50 = vunpack.c.l.b16 %v2483_v22  ;;  %v7180_v11 = vld [vmem:[#allocation19_spill] sm:$0xff]  ;;  %v7181_v58 = vld [vmem:[#allocation18_spill] sm:$0xff] }
 0xb09   :  { %v2506_v19 = vsel %vm447_vm3, %v2505_v57, %v2504_v17  ;;  %v2510_v60 = vrot.slane %v2498_v10, 7  ;;  %v2343_v0 = vadd.f32 %v6282_v18, %v7180_v11  ;;  %v2341_v57 = vadd.f32 %v2311_v24, %v7181_v58  ;;  %v7182_v17 = vld [vmem:[#allocation20_spill] sm:$0xff]  ;;  %v7183_v10 = vld [vmem:[#allocation21_spill] sm:$0xff] }
 0xb0a   :  { %v2508_v20 = vsel %vm450_vm4, %v2507_v14, %v2506_v19  ;;  %v2512_v61 = vrot.slane %v2499_v50, 6  ;;  %v2345_v19 = vadd.f32 %v2313_v1, %v7182_v17 }
 0xb0b   :  { %v2509_v41 = vsel %vm453_vm5, %v2497_v55, %v2508_v20  ;;  %v2347_v20 = vadd.f32 %v2315_v12, %v7183_v10  ;;  %v3817_v43 = vmul.f32 -1.442695, %v2343_v0  ;;  %v3815_v55 = vmul.f32 -1.442695, %v2341_v57 }
 0xb0c   :  { %v2511_v5 = vsel %vm456_vm6, %v2510_v60, %v2509_v41  ;;  %v3819_v22 = vmul.f32 -1.442695, %v2345_v19 }
 0xb0d   :  { %v2513_v34 = vsel %vm459_vm7, %v2512_v61, %v2511_v5  ;;  %v3821_v41 = vmul.f32 -1.442695, %v2347_v20 }
 0xb0e   :  { %v2514_v6 = vpack.c.b16 %v2513_v34, %v2513_v34 }
 0xb10   :  { %4083 = vmatmul.mubr.bf16.vlgmr.msra.gmra.mrb[24].mxu1 %v2514_v6 }
 0xb11   :  { %4087 = vmatpush3.bf16.msra.mxu1 %v6139_v30  ;;  %4102 = vmatprep.mubr.msk.bf16.mxu1 %vm4909_vm0, %v7084_v27  ;;  %v2303_v30 = vrot.slane %v6282_v18, 3 }
 0xb12   :  { %4088 = vmatprep.subr.bf16.mxu1 %v7084_v27 }
 0xb15   :  { %4089 = vmatpush3.bf16.msra.mxu1 %v6148_v53  ;;  %v2305_v53 = vrot.slane %v6282_v18, 4 }
 0xb16   :  { %4090 = vmatprep.subr.bf16.mxu1 %v7084_v27 }
 0xb19   :  { %4091 = vmatpush3.bf16.msra.mxu1 %v6155_v28  ;;  %v2307_v28 = vrot.slane %v6282_v18, 5 }
 0xb1a   :  { %4092 = vmatprep.subr.bf16.mxu1 %v7084_v27 }
 0xb1d   :  { %4093 = vmatpush3.bf16.msra.mxu1 %v6162_v21  ;;  %v2309_v21 = vrot.slane %v6282_v18, 6 }
 0xb1e   :  { %4094 = vmatprep.subr.bf16.mxu1 %v7084_v27 }
 0xb1f   :  { %v2339_v56 = vadd.f32 %v2309_v21, %v7179_v54 }
 0xb21   :  { %4095 = vmatpush3.bf16.msra.mxu1 %v6169_v4  ;;  %v7177_v4 = vld [vmem:[#allocation22_spill] sm:$0xff]  ;;  %v3813_v3 = vmul.f32 -1.442695, %v2339_v56 }
 0xb22   :  { %4096 = vmatprep.subr.bf16.mxu1 %v7084_v27 }
 0xb25   :  { %4097 = vmatpush3.bf16.msra.mxu1 %v6176_v42  ;;  %v2333_v42 = vadd.f32 %v2303_v30, %v7177_v4 }
 0xb26   :  { %4098 = vmatprep.subr.bf16.mxu1 %v7084_v27 }
 0xb27   :  { %v3807_v44 = vmul.f32 -1.442695, %v2333_v42 }
 0xb29   :  { %4099 = vmatpush3.bf16.msra.mxu1 %v6183_v13  ;;  %v2335_v13 = vadd.f32 %v2305_v53, %v7178_v45  ;;  %4627 = vpow2.f32 %v3807_v44 }
 0xb2a   :  { %4100 = vmatprep.subr.bf16.mxu1 %v7084_v27 }
 0xb2b   :  { %v3809_v48 = vmul.f32 -1.442695, %v2335_v13 }
 0xb2d   :  { %4101 = vmatpush3.bf16.msra.mxu1 %v6190_v46  ;;  %v2337_v46 = vadd.f32 %v2307_v28, %v7137_v25  ;;  %4629 = vpow2.f32 %v3809_v48 }
 0xb2e   :  { %4106 = vmatprep.subr.bf16.mxu1 %v7084_v27 }
 0xb2f   :  { %v3811_v14 = vmul.f32 -1.442695, %v2337_v46 }
 0xb31   :  { %4631 = vpow2.f32 %v3811_v14 }
 0xb32   :  { %4633 = vpow2.f32 %v3813_v3  ;;  %v7184_v3 = vld [vmem:[#allocation28_spill] sm:$0xff] }
 0xb33   :  { %4635 = vpow2.f32 %v3817_v43  ;;  %v4628_v18 = vpop.eup %4627 }
 0xb34   :  { %4637 = vpow2.f32 %v3815_v55  ;;  %v2397_v61 = vadd.f32 1.0, %v4628_v18  ;;  %v7186_v18 = vld [vmem:[#allocation24_spill] sm:$0xff] }
 0xb35   :  { %4639 = vpow2.f32 %v3819_v22  ;;  %v7185_v22 = vld [vmem:[#allocation23_spill] sm:$0xff] }
 0xb36   :  { %4641 = vpow2.f32 %v3821_v41 }
 0xb37   :  { %v4630_v60 = vpop.eup %4629  ;;  %4643 = vrcp.f32 %v2397_v61 }
 0xb38   :  { %v2399_v6 = vadd.f32 1.0, %v4630_v60 }
 0xb3a   :  { %4645 = vrcp.f32 %v2399_v6  ;;  %v7188_v6 = vld [vmem:[#allocation26_spill] sm:$0xff] }
 0xb3b   :  { %v4632_v50 = vpop.eup %4631 }
 0xb3c   :  { %v4634_v5 = vpop.eup %4633  ;;  %v2401_v53 = vadd.f32 1.0, %v4632_v50  ;;  %v7187_v50 = vld [vmem:[#allocation25_spill] sm:$0xff] }
 0xb3d   :  { %v4636_v34 = vpop.eup %4635  ;;  %v2403_v21 = vadd.f32 1.0, %v4634_v5 }
 0xb3e   :  { %v4638_v30 = vpop.eup %4637  ;;  %v2407_v42 = vadd.f32 1.0, %v4636_v34  ;;  %4647 = vrcp.f32 %v2401_v53 }
 0xb3f   :  { %v4640_v28 = vpop.eup %4639  ;;  %v2405_v13 = vadd.f32 1.0, %v4638_v30  ;;  %4649 = vrcp.f32 %v2403_v21 }
 0xb40   :  { %v4642_v24 = vpop.eup %4641  ;;  %v2409_v1 = vadd.f32 1.0, %v4640_v28  ;;  %4651 = vrcp.f32 %v2407_v42  ;;  %v7189_v28 = vld [vmem:[#allocation27_spill] sm:$0xff] }
 0xb41   :  { %v2411_v46 = vadd.f32 1.0, %v4642_v24  ;;  %4653 = vrcp.f32 %v2405_v13  ;;  %v4644_v34 = vpop.eup %4643  ;;  %v7190_v24 = vld [vmem:[#allocation29_spill] sm:$0xff] }
 0xb42   :  { %4655 = vrcp.f32 %v2409_v1 }
 0xb43   :  { %4657 = vrcp.f32 %v2411_v46  ;;  %v7191_v46 = vld [vmem:[#allocation30_spill] sm:$0xff] }
 0xb44   :  { %v4646_v53 = vpop.eup %4645 }
 0xb48   :  { %v4648_v42 = vpop.eup %4647 }
 0xb49   :  { %v4650_v1 = vpop.eup %4649 }
 0xbe3   :  { %v2550_v56 = vpop.f32.mrb[24].mxu1 }
 0xbe4   :  { %v2557_v12 = vrot.slane %v2550_v56, 3  ;;  %v2558_v0 = vrot.slane %v2550_v56, 4  ;;  %v2559_v44 = vrot.slane %v2550_v56, 5  ;;  %v2560_v57 = vrot.slane %v2550_v56, 6  ;;  %v4084_v48 = vpop.f32.mrb[25].mxu1 }
 0xbe5   :  { %v2561_v19 = vrot.slane %v2550_v56, 7  ;;  %v2562_v14 = vrot.slane %v2550_v56, 1  ;;  %v2577_v20 = vadd.f32 %v7184_v3, %v2550_v56  ;;  %v2553_v43 = vpop.f32.mrb[26].mxu1  ;;  %v2563_v55 = vrot.slane %v2550_v56, 2 }
 0xbe6   :  { %v2572_v41 = vadd.f32 %v7185_v22, %v2557_v12  ;;  %v2573_v60 = vadd.f32 %v7186_v18, %v2558_v0  ;;  %v2574_v5 = vadd.f32 %v7187_v50, %v2559_v44  ;;  %v4085_v61 = vpop.f32.mrb[27].mxu1  ;;  %v2575_v30 = vadd.f32 %v7188_v6, %v2560_v57  ;;  %v4652_v12 = vpop.eup %4651 }
 0xbe7   :  { %4659 = vtanh.f32 %v2577_v20  ;;  %v2576_v21 = vadd.f32 %v7189_v28, %v2561_v19  ;;  %v2578_v13 = vadd.f32 %v7190_v24, %v2562_v14  ;;  %v2579_v56 = vadd.f32 %v7191_v46, %v2563_v55  ;;  %v4654_v0 = vpop.eup %4653 }
 0xbe8   :  { %4661 = vtanh.f32 %v2572_v41  ;;  %v4656_v44 = vpop.eup %4655  ;;  %v2593_v57 = vsub.f32 1.0, %v4652_v12  ;;  %v2588_v20 = vsub.f32 1.0, %v4644_v34  ;;  %v2589_v19 = vsub.f32 1.0, %v4646_v53 }
 0xbe9   :  { %4663 = vtanh.f32 %v2573_v60  ;;  %v4658_v48 = vpop.eup %4657  ;;  %v2590_v41 = vsub.f32 1.0, %v4648_v42  ;;  %v2591_v14 = vsub.f32 1.0, %v4650_v1  ;;  %v2592_v60 = vsub.f32 1.0, %v4654_v0 }
 0xbea   :  { %4665 = vtanh.f32 %v2574_v5  ;;  %v2601_v9 = vmul.f32 %v2593_v57, %v6315_v26  ;;  %v2594_v16 = vsub.f32 1.0, %v4656_v44 }
 0xbeb   :  { %4667 = vtanh.f32 %v2575_v30  ;;  %v2596_v30 = vmul.f32 %v2588_v20, %v6293_v23  ;;  %v2598_v7 = vmul.f32 %v2590_v41, %v6299_v59 }
 0xbec   :  { %4669 = vtanh.f32 %v2576_v21 }
 0xbed   :  { %4671 = vtanh.f32 %v2578_v13  ;;  %v2595_v13 = vsub.f32 1.0, %v4658_v48 }
 0xbee   :  { %4673 = vtanh.f32 %v2579_v56  ;;  %v2597_v56 = vmul.f32 %v2589_v19, %v6296_v40  ;;  %v2602_v19 = vmul.f32 %v2594_v16, %v6311_v63 }
 0xbf1   :  { %v4660_v43 = vpop.eup %4659 }
 0xbf2   :  { %v4662_v61 = vpop.eup %4661  ;;  %v2609_v55 = vmul.f32 %v4660_v43, %v4652_v12  ;;  %v2599_v12 = vmul.f32 %v2591_v14, %v6303_v15  ;;  %v2600_v43 = vmul.f32 %v2592_v60, %v6307_v52 }
 0xbf3   :  { %v4664_v5 = vpop.eup %4663  ;;  %v2604_v21 = vmul.f32 %v4662_v61, %v4644_v34 }
 0xbf4   :  { %v4666_v51 = vpop.eup %4665  ;;  %v2605_v2 = vmul.f32 %v4664_v5, %v4646_v53  ;;  %v6376_v35 = vadd.f32 %v2609_v55, %v2601_v9 }
 0xbf5   :  { %v4668_v29 = vpop.eup %4667  ;;  %v2606_v8 = vmul.f32 %v4666_v51, %v4648_v42  ;;  %v6379_v46 = vadd.f32 %v2604_v21, %v2596_v30  ;;  %v2603_v42 = vmul.f32 %v2595_v13, %v6324_v33 }
 0xbf6   :  { %v4670_v57 = vpop.eup %4669  ;;  %v2607_v20 = vmul.f32 %v4668_v29, %v4650_v1  ;;  %v6383_v34 = vadd.f32 %v2605_v2, %v2597_v56 }
 0xbf7   :  { %v4672_v61 = vpop.eup %4671  ;;  %v2608_v53 = vmul.f32 %v4670_v57, %v4654_v0  ;;  %v6386_v9 = vadd.f32 %v2606_v8, %v2598_v7  ;;  %v2620_v41 = vpack.c.bf16 %v6379_v46, %v6379_v46 }
 0xbf8   :  { %v4674_v51 = vpop.eup %4673  ;;  %v2610_v55 = vmul.f32 %v4672_v61, %v4656_v44  ;;  %v6391_v5 = vadd.f32 %v2607_v20, %v2599_v12  ;;  %v2621_v29 = vpack.c.bf16 %v6383_v34, %v6383_v34 }
 0xbf9   :  { %v2611_v2 = vmul.f32 %v4674_v51, %v4658_v48  ;;  %v6395_v1 = vadd.f32 %v2608_v53, %v2600_v43  ;;  %v2622_v16 = vpack.c.bf16 %v6386_v9, %v6386_v9  ;;  %v2636_v8 = vunpack.c.l.b16 %v2620_v41 }
 0xbfa   :  { %v6399_v7 = vadd.f32 %v2610_v55, %v2602_v19  ;;  %v2623_v0 = vpack.c.bf16 %v6391_v5, %v6391_v5  ;;  %v2637_v14 = vunpack.c.l.b16 %v2621_v29  ;;  %v2625_v48 = vpack.c.bf16 %v6376_v35, %v6376_v35 }
 0xbfb   :  { %v6403_v60 = vadd.f32 %v2611_v2, %v2603_v42  ;;  %v2624_v44 = vpack.c.bf16 %v6395_v1, %v6395_v1  ;;  %v2638_v30 = vunpack.c.l.b16 %v2622_v16  ;;  %v2644_v21 = vrot.slane %v2636_v8, 5 }
 0xbfc   :  { %v2626_v13 = vpack.c.bf16 %v6399_v7, %v6399_v7  ;;  %v2639_v56 = vunpack.c.l.b16 %v2623_v0  ;;  %v2645_v57 = vrot.slane %v2637_v14, 4  ;;  %v2641_v55 = vunpack.c.l.b16 %v2625_v48  ;;  %v4884_v48 = vld [vmem:[%s6886_s3 + $0x14] ss:$8 sps:$4 sm:$0xff]  }
 0xbfd   :  { %v2627_v12 = vpack.c.bf16 %v6403_v60, %v6403_v60  ;;  %v2640_v43 = vunpack.c.l.b16 %v2624_v44  ;;  %v2647_v20 = vrot.slane %v2638_v30, 3 }
 0xbfe   :  { %v2642_v61 = vunpack.c.l.b16 %v2626_v13  ;;  %v2646_v19 = vsel %vm441_vm1, %v2645_v57, %v2644_v21  ;;  %v2649_v53 = vrot.slane %v2639_v56, 2  ;;  %v4883_v21 = vld [vmem:[%s6886_s3] ss:$8 sps:$4 sm:$0xff]   ;;  %v4885_v13 = vld [vmem:[%s6886_s3 + $0x10] ss:$8 sps:$4 sm:$0xff]  }
 0xbff   :  { %v2643_v41 = vunpack.c.l.b16 %v2627_v12  ;;  %v2648_v51 = vsel %vm444_vm2, %v2647_v20, %v2646_v19  ;;  %v2651_v42 = vrot.slane %v2640_v43, 1  ;;  %v4886_v56 = vld [vmem:[%s6886_s3 + $0x24] ss:$8 sps:$4 sm:$0xff]   ;;  %v4887_v57 = vld [vmem:[%s6886_s3 + $0x20] ss:$8 sps:$4 sm:$0xff]  }
 0xc00   :  { %v2650_v29 = vsel %vm447_vm3, %v2649_v53, %v2648_v51  ;;  %v2654_v16 = vrot.slane %v2642_v61, 7  ;;  %v4889_v12 = vld [vmem:[%s6886_s3 + $0x30] ss:$8 sps:$4 sm:$0xff]   ;;  %v4890_v43 = vld [vmem:[%s6886_s3 + $0x44] ss:$8 sps:$4 sm:$0xff]  }
 0xc01   :  { %v2652_v2 = vsel %vm450_vm4, %v2651_v42, %v2650_v29  ;;  %v2656_v0 = vrot.slane %v2643_v41, 6  ;;  %v4891_v20 = vld [vmem:[%s6886_s3 + $0x40] ss:$8 sps:$4 sm:$0xff]   ;;  %v4892_v61 = vld [vmem:[%s6886_s3 + $0x54] ss:$8 sps:$4 sm:$0xff]  }
 0xc02   :  { %v2653_v8 = vsel %vm453_vm5, %v2641_v55, %v2652_v2  ;;  %v4893_v19 = vld [vmem:[%s6886_s3 + $0x50] ss:$8 sps:$4 sm:$0xff]   ;;  %v4894_v53 = vld [vmem:[%s6886_s3 + $0x64] ss:$8 sps:$4 sm:$0xff]   ;;  %v4895_v41 = vld [vmem:[%s6886_s3 + $0x60] ss:$8 sps:$4 sm:$0xff]  }
 0xc03   :  { %v2655_v14 = vsel %vm456_vm6, %v2654_v16, %v2653_v8  ;;  %v4896_v51 = vld [vmem:[%s6886_s3 + $0x74] ss:$8 sps:$4 sm:$0xff]   ;;  %v4897_v42 = vld [vmem:[%s6886_s3 + $0x70] ss:$8 sps:$4 sm:$0xff]  }
 0xc04   :  { %v2657_v44 = vsel %vm459_vm7, %v2656_v0, %v2655_v14 }
 0xc05   :  { %v2658_v30 = vpack.c.b16 %v2657_v44, %v2657_v44 }
 0xc07   :  { %2693 = vmatmul.mubr.bf16.vlgmr.msra.gmra.mrb[20].mxu0 %v2658_v30 }
 0xc08   :  { %3062 = vmatpush1.bf16.msra.mxu0 %v4883_v21  ;;  %3093 = vmatprep.mubr.bf16.mxu0 %v7074_v32  ;;  %v4888_v32 = vld [vmem:[%s6886_s3 + $0x34] ss:$8 sps:$4 sm:$0xff]  }
 0xc09   :  { %3063 = vmatprep.subr.bf16.mxu0 %v4884_v48 }
 0xc0c   :  { %3064 = vmatpush1.bf16.msra.mxu0 %v4885_v13 }
 0xc0d   :  { %3065 = vmatprep.subr.bf16.mxu0 %v4886_v56 }
 0xc10   :  { %3066 = vmatpush1.bf16.msra.mxu0 %v4887_v57 }
 0xc11   :  { %3067 = vmatprep.subr.bf16.mxu0 %v4888_v32 }
 0xc14   :  { %3068 = vmatpush1.bf16.msra.mxu0 %v4889_v12 }
 0xc15   :  { %3069 = vmatprep.subr.bf16.mxu0 %v4890_v43 }
 0xc18   :  { %3070 = vmatpush1.bf16.msra.mxu0 %v4891_v20 }
 0xc19   :  { %3071 = vmatprep.subr.bf16.mxu0 %v4892_v61 }
 0xc1c   :  { %3072 = vmatpush1.bf16.msra.mxu0 %v4893_v19 }
 0xc1d   :  { %3073 = vmatprep.subr.bf16.mxu0 %v4894_v53 }
 0xc20   :  { %3074 = vmatpush1.bf16.msra.mxu0 %v4895_v41 }
 0xc21   :  { %3075 = vmatprep.subr.bf16.mxu0 %v4896_v51 }
 0xc24   :  { %3076 = vmatpush1.bf16.msra.mxu0 %v4897_v42 }
 0xcda   :  { %v2694_v55 = vpop.f32.mrb[20].mxu0 }
 0xcdb   :  { %v2703_v29 = vrot.slane %v2694_v55, 2  ;;  %v2705_v2 = vrot.slane %v2694_v55, 3  ;;  %v2707_v16 = vrot.slane %v2694_v55, 4  ;;  %v2709_v8 = vrot.slane %v2694_v55, 5  ;;  %v6466_v0 = vpop.f32.mrb[21].mxu0 }
 0xcdc   :  { %v2711_v14 = vrot.slane %v2694_v55, 6  ;;  %v2713_v44 = vrot.slane %v2694_v55, 7  ;;  %v2745_v30 = vadd.f32 %v2694_v55, %v7175_v62  ;;  %v2698_v21 = vpop.f32.mrb[22].mxu0  ;;  %v2715_v12 = vrot.slane %v2694_v55, 1 }
 0xcdd   :  { %v2733_v48 = vadd.f32 %v2703_v29, %v5162_v36  ;;  %v2735_v13 = vadd.f32 %v2705_v2, %v5164_v37  ;;  %v2737_v56 = vadd.f32 %v2707_v16, %v5166_v38  ;;  %v2739_v57 = vadd.f32 %v2709_v8, %v5168_v39  ;;  %v2699_v32 = vpop.f32.mrb[23].mxu0 }
 0xcde   :  { %v2741_v43 = vadd.f32 %v2711_v14, %v7174_v49  ;;  %v2743_v20 = vadd.f32 %v2713_v44, %v7124_v31  ;;  %v3834_v61 = vmul.f32 -1.442695, %v2745_v30  ;;  %v2747_v2 = vadd.f32 %v2715_v12, %v7176_v47 }
 0xcdf   :  { %v3822_v19 = vmul.f32 -1.442695, %v2733_v48  ;;  %v3824_v53 = vmul.f32 -1.442695, %v2735_v13  ;;  %v3826_v41 = vmul.f32 -1.442695, %v2737_v56 }
 0xce0   :  { %v3828_v51 = vmul.f32 -1.442695, %v2739_v57  ;;  %4675 = vpow2.f32 %v3834_v61  ;;  %v3830_v42 = vmul.f32 -1.442695, %v2741_v43  ;;  %v3832_v29 = vmul.f32 -1.442695, %v2743_v20 }
 0xce1   :  { %4677 = vpow2.f32 %v3822_v19  ;;  %v3836_v55 = vmul.f32 -1.442695, %v2747_v2  ;;  %v6477_v19 = vrot.slane %v6379_v46, 7  ;;  %v6491_v46 = vrot.slane %v6395_v1, 7 }
 0xce2   :  { %4679 = vpow2.f32 %v3824_v53 }
 0xce3   :  { %4681 = vpow2.f32 %v3826_v41  ;;  %v6480_v41 = vrot.slane %v6383_v34, 7 }
 0xce4   :  { %4683 = vpow2.f32 %v3828_v51 }
 0xce5   :  { %4685 = vpow2.f32 %v3830_v42 }
 0xce6   :  { %4687 = vpow2.f32 %v3832_v29  ;;  %v6483_v29 = vrot.slane %v6386_v9, 7 }
 0xce7   :  { %4689 = vpow2.f32 %v3836_v55 }
 0xcea   :  { %v4676_v16 = vpop.eup %4675 }
 0xceb   :  { %v4678_v8 = vpop.eup %4677  ;;  %v2809_v20 = vadd.f32 1.0, %v4676_v16  ;;  %v6487_v16 = vrot.slane %v6391_v5, 7 }
 0xcec   :  { %v4680_v14 = vpop.eup %4679  ;;  %v2797_v44 = vadd.f32 1.0, %v4678_v8 }
 0xced   :  { %v4682_v30 = vpop.eup %4681  ;;  %v2799_v21 = vadd.f32 1.0, %v4680_v14 }
 0xcee   :  { %v4684_v48 = vpop.eup %4683  ;;  %v2801_v13 = vadd.f32 1.0, %v4682_v30  ;;  %4691 = vrcp.f32 %v2797_v44 }
 0xcef   :  { %v4686_v56 = vpop.eup %4685  ;;  %v2803_v57 = vadd.f32 1.0, %v4684_v48  ;;  %4693 = vrcp.f32 %v2799_v21  ;;  %v6495_v21 = vrot.slane %v6376_v35, 7  ;;  %v6501_v35 = vrot.slane %v6399_v7, 7 }
 0xcf0   :  { %v4688_v32 = vpop.eup %4687  ;;  %v2805_v12 = vadd.f32 1.0, %v4686_v56  ;;  %4695 = vrcp.f32 %v2801_v13 }
 0xcf1   :  { %v2807_v43 = vadd.f32 1.0, %v4688_v32  ;;  %4697 = vrcp.f32 %v2803_v57  ;;  %v4690_v61 = vpop.eup %4689 }
 0xcf2   :  { %4699 = vrcp.f32 %v2805_v12  ;;  %v2811_v51 = vadd.f32 1.0, %v4690_v61 }
 0xcf3   :  { %4701 = vrcp.f32 %v2807_v43 }
 0xcf4   :  { %4703 = vrcp.f32 %v2809_v20 }
 0xcf5   :  { %4705 = vrcp.f32 %v2811_v51 }
 0xcf8   :  { %v4692_v53 = vpop.eup %4691 }
 0xcf9   :  { %v4694_v42 = vpop.eup %4693  ;;  %v2869_v2 = vmul.f32 %v4692_v53, %v6477_v19 }
 0xcfa   :  { %v4696_v55 = vpop.eup %4695  ;;  %v2870_v8 = vmul.f32 %v4694_v42, %v6480_v41 }
 0xcfb   :  { %v4698_v14 = vpop.eup %4697  ;;  %v2871_v34 = vmul.f32 %v4696_v55, %v6483_v29  ;;  %v2877_v44 = vpack.c.bf16 %v2869_v2, %v2869_v2 }
 0xcfc   :  { %v4700_v30 = vpop.eup %4699  ;;  %v2872_v9 = vmul.f32 %v4698_v14, %v6487_v16  ;;  %v2878_v48 = vpack.c.bf16 %v2870_v8, %v2870_v8 }
 0xcfd   :  { %v4702_v13 = vpop.eup %4701  ;;  %v2873_v5 = vmul.f32 %v4700_v30, %v6491_v46  ;;  %v2879_v56 = vpack.c.bf16 %v2871_v34, %v2871_v34  ;;  %v2893_v57 = vunpack.c.l.b16 %v2877_v44 }
 0xcfe   :  { %v2874_v32 = vmul.f32 %v4702_v13, %v6495_v21  ;;  %v2880_v1 = vpack.c.bf16 %v2872_v9, %v2872_v9  ;;  %v2894_v12 = vunpack.c.l.b16 %v2878_v48  ;;  %v4704_v43 = vpop.eup %4703 }
 0xcff   :  { %v2881_v20 = vpack.c.bf16 %v2873_v5, %v2873_v5  ;;  %v2895_v61 = vunpack.c.l.b16 %v2879_v56  ;;  %v2901_v53 = vrot.slane %v2893_v57, 6  ;;  %v2875_v14 = vmul.f32 %v4704_v43, %v6501_v35  ;;  %v4706_v7 = vpop.eup %4705 }
 0xd00   :  { %v2882_v51 = vpack.c.bf16 %v2874_v32, %v2874_v32  ;;  %v2896_v42 = vunpack.c.l.b16 %v2880_v1  ;;  %v2902_v2 = vrot.slane %v2894_v12, 5  ;;  %v6508_v5 = vrot.slane %v6403_v60, 7  ;;  %v4898_v60 = vld [vmem:[%s6888_s4] sm:$0xff]  }
 0xd01   :  { %v2897_v55 = vunpack.c.l.b16 %v2881_v20  ;;  %v2904_v8 = vrot.slane %v2895_v61, 4  ;;  %v2883_v56 = vpack.c.bf16 %v2875_v14, %v2875_v14  ;;  %v4901_v14 = vld [vmem:[%s6888_s4 + $0x18] sm:$0xff]  }
 0xd02   :  { %v2903_v34 = vsel %vm441_vm1, %v2902_v2, %v2901_v53  ;;  %v2906_v44 = vrot.slane %v2896_v42, 3  ;;  %v2898_v30 = vunpack.c.l.b16 %v2882_v51  ;;  %v2876_v32 = vmul.f32 %v4706_v7, %v6508_v5 }
 0xd03   :  { %v2905_v9 = vsel %vm444_vm2, %v2904_v8, %v2903_v34  ;;  %v2908_v13 = vrot.slane %v2897_v55, 2  ;;  %v2899_v20 = vunpack.c.l.b16 %v2883_v56  ;;  %v4899_v55 = vld [vmem:[%s6888_s4 + $0x8] sm:$0xff]   ;;  %v4900_v8 = vld [vmem:[%s6888_s4 + $0x10] sm:$0xff]   ;;  %v4902_v34 = vld [vmem:[%s6888_s4 + $0x20] sm:$0xff]   ;;  %v2706_v7 = vrot.slane %v6466_v0, 3 }
 0xd04   :  { %v2907_v48 = vsel %vm447_vm3, %v2906_v44, %v2905_v9  ;;  %v2910_v1 = vrot.slane %v2898_v30, 1  ;;  %v2884_v12 = vpack.c.bf16 %v2876_v32, %v2876_v32  ;;  %v4903_v44 = vld [vmem:[%s6888_s4 + $0x28] sm:$0xff]   ;;  %v4904_v30 = vld [vmem:[%s6888_s4 + $0x30] sm:$0xff]   ;;  %v4905_v9 = vld [vmem:[%s6888_s4 + $0x38] sm:$0xff]   ;;  %v2708_v56 = vrot.slane %v6466_v0, 4 }
 0xd05   :  { %v2909_v57 = vsel %vm450_vm4, %v2908_v13, %v2907_v48  ;;  %v6551_v48 = vld [vmem:[%s6891_s5] sm:$0xff]   ;;  %v2704_v13 = vrot.slane %v6466_v0, 2  ;;  %v2712_v32 = vrot.slane %v6466_v0, 6 }
 0xd06   :  { %v2911_v43 = vsel %vm453_vm5, %v2910_v1, %v2909_v57  ;;  %v2900_v61 = vunpack.c.l.b16 %v2884_v12  ;;  %4126 = vmatprep.subr.bf16.mxu0 %v6551_v48  ;;  %v2736_v1 = vadd.f32 %v2706_v7, %v7178_v45  ;;  %v2714_v12 = vrot.slane %v6466_v0, 7 }
 0xd07   :  { %v2912_v53 = vsel %vm456_vm6, %v2899_v20, %v2911_v43  ;;  %v2734_v57 = vadd.f32 %v2704_v13, %v7177_v4  ;;  %v2738_v43 = vadd.f32 %v2708_v56, %v7137_v25  ;;  %v4910_v7 = vmov 1966171168  }
 0xd08   :  { %v2913_v51 = vrot.slane %v2900_v61, 7  ;;  %v2716_v61 = vrot.slane %v6466_v0, 1  ;;  %v3449_v56 = vunpack.c.l.s4 %v4910_v7 }
 0xd0a   :  { %v2914_v42 = vsel %vm459_vm7, %v2913_v51, %v2912_v53  ;;  %v2746_v53 = vadd.f32 %v6466_v0, %v7182_v17  ;;  %v3823_v51 = vmul.f32 -1.442695, %v2734_v57 }
 0xd0b   :  { %v2915_v2 = vpack.c.b16 %v2914_v42, %v2914_v42  ;;  %v2742_v42 = vadd.f32 %v2712_v32, %v7181_v58 }
 0xd0c   :  { %4707 = vpow2.f32 %v3823_v51 }
 0xd0d   :  { %4103 = vmatmul.mubr.bf16.vlgmr.msra.gmra.mrb[28].mxu1 %v2915_v2  ;;  %v3825_v2 = vmul.f32 -1.442695, %v2736_v1 }
 0xd0e   :  { %4107 = vmatpush3.bf16.msra.mxu1 %v4898_v60  ;;  %4122 = vmatprep.mubr.msk.bf16.mxu1 %vm4909_vm0, %v7084_v27  ;;  %v2744_v60 = vadd.f32 %v2714_v12, %v7180_v11 }
 0xd0f   :  { %4108 = vmatprep.subr.bf16.mxu1 %v7084_v27  ;;  %4709 = vpow2.f32 %v3825_v2 }
 0xd12   :  { %4109 = vmatpush3.bf16.msra.mxu1 %v4899_v55  ;;  %v3827_v55 = vmul.f32 -1.442695, %v2738_v43 }
 0xd13   :  { %4110 = vmatprep.subr.bf16.mxu1 %v7084_v27 }
 0xd14   :  { %4711 = vpow2.f32 %v3827_v55 }
 0xd16   :  { %4111 = vmatpush3.bf16.msra.mxu1 %v4900_v8 }
 0xd17   :  { %4112 = vmatprep.subr.bf16.mxu1 %v7084_v27 }
 0xd1a   :  { %4113 = vmatpush3.bf16.msra.mxu1 %v4901_v14  ;;  %v2748_v14 = vadd.f32 %v2716_v61, %v7183_v10  ;;  %v3450_v61 = vunpack.c.0.s8 %v3449_v56 }
 0xd1b   :  { %4114 = vmatprep.subr.bf16.mxu1 %v7084_v27 }
 0xd1e   :  { %4115 = vmatpush3.bf16.msra.mxu1 %v4902_v34  ;;  %v3835_v34 = vmul.f32 -1.442695, %v2746_v53 }
 0xd1f   :  { %4116 = vmatprep.subr.bf16.mxu1 %v7084_v27 }
 0xd22   :  { %4117 = vmatpush3.bf16.msra.mxu1 %v4903_v44  ;;  %v3831_v44 = vmul.f32 -1.442695, %v2742_v42 }
 0xd23   :  { %4118 = vmatprep.subr.bf16.mxu1 %v7084_v27 }
 0xd26   :  { %4119 = vmatpush3.bf16.msra.mxu1 %v4904_v30  ;;  %v3833_v30 = vmul.f32 -1.442695, %v2744_v60 }
 0xd27   :  { %4120 = vmatprep.subr.bf16.mxu1 %v7084_v27  ;;  %v2710_v27 = vrot.slane %v6466_v0, 5  ;;  %v4708_v0 = vpop.eup %4707 }
 0xd28   :  { %v4710_v13 = vpop.eup %4709  ;;  %v2798_v1 = vadd.f32 1.0, %v4708_v0 }
 0xd29   :  { %v2740_v20 = vadd.f32 %v2710_v27, %v7179_v54  ;;  %v3451_v27 = vlaneseq  ;;  %v4712_v57 = vpop.eup %4711  ;;  %v2800_v43 = vadd.f32 1.0, %v4710_v13 }
 0xd2a   :  { %4121 = vmatpush3.bf16.msra.mxu1 %v4905_v9  ;;  %v3837_v9 = vmul.f32 -1.442695, %v2748_v14  ;;  %v2802_v51 = vadd.f32 1.0, %v4712_v57 }
 0xd2b   :  { %v3829_v8 = vmul.f32 -1.442695, %v2740_v20  ;;  %v3452_v53 = vshrl.u32 %v3451_v27, 7 }
 0xd2d   :  { %4713 = vpow2.f32 %v3829_v8  ;;  %v6570_v14 = vsub.s32 %v3450_v61, %v3452_v53 }
 0xd2e   :  { %4715 = vpow2.f32 %v3835_v34 }
 0xd2f   :  { %4717 = vpow2.f32 %v3831_v44 }
 0xd30   :  { %4719 = vpow2.f32 %v3833_v30 }
 0xd31   :  { %4721 = vpow2.f32 %v3837_v9  ;;  %v6572_v9 = vld [vmem:[#allocation2] sm:$0xff] }
 0xd32   :  { %4723 = vrcp.f32 %v2798_v1  ;;  %v3454_v0 = vrot.slane %v6572_v9, %v6570_v14 }
 0xd33   :  { %4725 = vrcp.f32 %v2800_v43 }
 0xd34   :  { %4727 = vrcp.f32 %v2802_v51 }
 0xd37   :  { %v4714_v32 = vpop.eup %4713 }
 0xd38   :  { %v4716_v12 = vpop.eup %4715  ;;  %v2804_v2 = vadd.f32 1.0, %v4714_v32 }
 0xd39   :  { %v4718_v20 = vpop.eup %4717  ;;  %v2810_v60 = vadd.f32 1.0, %v4716_v12 }
 0xd3a   :  { %v4720_v42 = vpop.eup %4719  ;;  %v2806_v8 = vadd.f32 1.0, %v4718_v20  ;;  %4729 = vrcp.f32 %v2804_v2 }
 0xd3b   :  { %v4722_v55 = vpop.eup %4721  ;;  %v2808_v34 = vadd.f32 1.0, %v4720_v42  ;;  %4731 = vrcp.f32 %v2810_v60 }
 0xd3c   :  { %v2812_v44 = vadd.f32 1.0, %v4722_v55  ;;  %4733 = vrcp.f32 %v2806_v8  ;;  %v4724_v2 = vpop.eup %4723 }
 0xd3d   :  { %4735 = vrcp.f32 %v2808_v34  ;;  %v4726_v55 = vpop.eup %4725 }
 0xd3e   :  { %4737 = vrcp.f32 %v2812_v44  ;;  %v4728_v34 = vpop.eup %4727 }
 0xde0   :  { %v2951_v30 = vpop.f32.mrb[28].mxu1 }
 0xde1   :  { %v2958_v13 = vrot.slane %v2951_v30, 2  ;;  %v2959_v7 = vrot.slane %v2951_v30, 3  ;;  %v2960_v56 = vrot.slane %v2951_v30, 4  ;;  %v2961_v27 = vrot.slane %v2951_v30, 5  ;;  %v4104_v57 = vpop.f32.mrb[29].mxu1 }
 0xde2   :  { %v2962_v32 = vrot.slane %v2951_v30, 6  ;;  %v2963_v1 = vrot.slane %v2951_v30, 7  ;;  %v2979_v12 = vadd.f32 %v7190_v24, %v2951_v30  ;;  %v2954_v43 = vpop.f32.mrb[30].mxu1  ;;  %v2964_v20 = vrot.slane %v2951_v30, 1  ;;  %v4730_v57 = vpop.eup %4729  ;;  %v7196_v24 = vld [vmem:[#allocation40_spill] sm:$0xff] }
 0xde3   :  { %v2973_v61 = vadd.f32 %v7185_v22, %v2958_v13  ;;  %v2974_v53 = vadd.f32 %v7186_v18, %v2959_v7  ;;  %v2975_v51 = vadd.f32 %v7187_v50, %v2960_v56  ;;  %v4105_v42 = vpop.f32.mrb[31].mxu1  ;;  %v2976_v60 = vadd.f32 %v7188_v6, %v2961_v27  ;;  %v7192_v13 = vld [vmem:[#allocation30_spill] sm:$0xff]  ;;  %v4732_v7 = vpop.eup %4731  ;;  %v7198_v50 = vld [vmem:[#allocation4_spill] sm:$0xff] }
 0xde4   :  { %4739 = vtanh.f32 %v2979_v12  ;;  %v2977_v8 = vadd.f32 %v7189_v28, %v2962_v32  ;;  %v2978_v44 = vadd.f32 %v7184_v3, %v2963_v1  ;;  %v3462_v30 = vcombine.high %v3454_v0, %v3454_v0  ;;  %v4734_v27 = vpop.eup %4733  ;;  %v7194_v42 = vld [vmem:[#allocation31_spill] sm:$0xff] }
 0xde5   :  { %4741 = vtanh.f32 %v2973_v61  ;;  %v2980_v43 = vadd.f32 %v7192_v13, %v2964_v20  ;;  %v6585_v56 = vrot.slane %v3454_v0, %v6570_v14  ;;  %v4736_v12 = vpop.eup %4735  ;;  %v2995_v1 = vsub.f32 1.0, %v4732_v7  ;;  %v7193_v20 = vld [vmem:[#allocation32_spill] sm:$0xff]  ;;  %v7197_v28 = vld [vmem:[#allocation3_spill] sm:$0xff] }
 0xde6   :  { %4743 = vtanh.f32 %v2974_v53  ;;  %v6588_v32 = vrot.slane %v3462_v30, %v6570_v14  ;;  %v4738_v61 = vpop.eup %4737  ;;  %v2989_v53 = vsub.f32 1.0, %v4724_v2  ;;  %v2991_v3 = vsub.f32 1.0, %v4728_v34 }
 0xde7   :  { %4745 = vtanh.f32 %v2975_v51  ;;  %v3505_v51 = vsel %vm3504_vm8, %v6585_v56, %v7193_v20  ;;  %v2992_v22 = vsub.f32 1.0, %v4730_v57  ;;  %v2993_v13 = vsub.f32 1.0, %v4734_v27 }
 0xde8   :  { %4747 = vtanh.f32 %v2976_v60  ;;  %v3506_v0 = vsel %vm3504_vm8, %v6588_v32, %v7194_v42  ;;  %v2990_v60 = vsub.f32 1.0, %v4726_v55  ;;  %v3003_v42 = vmul.f32 %v2995_v1, %v6501_v35  ;;  %v7199_v1 = vld [vmem:[#allocation53_spill] sm:$0xff] }
 0xde9   :  { %4749 = vtanh.f32 %v2977_v8  ;;  %v7195_v8 = vld [vmem:[#allocation10_spill] sm:$0xff]  ;;  %v3515_v30 = vsel %vm3513_vm9, %v3506_v0, %v7196_v24  ;;  %v2996_v58 = vsub.f32 1.0, %v4738_v61 }
 0xdea   :  { %4751 = vtanh.f32 %v2978_v44  ;;  %v3514_v44 = vsel %vm3513_vm9, %v3505_v51, %v7195_v8  ;;  %v3524_v20 = vsel %vm3522_vm10, %v3515_v30, %v7198_v50  ;;  %v2994_v51 = vsub.f32 1.0, %v4736_v12 }
 0xdeb   :  { %4753 = vtanh.f32 %v2980_v43  ;;  %v3523_v6 = vsel %vm3522_vm10, %v3514_v44, %v7197_v28  ;;  %v2997_v8 = vmul.f32 %v2989_v53, %v6477_v19  ;;  %v2998_v10 = vmul.f32 %v2990_v60, %v6480_v41 }
 0xdec   :  { %v2999_v30 = vmul.f32 %v2991_v3, %v6483_v29  ;;  %v3000_v53 = vmul.f32 %v2992_v22, %v6487_v16 }
 0xdee   :  { %v4740_v43 = vpop.eup %4739 }
 0xdef   :  { %v4742_v18 = vpop.eup %4741  ;;  %v3011_v17 = vmul.f32 %v4740_v43, %v4732_v7  ;;  %v3532_v7 = vsel %vm3531_vm11, %v3523_v6, %v7199_v1 }
 0xdf0   :  { %v4744_v11 = vpop.eup %4743  ;;  %v3005_v24 = vmul.f32 %v4742_v18, %v4724_v2  ;;  %v3001_v18 = vmul.f32 %v2993_v13, %v6491_v46 }
 0xdf1   :  { %v4746_v0 = vpop.eup %4745  ;;  %v3006_v28 = vmul.f32 %v4744_v11, %v4726_v55  ;;  %v6607_v44 = vadd.f32 %v3011_v17, %v3003_v42  ;;  %v3002_v11 = vmul.f32 %v2994_v51, %v6495_v21  ;;  %v7200_v51 = vld [vmem:[#allocation54_spill] sm:$0xff] }
 0xdf2   :  { %v4748_v50 = vpop.eup %4747  ;;  %v3007_v54 = vmul.f32 %v4746_v0, %v4728_v34  ;;  %v3013_v25 = vadd.f32 %v3005_v24, %v2997_v8  ;;  %v3004_v34 = vmul.f32 %v2996_v58, %v6508_v5  ;;  %v3533_v58 = vsel %vm3531_vm11, %v3524_v20, %v7200_v51 }
 0xdf3   :  { %v4750_v43 = vpop.eup %4749  ;;  %v3008_v2 = vmul.f32 %v4748_v50, %v4730_v57  ;;  %v3014_v45 = vadd.f32 %v3006_v28, %v2998_v10  ;;  %v3027_v1 = vpack.c.bf16 %v6607_v44, %v6607_v44 }
 0xdf4   :  { %v4752_v4 = vpop.eup %4751  ;;  %v3009_v17 = vmul.f32 %v4750_v43, %v4734_v27  ;;  %v6615_v55 = vadd.f32 %v3007_v54, %v2999_v30  ;;  %v3021_v60 = vpack.c.bf16 %v3013_v25, %v3013_v25 }
 0xdf5   :  { %v4754_v3 = vpop.eup %4753  ;;  %v3010_v42 = vmul.f32 %v4752_v4, %v4736_v12  ;;  %v6618_v8 = vadd.f32 %v3008_v2, %v3000_v53  ;;  %v3022_v6 = vpack.c.bf16 %v3014_v45, %v3014_v45 }
 0xdf6   :  { %v3012_v24 = vmul.f32 %v4754_v3, %v4738_v61  ;;  %v6620_v22 = vadd.f32 %v3009_v17, %v3001_v18  ;;  %v3023_v10 = vpack.c.bf16 %v6615_v55, %v6615_v55  ;;  %v3037_v57 = vunpack.c.l.b16 %v3021_v60 }
 0xdf7   :  { %v6624_v13 = vadd.f32 %v3010_v42, %v3002_v11  ;;  %v3024_v54 = vpack.c.bf16 %v6618_v8, %v6618_v8  ;;  %v3038_v27 = vunpack.c.l.b16 %v3022_v6  ;;  %v6641_v17 = vrot.slane %v3013_v25, 7 }
 0xdf8   :  { %v6630_v4 = vadd.f32 %v3012_v24, %v3004_v34  ;;  %v3025_v12 = vpack.c.bf16 %v6620_v22, %v6620_v22  ;;  %v3039_v61 = vunpack.c.l.b16 %v3023_v10  ;;  %v3045_v0 = vrot.slane %v3037_v57, 6 }
 0xdf9   :  { %v3026_v28 = vpack.c.bf16 %v6624_v13, %v6624_v13  ;;  %v3040_v50 = vunpack.c.l.b16 %v3024_v54  ;;  %v3046_v30 = vrot.slane %v3038_v27, 5  ;;  %v6644_v42 = vrot.slane %v3014_v45, 7 }
 0xdfa   :  { %v3028_v43 = vpack.c.bf16 %v6630_v4, %v6630_v4  ;;  %v3041_v20 = vunpack.c.l.b16 %v3025_v12  ;;  %v3048_v53 = vrot.slane %v3039_v61, 4  ;;  %v3541_v10 = vsel %vm3540_vm12, %v3532_v7, %v6293_v23 }
 0xdfb   :  { %v3042_v18 = vunpack.c.l.b16 %v3026_v28  ;;  %v3047_v2 = vsel %vm441_vm1, %v3046_v30, %v3045_v0  ;;  %v3050_v11 = vrot.slane %v3040_v50, 3  ;;  %v3043_v57 = vunpack.c.l.b16 %v3027_v1  ;;  %v4190_v50 = vld [vmem:[%s6891_s5 + $0x18] sm:$0xff]  }
 0xdfc   :  { %v3044_v60 = vunpack.c.l.b16 %v3028_v43  ;;  %v3049_v3 = vsel %vm444_vm2, %v3048_v53, %v3047_v2  ;;  %v3052_v34 = vrot.slane %v3041_v20, 2  ;;  %v3542_v25 = vsel %vm3540_vm12, %v3533_v58, %v6296_v40  ;;  %v4193_v2 = vld [vmem:[%s6891_s5 + $0x30] sm:$0xff]  }
 0xdfd   :  { %v3051_v6 = vsel %vm447_vm3, %v3050_v11, %v3049_v3  ;;  %v3054_v24 = vrot.slane %v3042_v18, 1  ;;  %v3550_v27 = vsel %vm3549_vm13, %v3541_v10, %v6477_v19  ;;  %v3551_v12 = vsel %vm3549_vm13, %v3542_v25, %v6480_v41  ;;  %v4188_v19 = vld [vmem:[%s6891_s5 + $0x8] sm:$0xff]   ;;  %v4189_v41 = vld [vmem:[%s6891_s5 + $0x10] sm:$0xff]   ;;  %v7204_v10 = vld [vmem:[#allocation41_spill] sm:$0xff] }
 0xdfe   :  { %v3053_v54 = vsel %vm450_vm4, %v3052_v34, %v3051_v6  ;;  %v3057_v45 = vrot.slane %v3044_v60, 7  ;;  %v3559_v23 = vsel %vm3558_vm14, %v3550_v27, %v6641_v17  ;;  %v3560_v7 = vsel %vm3558_vm14, %v3551_v12, %v6644_v42  ;;  %v7201_v60 = vld [vmem:[#allocation33_spill] sm:$0xff]  ;;  %v7202_v34 = vld [vmem:[#allocation34_spill] sm:$0xff]  ;;  %v7206_v25 = vld [vmem:[#allocation36_spill] sm:$0xff] }
 0xdff   :  { %v3055_v51 = vsel %vm453_vm5, %v3054_v24, %v3053_v54  ;;  %v3567_v0 = vpack.c.bf16 %v3560_v7, %v3559_v23  ;;  %v3447_v28 = vcombine.high %v6572_v9, %v6572_v9  ;;  %v4192_v9 = vld [vmem:[%s6891_s5 + $0x28] sm:$0xff]   ;;  %v3492_v20 = vcombine.high %v6585_v56, %v6585_v56  ;;  %v7209_v7 = vld [vmem:[#allocation42_spill] sm:$0xff] }
 0xe00   :  { %v3056_v61 = vsel %vm456_vm6, %v3043_v57, %v3055_v51  ;;  %v3494_v53 = vcombine.high %v6588_v32, %v6588_v32  ;;  %v7203_v56 = vld [vmem:[#allocation39_spill] sm:$0xff]  ;;  %v4194_v51 = vld [vmem:[%s6891_s5 + $0x38] sm:$0xff]  }
 0xe01   :  { %v3058_v40 = vsel %vm459_vm7, %v3057_v45, %v3056_v61  ;;  %v3461_v30 = vrot.slane %v3447_v28, %v6570_v14  ;;  %v3507_v3 = vsel %vm3504_vm8, %v3492_v20, %v7201_v60  ;;  %v7205_v57 = vld [vmem:[#allocation35_spill] sm:$0xff]  ;;  %v7207_v45 = vld [vmem:[#allocation6_spill] sm:$0xff]  ;;  %v7208_v61 = vld [vmem:[#allocation5_spill] sm:$0xff] }
 0xe02   :  { %v3059_v58 = vpack.c.b16 %v3058_v40, %v3058_v40  ;;  %v3508_v6 = vsel %vm3504_vm8, %v3494_v53, %v7202_v34  ;;  %v3516_v32 = vsel %vm3513_vm9, %v3507_v3, %v7203_v56  ;;  %v7211_v28 = vld [vmem:[#allocation7_spill] sm:$0xff]  ;;  %v6729_v53 = vrot.slane %v6620_v22, 7  ;;  %v7215_v60 = vld [vmem:[#allocation57_spill] sm:$0xff]  ;;  %v7216_v34 = vld [vmem:[#allocation58_spill] sm:$0xff] }
 0xe03   :  { %v3463_v1 = vcombine.high %v3461_v30, %v3461_v30  ;;  %v3477_v18 = vrot.slane %v3461_v30, %v6570_v14  ;;  %v3525_v12 = vsel %vm3522_vm10, %v3516_v32, %v7207_v45  ;;  %v7212_v30 = vld [vmem:[#allocation8_spill] sm:$0xff] }
 0xe04   :  { %3094 = vmatmul.mubr.bf16.vlgmr.msra.gmra.mrb[24].mxu0 %v3059_v58  ;;  %v7210_v58 = vld [vmem:[#allocation43_spill] sm:$0xff]  ;;  %v7220_v45 = vld [vmem:[#allocation12_spill] sm:$0xff] }
 0xe05   :  { %4127 = vmatpush3.bf16.msra.mxu0 %v6551_v48  ;;  %4142 = vmatprep.mubr.bf16.mxu0 %v3567_v0  ;;  %v4191_v48 = vld [vmem:[%s6891_s5 + $0x20] sm:$0xff]   ;;  %v3491_v43 = vrot.slane %v3463_v1, %v6570_v14  ;;  %v3493_v24 = vcombine.high %v3477_v18, %v3477_v18  ;;  %v3517_v14 = vsel %vm3513_vm9, %v3508_v6, %v7204_v10  ;;  %v6715_v0 = vrot.slane %v6615_v55, 7  ;;  %v7213_v1 = vld [vmem:[#allocation55_spill] sm:$0xff] }
 0xe06   :  { %4128 = vmatprep.subr.bf16.mxu0 %v4188_v19  ;;  %v3509_v54 = vsel %vm3504_vm8, %v3477_v18, %v7205_v57  ;;  %v3526_v23 = vsel %vm3522_vm10, %v3517_v14, %v7208_v61  ;;  %v6732_v55 = vrot.slane %v6624_v13, 7  ;;  %v7217_v10 = vld [vmem:[#allocation38_spill] sm:$0xff]  ;;  %v7218_v57 = vld [vmem:[#allocation45_spill] sm:$0xff]  ;;  %v7221_v61 = vld [vmem:[#allocation44_spill] sm:$0xff] }
 0xe07   :  { %v3495_v11 = vcombine.high %v3491_v43, %v3491_v43  ;;  %v3510_v27 = vsel %vm3504_vm8, %v3491_v43, %v7206_v25  ;;  %v3518_v40 = vsel %vm3513_vm9, %v3509_v54, %v7209_v7  ;;  %v7214_v43 = vld [vmem:[#allocation56_spill] sm:$0xff]  ;;  %v6778_v7 = vrot.slane %v6607_v44, 7 }
 0xe08   :  { %v3535_v20 = vsel %vm3531_vm11, %v3526_v23, %v7214_v43 }
 0xe09   :  { %4129 = vmatpush3.bf16.msra.mxu0 %v4188_v19  ;;  %v3519_v19 = vsel %vm3513_vm9, %v3510_v27, %v7210_v58  ;;  %v3544_v18 = vsel %vm3540_vm12, %v3535_v20, %v6303_v15  ;;  %v7219_v27 = vld [vmem:[#allocation37_spill] sm:$0xff]  ;;  %v7224_v58 = vld [vmem:[#allocation59_spill] sm:$0xff] }
 0xe0a   :  { %4130 = vmatprep.subr.bf16.mxu0 %v4189_v41  ;;  %v3553_v13 = vsel %vm3549_vm13, %v3544_v18, %v6487_v16 }
 0xe0d   :  { %4131 = vmatpush3.bf16.msra.mxu0 %v4189_v41  ;;  %v6718_v41 = vrot.slane %v6618_v8, 7 }
 0xe0e   :  { %4132 = vmatprep.subr.bf16.mxu0 %v4190_v50 }
 0xe0f   :  { %v3562_v56 = vsel %vm3558_vm14, %v3553_v13, %v6718_v41 }
 0xe11   :  { %4133 = vmatpush3.bf16.msra.mxu0 %v4190_v50  ;;  %v3527_v50 = vsel %vm3522_vm10, %v3518_v40, %v7211_v28  ;;  %v7223_v40 = vld [vmem:[#allocation9_spill] sm:$0xff] }
 0xe12   :  { %4134 = vmatprep.subr.bf16.mxu0 %v4191_v48  ;;  %v3536_v3 = vsel %vm3531_vm11, %v3527_v50, %v7215_v60 }
 0xe15   :  { %4135 = vmatpush3.bf16.msra.mxu0 %v4191_v48  ;;  %v3528_v48 = vsel %vm3522_vm10, %v3519_v19, %v7212_v30 }
 0xe16   :  { %4136 = vmatprep.subr.bf16.mxu0 %v4192_v9  ;;  %v3537_v6 = vsel %vm3531_vm11, %v3528_v48, %v7216_v34 }
 0xe19   :  { %4137 = vmatpush3.bf16.msra.mxu0 %v4192_v9  ;;  %v3534_v9 = vsel %vm3531_vm11, %v3525_v12, %v7213_v1 }
 0xe1a   :  { %4138 = vmatprep.subr.bf16.mxu0 %v4193_v2  ;;  %v3543_v8 = vsel %vm3540_vm12, %v3534_v9, %v6299_v59  ;;  %v3546_v59 = vsel %vm3540_vm12, %v3537_v6, %v6315_v26  ;;  %v3512_v26 = vsel %vm3504_vm8, %v3495_v11, %v7217_v10  ;;  %v7222_v11 = vld [vmem:[#allocation60_spill] sm:$0xff] }
 0xe1b   :  { %v3552_v22 = vsel %vm3549_vm13, %v3543_v8, %v6483_v29  ;;  %v3555_v29 = vsel %vm3549_vm13, %v3546_v59, %v6495_v21  ;;  %v3521_v54 = vsel %vm3513_vm9, %v3512_v26, %v7218_v57  ;;  %v3511_v21 = vsel %vm3504_vm8, %v3493_v24, %v7219_v27 }
 0xe1c   :  { %v3561_v15 = vsel %vm3558_vm14, %v3552_v22, %v6715_v0  ;;  %v3530_v12 = vsel %vm3522_vm10, %v3521_v54, %v7220_v45  ;;  %v3520_v23 = vsel %vm3513_vm9, %v3511_v21, %v7221_v61 }
 0xe1d   :  { %4139 = vmatpush3.bf16.msra.mxu0 %v4193_v2  ;;  %v3545_v2 = vsel %vm3540_vm12, %v3536_v3, %v6307_v52  ;;  %v3564_v52 = vsel %vm3558_vm14, %v3555_v29, %v6732_v55  ;;  %v3568_v14 = vpack.c.bf16 %v3562_v56, %v3561_v15 }
 0xe1e   :  { %4140 = vmatprep.subr.bf16.mxu0 %v4194_v51  ;;  %v3554_v32 = vsel %vm3549_vm13, %v3545_v2, %v6491_v46  ;;  %v6767_v46 = vrot.slane %v6630_v4, 7  ;;  %v3529_v4 = vsel %vm3522_vm10, %v3520_v23, %v7223_v40  ;;  %v3854_v40 = vld [vmem:[%s6892_s6] ss:$0 sm:$0xff] }
 0xe1f   :  { %v3563_v16 = vsel %vm3558_vm14, %v3554_v32, %v6729_v53  ;;  %v3538_v19 = vsel %vm3531_vm11, %v3529_v4, %v7224_v58 }
 0xe20   :  { %v3569_v25 = vpack.c.bf16 %v3564_v52, %v3563_v16  ;;  %v3547_v50 = vsel %vm3540_vm12, %v3538_v19, %v6311_v63 }
 0xe21   :  { %4141 = vmatpush3.bf16.msra.mxu0 %v4194_v51  ;;  %v3539_v51 = vsel %vm3531_vm11, %v3530_v12, %v7222_v11  ;;  %v3556_v44 = vsel %vm3549_vm13, %v3547_v50, %v6501_v35 }
 0xe22   :  { %v3548_v24 = vsel %vm3540_vm12, %v3539_v51, %v6324_v33  ;;  %v3565_v48 = vsel %vm3558_vm14, %v3556_v44, %v6778_v7 }
 0xe23   :  { %v3557_v28 = vsel %vm3549_vm13, %v3548_v24, %v6508_v5 }
 0xe24   :  { %4143 = vmatmul.mubr.bf16.vlgmr.msra.gmra.mrb[28].mxu0 %v3568_v14  ;;  %v3566_v30 = vsel %vm3558_vm14, %v3557_v28, %v6767_v46 }
 0xe25   :  { %4146 = vmatprep.mubr.bf16.mxu0 %v3569_v25  ;;  %v3570_v1 = vpack.c.bf16 %v3566_v30, %v3565_v48 }
 0xe2c   :  { %4147 = vmatmul.mubr.bf16.gmra.mrb[32].mxu0 %v3570_v1 }
 0xed7   :  { %v3095_v33 = vpop.f32.mrb[24].mxu0 }
 0xed8   :  { %v3104_v9 = vrot.slane %v3095_v33, 1  ;;  %v3106_v43 = vrot.slane %v3095_v33, 2  ;;  %v3108_v20 = vrot.slane %v3095_v33, 3  ;;  %v3110_v8 = vrot.slane %v3095_v33, 4  ;;  %v6796_v5 = vpop.f32.mrb[25].mxu0 }
 0xed9   :  { %v3112_v18 = vrot.slane %v3095_v33, 5  ;;  %v3114_v63 = vrot.slane %v3095_v33, 6  ;;  %v3116_v60 = vrot.slane %v3095_v33, 7  ;;  %v3148_v3 = vadd.f32 %v3095_v33, %v7176_v47  ;;  %v3099_v34 = vpop.f32.mrb[26].mxu0 }
 0xeda   :  { %v3134_v35 = vadd.f32 %v3104_v9, %v5162_v36  ;;  %v3136_v6 = vadd.f32 %v3106_v43, %v5164_v37  ;;  %v3138_v22 = vadd.f32 %v3108_v20, %v5166_v38  ;;  %v3140_v13 = vadd.f32 %v3110_v8, %v5168_v39  ;;  %v3100_v2 = vpop.f32.mrb[27].mxu0 }
 0xedb   :  { %v3142_v59 = vadd.f32 %v3112_v18, %v7174_v49  ;;  %v3144_v15 = vadd.f32 %v3114_v63, %v7124_v31  ;;  %v3852_v56 = vmul.f32 -1.442695, %v3148_v3  ;;  %v3146_v32 = vadd.f32 %v3116_v60, %v7175_v62 }
 0xedc   :  { %v3838_v29 = vmul.f32 -1.442695, %v3134_v35  ;;  %v3840_v16 = vmul.f32 -1.442695, %v3136_v6  ;;  %v3842_v47 = vmul.f32 -1.442695, %v3138_v22 }
 0xedd   :  { %v3844_v52 = vmul.f32 -1.442695, %v3140_v13  ;;  %4755 = vpow2.f32 %v3852_v56  ;;  %v3846_v36 = vmul.f32 -1.442695, %v3142_v59  ;;  %v3848_v37 = vmul.f32 -1.442695, %v3144_v15 }
 0xede   :  { %4757 = vpow2.f32 %v3838_v29  ;;  %v3850_v38 = vmul.f32 -1.442695, %v3146_v32 }
 0xedf   :  { %4759 = vpow2.f32 %v3840_v16 }
 0xee0   :  { %4761 = vpow2.f32 %v3842_v47 }
 0xee1   :  { %4763 = vpow2.f32 %v3844_v52 }
 0xee2   :  { %4765 = vpow2.f32 %v3846_v36 }
 0xee3   :  { %4767 = vpow2.f32 %v3848_v37 }
 0xee4   :  { %4769 = vpow2.f32 %v3850_v38 }
 0xee7   :  { %v4756_v39 = vpop.eup %4755 }
 0xee8   :  { %v4758_v31 = vpop.eup %4757  ;;  %v3212_v49 = vadd.f32 1.0, %v4756_v39 }
 0xee9   :  { %v4760_v10 = vpop.eup %4759  ;;  %v3198_v62 = vadd.f32 1.0, %v4758_v31 }
 0xeea   :  { %v4762_v26 = vpop.eup %4761  ;;  %v3200_v14 = vadd.f32 1.0, %v4760_v10  ;;  %4771 = vrcp.f32 %v3212_v49 }
 0xeeb   :  { %v4764_v57 = vpop.eup %4763  ;;  %v3202_v54 = vadd.f32 1.0, %v4762_v26  ;;  %4773 = vrcp.f32 %v3198_v62 }
 0xeec   :  { %v4766_v25 = vpop.eup %4765  ;;  %v3204_v27 = vadd.f32 1.0, %v4764_v57  ;;  %4775 = vrcp.f32 %v3200_v14 }
 0xeed   :  { %v4768_v21 = vpop.eup %4767  ;;  %v3206_v45 = vadd.f32 1.0, %v4766_v25  ;;  %4777 = vrcp.f32 %v3202_v54 }
 0xeee   :  { %v4770_v12 = vpop.eup %4769  ;;  %v3208_v61 = vadd.f32 1.0, %v4768_v21  ;;  %4779 = vrcp.f32 %v3204_v27 }
 0xeef   :  { %v3210_v23 = vadd.f32 1.0, %v4770_v12  ;;  %4781 = vrcp.f32 %v3206_v45 }
 0xef0   :  { %4783 = vrcp.f32 %v3208_v61 }
 0xef1   :  { %4785 = vrcp.f32 %v3210_v23 }
 0xef4   :  { %v4772_v11 = vpop.eup %4771 }
 0xef5   :  { %v4774_v51 = vpop.eup %4773  ;;  %v3277_v47 = vmul.f32 %v4772_v11, %v6767_v46 }
 0xef6   :  { %v4776_v4 = vpop.eup %4775  ;;  %v3270_v24 = vmul.f32 %v4774_v51, %v6641_v17 }
 0xef7   :  { %v4778_v58 = vpop.eup %4777  ;;  %v4144_v19 = vpop.f32.mrb[28].mxu0  ;;  %v3271_v28 = vmul.f32 %v4776_v4, %v6644_v42  ;;  %v3285_v21 = vpack.c.bf16 %v3277_v47, %v3277_v47  ;;  %v7232_v47 = vld [vmem:[#allocation20_spill] sm:$0xff] }
 0xef8   :  { %v4780_v50 = vpop.eup %4779  ;;  %v3668_v30 = vadd.f32 %v4144_v19, %v3854_v40  ;;  %v3659_v44 = vpop.f32.mrb[29].mxu0  ;;  %v3272_v48 = vmul.f32 %v4778_v58, %v6715_v0  ;;  %v3278_v1 = vpack.c.bf16 %v3270_v24, %v3270_v24 }
 0xef9   :  { %v4782_v33 = vpop.eup %4781  ;;  %v3660_v9 = vadd.f32 %v3854_v40, %v3659_v44  ;;  %v4145_v43 = vpop.f32.mrb[30].mxu0  ;;  %v3273_v20 = vmul.f32 %v4780_v50, %v6718_v41  ;;  %v3279_v8 = vpack.c.bf16 %v3271_v28, %v3271_v28  ;;  %v3301_v58 = vunpack.c.l.b16 %v3285_v21 }
 0xefa   :  { %v4784_v18 = vpop.eup %4783  ;;  %3692 = vst [vmem:[%s6893_s7 + $0x10] sm:$0xff] %v3668_v30  ;;  %v3671_v63 = vadd.f32 %v4145_v43, %v3854_v40  ;;  %v3662_v60 = vpop.f32.mrb[31].mxu0  ;;  %v3274_v3 = vmul.f32 %v4782_v33, %v6729_v53  ;;  %v3280_v34 = vpack.c.bf16 %v3272_v48, %v3272_v48  ;;  %v3294_v35 = vunpack.c.l.b16 %v3278_v1  ;;  %v7225_v33 = vld [vmem:[#allocation22_spill] sm:$0xff] }
 0xefb   :  { %v4786_v6 = vpop.eup %4785  ;;  %3690 = vst [vmem:[%s6893_s7] sm:$0xff] %v3660_v9  ;;  %v3663_v22 = vadd.f32 %v3854_v40, %v3662_v60  ;;  %v3275_v13 = vmul.f32 %v4784_v18, %v6732_v55  ;;  %v3281_v2 = vpack.c.bf16 %v3273_v20, %v3273_v20  ;;  %v3295_v59 = vunpack.c.l.b16 %v3279_v8  ;;  %v7226_v20 = vld [vmem:[#allocation15_spill] sm:$0xff] }
 0xefc   :  { %3693 = vst [vmem:[%s6893_s7 + $0x18] sm:$0xff] %v3671_v63  ;;  %v3276_v15 = vmul.f32 %v4786_v6, %v6778_v7  ;;  %v3282_v56 = vpack.c.bf16 %v3274_v3, %v3274_v3  ;;  %v3296_v32 = vunpack.c.l.b16 %v3280_v34  ;;  %v3302_v16 = vrot.slane %v3294_v35, 7  ;;  %v7227_v63 = vld [vmem:[#allocation16_spill] sm:$0xff]  ;;  %v7228_v3 = vld [vmem:[#allocation17_spill] sm:$0xff] }
 0xefd   :  { %3691 = vst [vmem:[%s6893_s7 + $0x8] sm:$0xff] %v3663_v22  ;;  %v3283_v29 = vpack.c.bf16 %v3275_v13, %v3275_v13  ;;  %v3297_v36 = vunpack.c.l.b16 %v3281_v2  ;;  %v3303_v37 = vrot.slane %v3295_v59, 6  ;;  %v3105_v30 = vrot.slane %v6796_v5, 1  ;;  %v7229_v6 = vld [vmem:[#allocation21_spill] sm:$0xff]  ;;  %v7230_v2 = vld [vmem:[#allocation18_spill] sm:$0xff] }
 0xefe   :  { %v3284_v52 = vpack.c.bf16 %v3276_v15, %v3276_v15  ;;  %v3298_v39 = vunpack.c.l.b16 %v3282_v56  ;;  %v3305_v31 = vrot.slane %v3296_v32, 5  ;;  %v3107_v44 = vrot.slane %v6796_v5, 2  ;;  %v7231_v56 = vld [vmem:[#allocation19_spill] sm:$0xff] }
 0xeff   :  { %v4148_v38 = vpop.f32.mrb[32].mxu0  ;;  %v3299_v62 = vunpack.c.l.b16 %v3283_v29  ;;  %v3304_v54 = vsel %vm441_vm1, %v3303_v37, %v3302_v16  ;;  %v3307_v12 = vrot.slane %v3297_v36, 4  ;;  %v3109_v48 = vrot.slane %v6796_v5, 3 }
 0xf00   :  { %v3684_v49 = vadd.f32 %v4148_v38, %v3854_v40  ;;  %v3675_v10 = vpop.f32.mrb[33].mxu0  ;;  %v3300_v57 = vunpack.c.l.b16 %v3284_v52  ;;  %v3306_v45 = vsel %vm444_vm2, %v3305_v31, %v3304_v54  ;;  %v3309_v23 = vrot.slane %v3298_v39, 3 }
 0xf01   :  { %v3676_v26 = vadd.f32 %v3854_v40, %v3675_v10  ;;  %v4149_v14 = vpop.f32.mrb[34].mxu0  ;;  %v3308_v11 = vsel %vm447_vm3, %v3307_v12, %v3306_v45  ;;  %v3311_v51 = vrot.slane %v3299_v62, 2  ;;  %v3111_v1 = vrot.slane %v6796_v5, 4 }
 0xf02   :  { %3696 = vst [vmem:[%s6893_s7 + $0x30] sm:$0xff] %v3684_v49  ;;  %v3687_v25 = vadd.f32 %v4149_v14, %v3854_v40  ;;  %v3678_v27 = vpop.f32.mrb[35].mxu0  ;;  %v3310_v4 = vsel %vm450_vm4, %v3309_v23, %v3308_v11  ;;  %v3313_v24 = vrot.slane %v3300_v57, 1  ;;  %v3135_v9 = vadd.f32 %v3105_v30, %v7225_v33 }
 0xf03   :  { %3694 = vst [vmem:[%s6893_s7 + $0x20] sm:$0xff] %v3676_v26  ;;  %v3679_v61 = vadd.f32 %v3854_v40, %v3678_v27  ;;  %v3312_v19 = vsel %vm453_vm5, %v3311_v51, %v3310_v4  ;;  %v3113_v43 = vrot.slane %v6796_v5, 5  ;;  %v3137_v8 = vadd.f32 %v3107_v44, %v7226_v20  ;;  %v7236_v20 = vld [vmem:[#allocation25_spill] sm:$0xff] }
 0xf04   :  { %3697 = vst [vmem:[%s6893_s7 + $0x38] sm:$0xff] %v3687_v25  ;;  %v3314_v40 = vsel %vm456_vm6, %v3313_v24, %v3312_v19  ;;  %v3115_v18 = vrot.slane %v6796_v5, 6  ;;  %v3139_v60 = vadd.f32 %v3109_v48, %v7227_v63  ;;  %v3141_v34 = vadd.f32 %v3111_v1, %v7228_v3  ;;  %v7234_v1 = vld [vmem:[#allocation23_spill] sm:$0xff] }
 0xf05   :  { %3695 = vst [vmem:[%s6893_s7 + $0x28] sm:$0xff] %v3679_v61  ;;  %v3315_v28 = vsel %vm459_vm7, %v3301_v58, %v3314_v40  ;;  %v3117_v35 = vrot.slane %v6796_v5, 7  ;;  %v3149_v22 = vadd.f32 %v6796_v5, %v7229_v6  ;;  %v3839_v13 = vmul.f32 -1.442695, %v3135_v9  ;;  %v7235_v9 = vld [vmem:[#allocation24_spill] sm:$0xff] }
 0xf06   :  { %v3316_v50 = vpack.c.b16 %v3315_v28, %v3315_v28  ;;  %v3143_v59 = vadd.f32 %v3113_v43, %v7230_v2  ;;  %v3841_v15 = vmul.f32 -1.442695, %v3137_v8  ;;  %v3145_v32 = vadd.f32 %v3115_v18, %v7231_v56 }
 0xf07   :  { %v3843_v29 = vmul.f32 -1.442695, %v3139_v60  ;;  %v3845_v16 = vmul.f32 -1.442695, %v3141_v34  ;;  %v3147_v52 = vadd.f32 %v3117_v35, %v7232_v47  ;;  %4787 = vpow2.f32 %v3839_v13  ;;  %v7237_v60 = vld [vmem:[#allocation26_spill] sm:$0xff]  ;;  %v7238_v35 = vld [vmem:[#allocation27_spill] sm:$0xff] }
 0xf08   :  { %4123 = vmatmul.mubr.bf16.vlgmr.msra.gmra.mrb[32].mxu1 %v3316_v50  ;;  %v3853_v36 = vmul.f32 -1.442695, %v3149_v22  ;;  %4789 = vpow2.f32 %v3841_v15  ;;  %v3847_v37 = vmul.f32 -1.442695, %v3143_v59  ;;  %v3849_v38 = vmul.f32 -1.442695, %v3145_v32 }
 0xf09   :  { %4791 = vpow2.f32 %v3843_v29  ;;  %v3851_v39 = vmul.f32 -1.442695, %v3147_v52  ;;  %v7233_v50 = vld [vmem:[#allocation30_spill] sm:$0xff]  ;;  %v7239_v13 = vld [vmem:[#allocation28_spill] sm:$0xff]  ;;  %v7240_v15 = vld [vmem:[#allocation29_spill] sm:$0xff] }
 0xf0a   :  { %4793 = vpow2.f32 %v3845_v16 }
 0xf0b   :  { %4795 = vpow2.f32 %v3853_v36 }
 0xf0c   :  { %4797 = vpow2.f32 %v3847_v37 }
 0xf0d   :  { %4799 = vpow2.f32 %v3849_v38 }
 0xf0e   :  { %4801 = vpow2.f32 %v3851_v39 }
 0xf11   :  { %v4788_v5 = vpop.eup %4787 }
 0xf12   :  { %v4790_v31 = vpop.eup %4789  ;;  %v3199_v62 = vadd.f32 1.0, %v4788_v5 }
 0xf13   :  { %v4792_v49 = vpop.eup %4791  ;;  %v3201_v14 = vadd.f32 1.0, %v4790_v31 }
 0xf14   :  { %v4794_v10 = vpop.eup %4793  ;;  %v3203_v54 = vadd.f32 1.0, %v4792_v49  ;;  %4803 = vrcp.f32 %v3199_v62 }
 0xf15   :  { %v4796_v26 = vpop.eup %4795  ;;  %v3205_v27 = vadd.f32 1.0, %v4794_v10  ;;  %4805 = vrcp.f32 %v3201_v14 }
 0xf16   :  { %v4798_v57 = vpop.eup %4797  ;;  %v3213_v21 = vadd.f32 1.0, %v4796_v26  ;;  %4807 = vrcp.f32 %v3203_v54 }
 0xf17   :  { %v4800_v25 = vpop.eup %4799  ;;  %v3207_v12 = vadd.f32 1.0, %v4798_v57  ;;  %4809 = vrcp.f32 %v3205_v27 }
 0xf18   :  { %v4802_v45 = vpop.eup %4801  ;;  %v3209_v61 = vadd.f32 1.0, %v4800_v25  ;;  %4811 = vrcp.f32 %v3213_v21 }
 0xf19   :  { %v3211_v23 = vadd.f32 1.0, %v4802_v45  ;;  %4813 = vrcp.f32 %v3207_v12 }
 0xf1a   :  { %4815 = vrcp.f32 %v3209_v61 }
 0xf1b   :  { %4817 = vrcp.f32 %v3211_v23 }
 0xf1e   :  { %v4804_v63 = vpop.eup %4803 }
 0xf1f   :  { %v4806_v34 = vpop.eup %4805  ;;  %v3390_v36 = vsub.f32 1.0, %v4804_v63 }
 0xf20   :  { %v4808_v22 = vpop.eup %4807  ;;  %v3391_v37 = vsub.f32 1.0, %v4806_v34 }
 0xf21   :  { %v4810_v59 = vpop.eup %4809  ;;  %v3392_v39 = vsub.f32 1.0, %v4808_v22  ;;  %v3398_v14 = vmul.f32 %v3390_v36, %v6641_v17 }
 0xf22   :  { %v4812_v32 = vpop.eup %4811  ;;  %v3393_v31 = vsub.f32 1.0, %v4810_v59  ;;  %v3399_v27 = vmul.f32 %v3391_v37, %v6644_v42 }
 0xf23   :  { %v4814_v29 = vpop.eup %4813  ;;  %v3397_v47 = vsub.f32 1.0, %v4812_v32  ;;  %v3400_v23 = vmul.f32 %v3392_v39, %v6715_v0 }
 0xf24   :  { %v4816_v16 = vpop.eup %4815  ;;  %v3394_v26 = vsub.f32 1.0, %v4814_v29 }
 0xf25   :  { %v4818_v52 = vpop.eup %4817  ;;  %v3405_v49 = vmul.f32 %v3397_v47, %v6767_v46  ;;  %v3395_v25 = vsub.f32 1.0, %v4816_v16  ;;  %v3401_v46 = vmul.f32 %v3393_v31, %v6718_v41 }
 0xf26   :  { %v3396_v61 = vsub.f32 1.0, %v4818_v52  ;;  %v3402_v17 = vmul.f32 %v3394_v26, %v6729_v53 }
 0xf28   :  { %v3404_v0 = vmul.f32 %v3396_v61, %v6778_v7 }
 0xfdb   :  { %v3352_v11 = vpop.f32.mrb[32].mxu1 }
 0xfdc   :  { %v3359_v51 = vrot.slane %v3352_v11, 1  ;;  %v3360_v4 = vrot.slane %v3352_v11, 2  ;;  %v3361_v24 = vrot.slane %v3352_v11, 3  ;;  %v3362_v58 = vrot.slane %v3352_v11, 4  ;;  %v4124_v19 = vpop.f32.mrb[33].mxu1 }
 0xfdd   :  { %v3363_v40 = vrot.slane %v3352_v11, 5  ;;  %v3364_v28 = vrot.slane %v3352_v11, 6  ;;  %v3381_v30 = vadd.f32 %v7233_v50, %v3352_v11  ;;  %v3355_v44 = vpop.f32.mrb[34].mxu1  ;;  %v3365_v48 = vrot.slane %v3352_v11, 7 }
 0xfde   :  { %v3374_v33 = vadd.f32 %v7234_v1, %v3359_v51  ;;  %v3375_v43 = vadd.f32 %v7235_v9, %v3360_v4  ;;  %v3376_v8 = vadd.f32 %v7236_v20, %v3361_v24  ;;  %v4125_v18 = vpop.f32.mrb[35].mxu1  ;;  %v3377_v3 = vadd.f32 %v7237_v60, %v3362_v58 }
 0xfdf   :  { %4819 = vtanh.f32 %v3381_v30  ;;  %v3378_v6 = vadd.f32 %v7238_v35, %v3363_v40  ;;  %v3379_v2 = vadd.f32 %v7239_v13, %v3364_v28  ;;  %v3380_v56 = vadd.f32 %v7240_v15, %v3365_v48 }
 0xfe0   :  { %4821 = vtanh.f32 %v3374_v33  ;;  %v3403_v50 = vmul.f32 %v3395_v25, %v6732_v55 }
 0xfe1   :  { %4823 = vtanh.f32 %v3375_v43 }
 0xfe2   :  { %4825 = vtanh.f32 %v3376_v8 }
 0xfe3   :  { %4827 = vtanh.f32 %v3377_v3 }
 0xfe4   :  { %4829 = vtanh.f32 %v3378_v6 }
 0xfe5   :  { %4831 = vtanh.f32 %v3379_v2 }
 0xfe6   :  { %4833 = vtanh.f32 %v3380_v56 }
 0xfe9   :  { %v4820_v38 = vpop.eup %4819 }
 0xfea   :  { %v4822_v5 = vpop.eup %4821  ;;  %v3413_v10 = vmul.f32 %v4820_v38, %v4812_v32 }
 0xfeb   :  { %v4824_v62 = vpop.eup %4823  ;;  %v3406_v57 = vmul.f32 %v4822_v5, %v4804_v63 }
 0xfec   :  { %v4826_v54 = vpop.eup %4825  ;;  %v3407_v21 = vmul.f32 %v4824_v62, %v4806_v34  ;;  %v3421_v45 = vadd.f32 %v3413_v10, %v3405_v49 }
 0xfed   :  { %v4828_v12 = vpop.eup %4827  ;;  %v3408_v11 = vmul.f32 %v4826_v54, %v4808_v22  ;;  %v3414_v51 = vadd.f32 %v3406_v57, %v3398_v14 }
 0xfee   :  { %v4830_v4 = vpop.eup %4829  ;;  %v3409_v24 = vmul.f32 %v4828_v12, %v4810_v59  ;;  %v3415_v58 = vadd.f32 %v3407_v21, %v3399_v27  ;;  %v3441_v34 = vrot.slane %v3421_v45, 1 }
 0xfef   :  { %v4832_v19 = vpop.eup %4831  ;;  %v3410_v40 = vmul.f32 %v4830_v4, %v4814_v29  ;;  %v3416_v28 = vadd.f32 %v3408_v11, %v3400_v23  ;;  %3445 = vst [vmem:[#allocation2 - $0x7] sm:$0x80] %v3414_v51 }
 0xff0   :  { %v4834_v42 = vpop.eup %4833  ;;  %v3411_v30 = vmul.f32 %v4832_v19, %v4816_v16  ;;  %v3417_v44 = vadd.f32 %v3409_v24, %v3401_v46  ;;  %v3430_v48 = vrot.slane %v3415_v58, 7 }
 0xff1   :  { %v3412_v1 = vmul.f32 %v4834_v42, %v4818_v52  ;;  %v3418_v33 = vadd.f32 %v3410_v40, %v3402_v17  ;;  %v3431_v9 = vrot.slane %v3416_v28, 6 }
 0xff2   :  { %v3419_v41 = vadd.f32 %v3411_v30, %v3403_v50  ;;  %v3433_v43 = vrot.slane %v3417_v44, 5 }
 0xff3   :  { %v3420_v20 = vadd.f32 %v3412_v1, %v3404_v0  ;;  %v3432_v8 = vsel %vm441_vm1, %v3431_v9, %v3430_v48  ;;  %v3435_v53 = vrot.slane %v3418_v33, 4 }
 0xff4   :  { %v3434_v18 = vsel %vm444_vm2, %v3433_v43, %v3432_v8  ;;  %v3437_v63 = vrot.slane %v3419_v41, 3 }
 0xff5   :  { %v3436_v60 = vsel %vm447_vm3, %v3435_v53, %v3434_v18  ;;  %v3439_v55 = vrot.slane %v3420_v20, 2 }
 0xff6   :  { %v3438_v3 = vsel %vm450_vm4, %v3437_v63, %v3436_v60 }
 0xff7   :  { %v3440_v7 = vsel %vm453_vm5, %v3439_v55, %v3438_v3 }
 0xff8   :  { %v3442_v35 = vsel %vm456_vm6, %v3441_v34, %v3440_v7 }
 0xff9   :  { %3446 = vst [vmem:[#allocation2 + $0x1] sm:$0x7f] %v3442_v35 }

</bundles_post_ra>
